<compile_context>
chip_gen: v6e
topology: v6e:2x2x1
jax: 0.10.0
libtpu: 0.0.40
codegen_flags: <defaults>
</compile_context>

<pallas_src>
import jax
import jax.numpy as jnp
from jax.experimental import pallas as pl
from jax.experimental.pallas import tpu as pltpu


def _round_up(x, m):
    return (x + m - 1) // m * m


# ----------------------------------------------------------------------------
# Fused Conv3d(k=3, s=1, p=1) + bias + ReLU + MaxPool3d(2, 2) as ONE matmul.
#
# Wrapper builds a phase-major im2col slab of shape (8*B*M, Kp) with
#   M  = (D/2)*(H/2)*(W/2)   (pooled output positions per batch item)
#   Kp = round_up(27*Cin, 128)
# Kernel: one fat-K MXU matmul (f32 accumulate), then a running max over the
# 8 phase slabs (VPU), then bias + ReLU (f32) and a bf16 store.  Since the
# bias is identical across phases and ReLU is monotone,
#   pool(relu(conv + b)) == relu(max_over_phases(conv) + b).
# ----------------------------------------------------------------------------
def conv3d_relu_maxpool(x, w, b):
    # x: (B, D, H, W, Cin), f32 or bf16, D/H/W even
    # w: (3, 3, 3, Cin, Cout) f32     b: (Cout,) f32
    B, D, H, W, Cin = x.shape
    Cout = w.shape[-1]
    Do, Ho, Wo = D // 2, H // 2, W // 2
    M = Do * Ho * Wo
    BM = B * M
    K = 27 * Cin
    Kp = _round_up(K, 128)

    # ---- wrapper-side im2col (XLA glue), phase-major -------------------------
    # TODO(synk): at real 224x224 shapes, build the patches in-kernel from an
    # un-duplicated halo'd VMEM tile (spatial M-tile grid axis) instead of
    # materializing the 27x-duplicated im2col tensor in HBM.
    xb = x if x.dtype == jnp.bfloat16 else x.astype(jnp.bfloat16)
    xp = jnp.pad(xb, ((0, 0), (1, 1), (1, 1), (1, 1), (0, 0)))   # zero pad = 1
    cols = [xp[:, kd:kd + D, kh:kh + H, kw:kw + W, :]
            for kd in range(3) for kh in range(3) for kw in range(3)]
    if Kp != K:  # zero lanes so the MXU contraction is lane-aligned / unmasked
        cols.append(jnp.zeros((B, D, H, W, Kp - K), jnp.bfloat16))
    pat = jnp.concatenate(cols, axis=-1)                          # (B,D,H,W,Kp)
    # phase-major rows: (pd, ph, pw, b, do, ho, wo)
    pat = pat.reshape(B, Do, 2, Ho, 2, Wo, 2, Kp)
    pat = jnp.transpose(pat, (2, 4, 6, 0, 1, 3, 5, 7))
    pat = pat.reshape(8 * BM, Kp)

    wmat = w.reshape(K, Cout).astype(jnp.bfloat16)                # rows=(kd,kh,kw,ci)
    if Kp != K:
        wmat = jnp.concatenate(
            [wmat, jnp.zeros((Kp - K, Cout), jnp.bfloat16)], axis=0)
    brow = b.reshape(1, Cout).astype(jnp.float32)

    def kernel(pat_ref, w_ref, b_ref, o_ref):
        # One fat-K matmul covering all batches and all 8 pool phases.
        r = jnp.dot(pat_ref[...], w_ref[...],
                    preferred_element_type=jnp.float32)           # (8*BM, Cout) f32
        # 2x2x2 max-pool = running max over the 8 phase slabs (static,
        # sublane-aligned slices; pure VPU work in f32).
        acc = r[0:BM]
        for p in range(1, 8):
            acc = jnp.maximum(acc, r[p * BM:(p + 1) * BM])
        # bias + ReLU commute with the phase max; cast to bf16 only at store.
        o_ref[...] = jnp.maximum(acc + b_ref[...], 0.0).astype(o_ref.dtype)

    out = pl.pallas_call(
        kernel,
        out_shape=jax.ShapeDtypeStruct((BM, Cout), jnp.bfloat16),
        compiler_params=pltpu.CompilerParams(
            vmem_limit_bytes=32 * 1024 * 1024),
    )(pat, wmat, brow)
    # rows are (b, do, ho, wo)-major -> metadata-only reshape
    return out.reshape(B, Do, Ho, Wo, Cout)


# ----------------------------------------------------------------------------
# Fused MLP head: relu(x @ W1 + b1) @ W2 + b2 in one Pallas kernel.
# Matmuls in bf16 with f32 accumulation; bias/ReLU in f32.
# ----------------------------------------------------------------------------
def mlp_head(x, w1, b1, w2, b2):
    # x: (B, F) (bf16 from the conv stack)  w1: (F, Hd)  w2: (Hd, num_classes)
    # TODO(synk): at the real 224x224 shape (feat=200704, ~51 MB bf16) w1 must
    # be K-tiled over a grid axis with an f32 accumulator; a single resident
    # block only fits at the small shapes exercised here.
    def kernel(x_ref, w1_ref, b1_ref, w2_ref, b2_ref, o_ref):
        h = jnp.dot(x_ref[...], w1_ref[...],
                    preferred_element_type=jnp.float32) + b1_ref[...]
        h = jnp.maximum(h, 0.0)
        o_ref[...] = jnp.dot(h.astype(jnp.bfloat16), w2_ref[...],
                             preferred_element_type=jnp.float32) + b2_ref[...]

    xb = x if x.dtype == jnp.bfloat16 else x.astype(jnp.bfloat16)
    return pl.pallas_call(
        kernel,
        out_shape=jax.ShapeDtypeStruct((x.shape[0], w2.shape[1]), jnp.float32),
        compiler_params=pltpu.CompilerParams(
            vmem_limit_bytes=32 * 1024 * 1024),
    )(xb, w1.astype(jnp.bfloat16), b1.reshape(1, -1).astype(jnp.float32),
      w2.astype(jnp.bfloat16), b2.reshape(1, -1).astype(jnp.float32))


# ----------------------------------------------------------------------------
# Parameters (deterministic synthetic init, same shapes as the nn.Module).
# Conv weights stored as (kd, kh, kw, Cin, Cout); fc1 weight rows are permuted
# ONCE from torch's (C, D, H, W) flatten order to the channels-last
# (D, H, W, C) flatten order the kernels produce, so no runtime transpose is
# needed before fc1.
# ----------------------------------------------------------------------------
def init_params(key, D, H, W, num_classes=2):
    k1, k2, k3, k4 = jax.random.split(key, 4)
    Do, Ho, Wo = D // 4, H // 4, W // 4
    feat = 64 * Do * Ho * Wo

    def uinit(k, shape, fan_in):
        bound = 1.0 / jnp.sqrt(float(fan_in))
        return jax.random.uniform(k, shape, jnp.float32, -bound, bound)

    fc1_w_torch = uinit(k3, (feat, 128), feat)              # rows in (C,D,H,W) order
    idx = jnp.arange(feat).reshape(64, Do, Ho, Wo)          # idx[c,d,h,w] = torch row
    perm = jnp.transpose(idx, (1, 2, 3, 0)).reshape(-1)     # channels-last row order
    fc1_w = fc1_w_torch[perm]

    return dict(
        conv1_w=uinit(k1, (3, 3, 3, 3, 32), 3 * 27),
        conv1_b=jnp.zeros((32,), jnp.float32),
        conv2_w=uinit(k2, (3, 3, 3, 32, 64), 32 * 27),
        conv2_b=jnp.zeros((64,), jnp.float32),
        fc1_w=fc1_w,
        fc1_b=jnp.zeros((128,), jnp.float32),
        fc2_w=uinit(k4, (128, num_classes), 128),
        fc2_b=jnp.zeros((num_classes,), jnp.float32),
    )


@jax.jit
def pig_action_3dcnn_forward(x_ncdhw, params):
    # NCDHW -> channels-last for the kernels (small, one-time per call).
    x = jnp.transpose(x_ncdhw, (0, 2, 3, 4, 1)).astype(jnp.float32)

    x = conv3d_relu_maxpool(x, params["conv1_w"], params["conv1_b"])  # (B,D/2,H/2,W/2,32) bf16
    x = conv3d_relu_maxpool(x, params["conv2_w"], params["conv2_b"])  # (B,D/4,H/4,W/4,64) bf16

    # Channels-last flatten (metadata-only); fc1_w rows were pre-permuted to
    # match this order, so no cross-lane transpose is needed here.
    x = x.reshape(x.shape[0], -1)

    return mlp_head(x, params["fc1_w"], params["fc1_b"],
                    params["fc2_w"], params["fc2_b"])


if __name__ == "__main__":
    key = jax.random.PRNGKey(0)
    kx, kp = jax.random.split(key)

    B, C, D, H, W = 2, 3, 4, 16, 16
    x = jax.random.normal(kx, (B, C, D, H, W), jnp.float32)
    params = init_params(kp, D, H, W, num_classes=2)

    out = pig_action_3dcnn_forward(x, params)
    out = jax.block_until_ready(out)
    assert out.shape == (B, 2) and out.dtype == jnp.float32
    print("KERNEL_OK")
</pallas_src>

<mosaic_0001>
module attributes {stable_mosaic.version = 11 : i64} {
  func.func @kernel(%arg0: memref<2048x128xbf16, #tpu.memory_space<vmem>>, %arg1: memref<128x32xbf16, #tpu.memory_space<vmem>>, %arg2: memref<1x32xf32, #tpu.memory_space<vmem>>, %arg3: memref<256x32xbf16, #tpu.memory_space<vmem>>) attributes {dimension_semantics = [], scalar_prefetch = 0 : i64, scratch_operands = 0 : i64, tpu.core_type = #tpu.core_type<tc>} {
    %c0 = arith.constant 0 : index
    %c0_0 = arith.constant 0 : index
    %0 = vector.load %arg0[%c0, %c0_0] : memref<2048x128xbf16, #tpu.memory_space<vmem>>, vector<2048x128xbf16>
    %c0_1 = arith.constant 0 : index
    %c0_2 = arith.constant 0 : index
    %1 = vector.load %arg1[%c0_1, %c0_2] : memref<128x32xbf16, #tpu.memory_space<vmem>>, vector<128x32xbf16>
    %cst = arith.constant dense<0.000000e+00> : vector<2048x32xf32>
    %2 = tpu.matmul %0, %1, %cst {dimension_numbers = #tpu.dot_dimension_numbers<[1], [0], [0], [1], [0, 0, 1, 1], [], []>} : vector<2048x128xbf16>, vector<128x32xbf16>, vector<2048x32xf32> -> vector<2048x32xf32>
    %3 = vector.extract_strided_slice %2 {offsets = [0, 0], sizes = [256, 32], strides = [1, 1]} : vector<2048x32xf32> to vector<256x32xf32>
    %4 = vector.extract_strided_slice %2 {offsets = [256, 0], sizes = [256, 32], strides = [1, 1]} : vector<2048x32xf32> to vector<256x32xf32>
    %5 = arith.maximumf %3, %4 : vector<256x32xf32>
    %6 = vector.extract_strided_slice %2 {offsets = [512, 0], sizes = [256, 32], strides = [1, 1]} : vector<2048x32xf32> to vector<256x32xf32>
    %7 = arith.maximumf %5, %6 : vector<256x32xf32>
    %8 = vector.extract_strided_slice %2 {offsets = [768, 0], sizes = [256, 32], strides = [1, 1]} : vector<2048x32xf32> to vector<256x32xf32>
    %9 = arith.maximumf %7, %8 : vector<256x32xf32>
    %10 = vector.extract_strided_slice %2 {offsets = [1024, 0], sizes = [256, 32], strides = [1, 1]} : vector<2048x32xf32> to vector<256x32xf32>
    %11 = arith.maximumf %9, %10 : vector<256x32xf32>
    %12 = vector.extract_strided_slice %2 {offsets = [1280, 0], sizes = [256, 32], strides = [1, 1]} : vector<2048x32xf32> to vector<256x32xf32>
    %13 = arith.maximumf %11, %12 : vector<256x32xf32>
    %14 = vector.extract_strided_slice %2 {offsets = [1536, 0], sizes = [256, 32], strides = [1, 1]} : vector<2048x32xf32> to vector<256x32xf32>
    %15 = arith.maximumf %13, %14 : vector<256x32xf32>
    %16 = vector.extract_strided_slice %2 {offsets = [1792, 0], sizes = [256, 32], strides = [1, 1]} : vector<2048x32xf32> to vector<256x32xf32>
    %17 = arith.maximumf %15, %16 : vector<256x32xf32>
    %c0_3 = arith.constant 0 : index
    %c0_4 = arith.constant 0 : index
    %18 = vector.load %arg2[%c0_3, %c0_4] : memref<1x32xf32, #tpu.memory_space<vmem>>, vector<1x32xf32>
    %19 = vector.broadcast %18 : vector<1x32xf32> to vector<256x32xf32>
    %20 = arith.addf %17, %19 : vector<256x32xf32>
    %cst_5 = arith.constant 0.000000e+00 : f32
    %21 = vector.broadcast %cst_5 : f32 to vector<256x32xf32>
    %22 = arith.maximumf %20, %21 : vector<256x32xf32>
    %23 = arith.truncf %22 : vector<256x32xf32> to vector<256x32xbf16>
    %c0_6 = arith.constant 0 : index
    %c0_7 = arith.constant 0 : index
    %24 = vector.load %arg3[%c0_6, %c0_7] : memref<256x32xbf16, #tpu.memory_space<vmem>>, vector<256x32xbf16>
    tpu.vector_store %arg3[%c0_6, %c0_7], %23 {strides = array<i32>} : memref<256x32xbf16, #tpu.memory_space<vmem>>, vector<256x32xbf16>,
    return
  }
}

module attributes {stable_mosaic.version = 11 : i64} {
  func.func @kernel(%arg0: memref<256x896xbf16, #tpu.memory_space<vmem>>, %arg1: memref<896x64xbf16, #tpu.memory_space<vmem>>, %arg2: memref<1x64xf32, #tpu.memory_space<vmem>>, %arg3: memref<32x64xbf16, #tpu.memory_space<vmem>>) attributes {dimension_semantics = [], scalar_prefetch = 0 : i64, scratch_operands = 0 : i64, tpu.core_type = #tpu.core_type<tc>} {
    %c0 = arith.constant 0 : index
    %c0_0 = arith.constant 0 : index
    %0 = vector.load %arg0[%c0, %c0_0] : memref<256x896xbf16, #tpu.memory_space<vmem>>, vector<256x896xbf16>
    %c0_1 = arith.constant 0 : index
    %c0_2 = arith.constant 0 : index
    %1 = vector.load %arg1[%c0_1, %c0_2] : memref<896x64xbf16, #tpu.memory_space<vmem>>, vector<896x64xbf16>
    %cst = arith.constant dense<0.000000e+00> : vector<256x64xf32>
    %2 = tpu.matmul %0, %1, %cst {dimension_numbers = #tpu.dot_dimension_numbers<[1], [0], [0], [1], [0, 0, 1, 1], [], []>} : vector<256x896xbf16>, vector<896x64xbf16>, vector<256x64xf32> -> vector<256x64xf32>
    %3 = vector.extract_strided_slice %2 {offsets = [0, 0], sizes = [32, 64], strides = [1, 1]} : vector<256x64xf32> to vector<32x64xf32>
    %4 = vector.extract_strided_slice %2 {offsets = [32, 0], sizes = [32, 64], strides = [1, 1]} : vector<256x64xf32> to vector<32x64xf32>
    %5 = arith.maximumf %3, %4 : vector<32x64xf32>
    %6 = vector.extract_strided_slice %2 {offsets = [64, 0], sizes = [32, 64], strides = [1, 1]} : vector<256x64xf32> to vector<32x64xf32>
    %7 = arith.maximumf %5, %6 : vector<32x64xf32>
    %8 = vector.extract_strided_slice %2 {offsets = [96, 0], sizes = [32, 64], strides = [1, 1]} : vector<256x64xf32> to vector<32x64xf32>
    %9 = arith.maximumf %7, %8 : vector<32x64xf32>
    %10 = vector.extract_strided_slice %2 {offsets = [128, 0], sizes = [32, 64], strides = [1, 1]} : vector<256x64xf32> to vector<32x64xf32>
    %11 = arith.maximumf %9, %10 : vector<32x64xf32>
    %12 = vector.extract_strided_slice %2 {offsets = [160, 0], sizes = [32, 64], strides = [1, 1]} : vector<256x64xf32> to vector<32x64xf32>
    %13 = arith.maximumf %11, %12 : vector<32x64xf32>
    %14 = vector.extract_strided_slice %2 {offsets = [192, 0], sizes = [32, 64], strides = [1, 1]} : vector<256x64xf32> to vector<32x64xf32>
    %15 = arith.maximumf %13, %14 : vector<32x64xf32>
    %16 = vector.extract_strided_slice %2 {offsets = [224, 0], sizes = [32, 64], strides = [1, 1]} : vector<256x64xf32> to vector<32x64xf32>
    %17 = arith.maximumf %15, %16 : vector<32x64xf32>
    %c0_3 = arith.constant 0 : index
    %c0_4 = arith.constant 0 : index
    %18 = vector.load %arg2[%c0_3, %c0_4] : memref<1x64xf32, #tpu.memory_space<vmem>>, vector<1x64xf32>
    %19 = vector.broadcast %18 : vector<1x64xf32> to vector<32x64xf32>
    %20 = arith.addf %17, %19 : vector<32x64xf32>
    %cst_5 = arith.constant 0.000000e+00 : f32
    %21 = vector.broadcast %cst_5 : f32 to vector<32x64xf32>
    %22 = arith.maximumf %20, %21 : vector<32x64xf32>
    %23 = arith.truncf %22 : vector<32x64xf32> to vector<32x64xbf16>
    %c0_6 = arith.constant 0 : index
    %c0_7 = arith.constant 0 : index
    %24 = vector.load %arg3[%c0_6, %c0_7] : memref<32x64xbf16, #tpu.memory_space<vmem>>, vector<32x64xbf16>
    tpu.vector_store %arg3[%c0_6, %c0_7], %23 {strides = array<i32>} : memref<32x64xbf16, #tpu.memory_space<vmem>>, vector<32x64xbf16>,
    return
  }
}

module attributes {stable_mosaic.version = 11 : i64} {
  func.func @kernel(%arg0: memref<2x1024xbf16, #tpu.memory_space<vmem>>, %arg1: memref<1024x128xbf16, #tpu.memory_space<vmem>>, %arg2: memref<1x128xf32, #tpu.memory_space<vmem>>, %arg3: memref<128x2xbf16, #tpu.memory_space<vmem>>, %arg4: memref<1x2xf32, #tpu.memory_space<vmem>>, %arg5: memref<2x2xf32, #tpu.memory_space<vmem>>) attributes {dimension_semantics = [], scalar_prefetch = 0 : i64, scratch_operands = 0 : i64, tpu.core_type = #tpu.core_type<tc>} {
    %c0 = arith.constant 0 : index
    %c0_0 = arith.constant 0 : index
    %0 = vector.load %arg0[%c0, %c0_0] : memref<2x1024xbf16, #tpu.memory_space<vmem>>, vector<2x1024xbf16>
    %c0_1 = arith.constant 0 : index
    %c0_2 = arith.constant 0 : index
    %1 = vector.load %arg1[%c0_1, %c0_2] : memref<1024x128xbf16, #tpu.memory_space<vmem>>, vector<1024x128xbf16>
    %cst = arith.constant dense<0.000000e+00> : vector<2x128xf32>
    %2 = tpu.matmul %0, %1, %cst {dimension_numbers = #tpu.dot_dimension_numbers<[1], [0], [0], [1], [0, 0, 1, 1], [], []>} : vector<2x1024xbf16>, vector<1024x128xbf16>, vector<2x128xf32> -> vector<2x128xf32>
    %c0_3 = arith.constant 0 : index
    %c0_4 = arith.constant 0 : index
    %3 = vector.load %arg2[%c0_3, %c0_4] : memref<1x128xf32, #tpu.memory_space<vmem>>, vector<1x128xf32>
    %4 = vector.broadcast %3 : vector<1x128xf32> to vector<2x128xf32>
    %5 = arith.addf %2, %4 : vector<2x128xf32>
    %cst_5 = arith.constant 0.000000e+00 : f32
    %6 = vector.broadcast %cst_5 : f32 to vector<2x128xf32>
    %7 = arith.maximumf %5, %6 : vector<2x128xf32>
    %8 = arith.truncf %7 : vector<2x128xf32> to vector<2x128xbf16>
    %c0_6 = arith.constant 0 : index
    %c0_7 = arith.constant 0 : index
    %9 = vector.load %arg3[%c0_6, %c0_7] : memref<128x2xbf16, #tpu.memory_space<vmem>>, vector<128x2xbf16>
    %cst_8 = arith.constant dense<0.000000e+00> : vector<2x2xf32>
    %10 = tpu.matmul %8, %9, %cst_8 {dimension_numbers = #tpu.dot_dimension_numbers<[1], [0], [0], [1], [0, 0, 1, 1], [], []>} : vector<2x128xbf16>, vector<128x2xbf16>, vector<2x2xf32> -> vector<2x2xf32>
    %c0_9 = arith.constant 0 : index
    %c0_10 = arith.constant 0 : index
    %11 = vector.load %arg4[%c0_9, %c0_10] : memref<1x2xf32, #tpu.memory_space<vmem>>, vector<1x2xf32>
    %12 = vector.broadcast %11 : vector<1x2xf32> to vector<2x2xf32>
    %13 = arith.addf %10, %12 : vector<2x2xf32>
    %c0_11 = arith.constant 0 : index
    %c0_12 = arith.constant 0 : index
    %14 = vector.load %arg5[%c0_11, %c0_12] : memref<2x2xf32, #tpu.memory_space<vmem>>, vector<2x2xf32>
    tpu.vector_store %arg5[%c0_11, %c0_12], %13 {strides = array<i32>} : memref<2x2xf32, #tpu.memory_space<vmem>>, vector<2x2xf32>,
    return
  }
}

</mosaic_0001>

<bundles_post_ra>
// kernel: pig_action_3dcnn_forward.3
= control target key start
LH: loop header
LB: loop body
LE: loop exit
PB: predicated region body
PF: predicated region fallthrough
CT: control target
= control target key end

     0   :  { %vm2583_vm0 = vcmask 257024   ;;  %s4679_s1 = inlined_call_operand.vmem [shape: bf16[128,32], index: 1, kind: input, shape index: {}]   ;;  %s4680_s0 = inlined_call_operand.vmem [shape: bf16[2048,128], index: 0, kind: input, shape index: {}]   ;;  %s4681_s2 = inlined_call_operand.vmem [shape: f32[1,32], index: 2, kind: input, shape index: {}]   ;;  %s4682_s3 = inlined_call_operand.vmem [shape: bf16[256,32], index: 3, kind: output, shape index: {}]  }
   0x1   :  { %v3245_v0 = vld [vmem:[%s4679_s1 + $0x38] sm:$0xff]   ;;  %v3246_v1 = vld [vmem:[%s4679_s1 + $0x30] sm:$0xff]   ;;  %v3247_v2 = vld [vmem:[%s4679_s1 + $0x28] sm:$0xff]  }
   0x2   :  { %2957 = vmatprep.subr.bf16.mxu0 %v3245_v0  ;;  %3229 = vmatprep.subr.bf16.mxu1 %v3245_v0  ;;  %v3248_v3 = vld [vmem:[%s4679_s1 + $0x20] sm:$0xff]   ;;  %v3249_v6 = vld [vmem:[%s4679_s1 + $0x18] sm:$0xff]   ;;  %v3250_v7 = vld [vmem:[%s4679_s1 + $0x10] sm:$0xff]  }
   0x3   :  { %2958 = vmatpush3.bf16.msra.mxu0 %v3245_v0  ;;  %3237 = vmatpush3.bf16.msra.mxu1 %v3245_v0  ;;  %v3253_v4 = vld [vmem:[%s4680_s0] sm:$0xff]   ;;  %v3251_v8 = vld [vmem:[%s4679_s1 + $0x8] sm:$0xff]   ;;  %v3257_v12 = vld [vmem:[%s4680_s0 + $0x10] sm:$0xff]  }
   0x4   :  { %2959 = vmatprep.subr.bf16.mxu0 %v3246_v1  ;;  %3230 = vmatprep.subr.bf16.mxu1 %v3246_v1  ;;  %v3255_v5 = vld [vmem:[%s4680_s0 + $0x200] sm:$0xff]   ;;  %v3254_v10 = vld [vmem:[%s4680_s0 + $0x8] sm:$0xff]   ;;  %v3259_v13 = vld [vmem:[%s4680_s0 + $0x210] sm:$0xff]  }
   0x5   :  { %2973 = vmatprep.mubr.bf16.mxu0 %v3253_v4  ;;  %3101 = vmatprep.mubr.bf16.mxu1 %v3255_v5  ;;  %v3252_v9 = vld [vmem:[%s4679_s1] sm:$0xff]   ;;  %v3256_v11 = vld [vmem:[%s4680_s0 + $0x208] sm:$0xff]   ;;  %v3258_v14 = vld [vmem:[%s4680_s0 + $0x18] sm:$0xff]  }
   0x6   :  { %v3260_v15 = vld [vmem:[%s4680_s0 + $0x218] sm:$0xff]   ;;  %v3261_v16 = vld [vmem:[%s4680_s0 + $0x20] sm:$0xff]   ;;  %v3262_v18 = vld [vmem:[%s4680_s0 + $0x28] sm:$0xff]  }
   0x7   :  { %2960 = vmatpush3.bf16.msra.mxu0 %v3246_v1  ;;  %3238 = vmatpush3.bf16.msra.mxu1 %v3246_v1  ;;  %v3263_v17 = vld [vmem:[%s4680_s0 + $0x220] sm:$0xff]   ;;  %v3264_v19 = vld [vmem:[%s4680_s0 + $0x228] sm:$0xff]   ;;  %v3265_v20 = vld [vmem:[%s4680_s0 + $0x30] sm:$0xff]  }
   0x8   :  { %2961 = vmatprep.subr.bf16.mxu0 %v3247_v2  ;;  %3231 = vmatprep.subr.bf16.mxu1 %v3247_v2  ;;  %v3267_v21 = vld [vmem:[%s4680_s0 + $0x230] sm:$0xff]   ;;  %v3266_v22 = vld [vmem:[%s4680_s0 + $0x38] sm:$0xff]   ;;  %v3269_v24 = vld [vmem:[%s4680_s0 + $0x40] sm:$0xff]  }
   0x9   :  { %v3268_v23 = vld [vmem:[%s4680_s0 + $0x238] sm:$0xff]   ;;  %v3271_v25 = vld [vmem:[%s4680_s0 + $0x240] sm:$0xff]   ;;  %v3270_v26 = vld [vmem:[%s4680_s0 + $0x48] sm:$0xff]  }
   0xa   :  { %v3272_v27 = vld [vmem:[%s4680_s0 + $0x248] sm:$0xff]   ;;  %v3273_v28 = vld [vmem:[%s4680_s0 + $0x50] sm:$0xff]   ;;  %v3274_v30 = vld [vmem:[%s4680_s0 + $0x58] sm:$0xff]  }
   0xb   :  { %2962 = vmatpush3.bf16.msra.mxu0 %v3247_v2  ;;  %3239 = vmatpush3.bf16.msra.mxu1 %v3247_v2  ;;  %v3275_v29 = vld [vmem:[%s4680_s0 + $0x250] sm:$0xff]   ;;  %v3276_v31 = vld [vmem:[%s4680_s0 + $0x258] sm:$0xff]   ;;  %v3277_v32 = vld [vmem:[%s4680_s0 + $0x60] sm:$0xff]  }
   0xc   :  { %2963 = vmatprep.subr.bf16.mxu0 %v3248_v3  ;;  %3232 = vmatprep.subr.bf16.mxu1 %v3248_v3  ;;  %v3279_v33 = vld [vmem:[%s4680_s0 + $0x260] sm:$0xff]   ;;  %v3278_v34 = vld [vmem:[%s4680_s0 + $0x68] sm:$0xff]   ;;  %v3281_v36 = vld [vmem:[%s4680_s0 + $0x70] sm:$0xff]  }
   0xd   :  { %v3280_v35 = vld [vmem:[%s4680_s0 + $0x268] sm:$0xff]   ;;  %v3283_v37 = vld [vmem:[%s4680_s0 + $0x270] sm:$0xff]   ;;  %v3282_v38 = vld [vmem:[%s4680_s0 + $0x78] sm:$0xff]  }
   0xe   :  { %v3284_v39 = vld [vmem:[%s4680_s0 + $0x278] sm:$0xff]   ;;  %v3285_v40 = vld [vmem:[%s4680_s0 + $0x80] sm:$0xff]   ;;  %v3286_v42 = vld [vmem:[%s4680_s0 + $0x88] sm:$0xff]  }
   0xf   :  { %2964 = vmatpush3.bf16.msra.mxu0 %v3248_v3  ;;  %3240 = vmatpush3.bf16.msra.mxu1 %v3248_v3  ;;  %v3287_v41 = vld [vmem:[%s4680_s0 + $0x280] sm:$0xff]   ;;  %v3288_v43 = vld [vmem:[%s4680_s0 + $0x288] sm:$0xff]   ;;  %v3289_v44 = vld [vmem:[%s4680_s0 + $0x90] sm:$0xff]  }
  0x10   :  { %2965 = vmatprep.subr.bf16.mxu0 %v3249_v6  ;;  %3233 = vmatprep.subr.bf16.mxu1 %v3249_v6  ;;  %v3291_v45 = vld [vmem:[%s4680_s0 + $0x290] sm:$0xff]   ;;  %v3290_v46 = vld [vmem:[%s4680_s0 + $0x98] sm:$0xff]   ;;  %v3293_v48 = vld [vmem:[%s4680_s0 + $0xa0] sm:$0xff]  }
  0x11   :  { %v3292_v47 = vld [vmem:[%s4680_s0 + $0x298] sm:$0xff]   ;;  %v3295_v49 = vld [vmem:[%s4680_s0 + $0x2a0] sm:$0xff]   ;;  %v3294_v50 = vld [vmem:[%s4680_s0 + $0xa8] sm:$0xff]  }
  0x12   :  { %v3296_v51 = vld [vmem:[%s4680_s0 + $0x2a8] sm:$0xff]   ;;  %v3297_v52 = vld [vmem:[%s4680_s0 + $0xb0] sm:$0xff]   ;;  %v3298_v54 = vld [vmem:[%s4680_s0 + $0xb8] sm:$0xff]  }
  0x13   :  { %2966 = vmatpush3.bf16.msra.mxu0 %v3249_v6  ;;  %3241 = vmatpush3.bf16.msra.mxu1 %v3249_v6  ;;  %v3299_v53 = vld [vmem:[%s4680_s0 + $0x2b0] sm:$0xff]   ;;  %v3300_v55 = vld [vmem:[%s4680_s0 + $0x2b8] sm:$0xff]   ;;  %v3301_v56 = vld [vmem:[%s4680_s0 + $0xc0] sm:$0xff]  }
  0x14   :  { %2967 = vmatprep.subr.bf16.mxu0 %v3250_v7  ;;  %3234 = vmatprep.subr.bf16.mxu1 %v3250_v7  ;;  %v3303_v57 = vld [vmem:[%s4680_s0 + $0x2c0] sm:$0xff]   ;;  %v3302_v58 = vld [vmem:[%s4680_s0 + $0xc8] sm:$0xff]   ;;  %v3305_v60 = vld [vmem:[%s4680_s0 + $0xd0] sm:$0xff]  }
  0x15   :  { %v3304_v59 = vld [vmem:[%s4680_s0 + $0x2c8] sm:$0xff]   ;;  %v3307_v61 = vld [vmem:[%s4680_s0 + $0x2d0] sm:$0xff]   ;;  %v3306_v62 = vld [vmem:[%s4680_s0 + $0xd8] sm:$0xff]  }
  0x16   :  { %v3308_v63 = vld [vmem:[%s4680_s0 + $0x2d8] sm:$0xff]   ;;  %v3309_v0 = vld [vmem:[%s4680_s0 + $0xe0] sm:$0xff]   ;;  %v3310_v2 = vld [vmem:[%s4680_s0 + $0xe8] sm:$0xff]  }
  0x17   :  { %2968 = vmatpush3.bf16.msra.mxu0 %v3250_v7  ;;  %3242 = vmatpush3.bf16.msra.mxu1 %v3250_v7  ;;  %v3311_v1 = vld [vmem:[%s4680_s0 + $0x2e0] sm:$0xff]   ;;  %v3312_v3 = vld [vmem:[%s4680_s0 + $0x2e8] sm:$0xff]   ;;  %v3313_v4 = vld [vmem:[%s4680_s0 + $0xf0] sm:$0xff]  }
  0x18   :  { %2969 = vmatprep.subr.bf16.mxu0 %v3251_v8  ;;  %3235 = vmatprep.subr.bf16.mxu1 %v3251_v8  ;;  %v3315_v5 = vld [vmem:[%s4680_s0 + $0x2f0] sm:$0xff]   ;;  %v3314_v6 = vld [vmem:[%s4680_s0 + $0xf8] sm:$0xff]  }
  0x19   :  { %v3316_v7 = vld [vmem:[%s4680_s0 + $0x2f8] sm:$0xff]  }
  0x1b   :  { %2970 = vmatpush3.bf16.msra.mxu0 %v3251_v8  ;;  %3243 = vmatpush3.bf16.msra.mxu1 %v3251_v8  ;;  %v3317_v8 = vld [vmem:[%s4680_s0 + $0x100] sm:$0xff]  }
  0x1c   :  { %2971 = vmatprep.subr.bf16.mxu0 %v3252_v9  ;;  %3236 = vmatprep.subr.bf16.mxu1 %v3252_v9 }
  0x1f   :  { %2972 = vmatpush3.bf16.msra.mxu0 %v3252_v9  ;;  %3244 = vmatpush3.bf16.msra.mxu1 %v3252_v9  ;;  %v3319_v9 = vld [vmem:[%s4680_s0 + $0x300] sm:$0xff]  }
  0x22   :  { %2974 = vmatmul.mubr.bf16.vlgmr.msra.gmra.mxu0 %v3254_v10  ;;  %3102 = vmatmul.mubr.bf16.vlgmr.msra.gmra.mxu1 %v3256_v11  ;;  %v3318_v10 = vld [vmem:[%s4680_s0 + $0x108] sm:$0xff]  }
  0x23   :  { %2977 = vmatprep.mubr.bf16.mxu0 %v3257_v12  ;;  %3105 = vmatprep.mubr.bf16.mxu1 %v3259_v13  ;;  %v3320_v11 = vld [vmem:[%s4680_s0 + $0x308] sm:$0xff]   ;;  %v3321_v12 = vld [vmem:[%s4680_s0 + $0x110] sm:$0xff]  }
  0x24   :  { %v3323_v13 = vld [vmem:[%s4680_s0 + $0x310] sm:$0xff]  }
  0x2a   :  { %2978 = vmatmul.mubr.bf16.gmra.mxu0 %v3258_v14  ;;  %3106 = vmatmul.mubr.bf16.gmra.mxu1 %v3260_v15  ;;  %v3322_v14 = vld [vmem:[%s4680_s0 + $0x118] sm:$0xff]  }
  0x2b   :  { %2981 = vmatprep.mubr.bf16.mxu0 %v3261_v16  ;;  %3109 = vmatprep.mubr.bf16.mxu1 %v3263_v17  ;;  %v3324_v15 = vld [vmem:[%s4680_s0 + $0x318] sm:$0xff]   ;;  %v3325_v16 = vld [vmem:[%s4680_s0 + $0x120] sm:$0xff]  }
  0x2c   :  { %v3327_v17 = vld [vmem:[%s4680_s0 + $0x320] sm:$0xff]  }
  0x32   :  { %2982 = vmatmul.mubr.bf16.gmra.mxu0 %v3262_v18  ;;  %3110 = vmatmul.mubr.bf16.gmra.mxu1 %v3264_v19  ;;  %v3326_v18 = vld [vmem:[%s4680_s0 + $0x128] sm:$0xff]  }
  0x33   :  { %2985 = vmatprep.mubr.bf16.mxu0 %v3265_v20  ;;  %3113 = vmatprep.mubr.bf16.mxu1 %v3267_v21  ;;  %v3328_v19 = vld [vmem:[%s4680_s0 + $0x328] sm:$0xff]   ;;  %v3329_v20 = vld [vmem:[%s4680_s0 + $0x130] sm:$0xff]  }
  0x34   :  { %v3331_v21 = vld [vmem:[%s4680_s0 + $0x330] sm:$0xff]  }
  0x3a   :  { %2986 = vmatmul.mubr.bf16.gmra.mxu0 %v3266_v22  ;;  %3114 = vmatmul.mubr.bf16.gmra.mxu1 %v3268_v23  ;;  %v3330_v22 = vld [vmem:[%s4680_s0 + $0x138] sm:$0xff]  }
  0x3b   :  { %2989 = vmatprep.mubr.bf16.mxu0 %v3269_v24  ;;  %3117 = vmatprep.mubr.bf16.mxu1 %v3271_v25  ;;  %v3332_v23 = vld [vmem:[%s4680_s0 + $0x338] sm:$0xff]   ;;  %v3333_v24 = vld [vmem:[%s4680_s0 + $0x140] sm:$0xff]  }
  0x3c   :  { %v3335_v25 = vld [vmem:[%s4680_s0 + $0x340] sm:$0xff]  }
  0x42   :  { %2990 = vmatmul.mubr.bf16.gmra.mxu0 %v3270_v26  ;;  %3118 = vmatmul.mubr.bf16.gmra.mxu1 %v3272_v27  ;;  %v3334_v26 = vld [vmem:[%s4680_s0 + $0x148] sm:$0xff]  }
  0x43   :  { %2993 = vmatprep.mubr.bf16.mxu0 %v3273_v28  ;;  %3121 = vmatprep.mubr.bf16.mxu1 %v3275_v29  ;;  %v3336_v27 = vld [vmem:[%s4680_s0 + $0x348] sm:$0xff]   ;;  %v3337_v28 = vld [vmem:[%s4680_s0 + $0x150] sm:$0xff]  }
  0x44   :  { %v3339_v29 = vld [vmem:[%s4680_s0 + $0x350] sm:$0xff]  }
  0x4a   :  { %2994 = vmatmul.mubr.bf16.gmra.mxu0 %v3274_v30  ;;  %3122 = vmatmul.mubr.bf16.gmra.mxu1 %v3276_v31  ;;  %v3338_v30 = vld [vmem:[%s4680_s0 + $0x158] sm:$0xff]  }
  0x4b   :  { %2997 = vmatprep.mubr.bf16.mxu0 %v3277_v32  ;;  %3125 = vmatprep.mubr.bf16.mxu1 %v3279_v33  ;;  %v3340_v31 = vld [vmem:[%s4680_s0 + $0x358] sm:$0xff]   ;;  %v3341_v32 = vld [vmem:[%s4680_s0 + $0x160] sm:$0xff]  }
  0x4c   :  { %v3343_v33 = vld [vmem:[%s4680_s0 + $0x360] sm:$0xff]  }
  0x52   :  { %2998 = vmatmul.mubr.bf16.gmra.mxu0 %v3278_v34  ;;  %3126 = vmatmul.mubr.bf16.gmra.mxu1 %v3280_v35  ;;  %v3342_v34 = vld [vmem:[%s4680_s0 + $0x168] sm:$0xff]  }
  0x53   :  { %3001 = vmatprep.mubr.bf16.mxu0 %v3281_v36  ;;  %3129 = vmatprep.mubr.bf16.mxu1 %v3283_v37  ;;  %v3344_v35 = vld [vmem:[%s4680_s0 + $0x368] sm:$0xff]   ;;  %v3345_v36 = vld [vmem:[%s4680_s0 + $0x170] sm:$0xff]  }
  0x54   :  { %v3347_v37 = vld [vmem:[%s4680_s0 + $0x370] sm:$0xff]  }
  0x5a   :  { %3002 = vmatmul.mubr.bf16.gmra.mxu0 %v3282_v38  ;;  %3130 = vmatmul.mubr.bf16.gmra.mxu1 %v3284_v39  ;;  %v3346_v38 = vld [vmem:[%s4680_s0 + $0x178] sm:$0xff]  }
  0x5b   :  { %3005 = vmatprep.mubr.bf16.mxu0 %v3285_v40  ;;  %3133 = vmatprep.mubr.bf16.mxu1 %v3287_v41  ;;  %v3348_v39 = vld [vmem:[%s4680_s0 + $0x378] sm:$0xff]   ;;  %v3349_v40 = vld [vmem:[%s4680_s0 + $0x180] sm:$0xff]  }
  0x5c   :  { %v3351_v41 = vld [vmem:[%s4680_s0 + $0x380] sm:$0xff]  }
  0x62   :  { %3006 = vmatmul.mubr.bf16.gmra.mxu0 %v3286_v42  ;;  %3134 = vmatmul.mubr.bf16.gmra.mxu1 %v3288_v43  ;;  %v3350_v42 = vld [vmem:[%s4680_s0 + $0x188] sm:$0xff]  }
  0x63   :  { %3009 = vmatprep.mubr.bf16.mxu0 %v3289_v44  ;;  %3137 = vmatprep.mubr.bf16.mxu1 %v3291_v45  ;;  %v3352_v43 = vld [vmem:[%s4680_s0 + $0x388] sm:$0xff]   ;;  %v3353_v44 = vld [vmem:[%s4680_s0 + $0x190] sm:$0xff]  }
  0x64   :  { %v3355_v45 = vld [vmem:[%s4680_s0 + $0x390] sm:$0xff]  }
  0x6a   :  { %3010 = vmatmul.mubr.bf16.gmra.mxu0 %v3290_v46  ;;  %3138 = vmatmul.mubr.bf16.gmra.mxu1 %v3292_v47 }
  0x6b   :  { %3013 = vmatprep.mubr.bf16.mxu0 %v3293_v48  ;;  %3141 = vmatprep.mubr.bf16.mxu1 %v3295_v49 }
  0x72   :  { %3014 = vmatmul.mubr.bf16.gmra.mxu0 %v3294_v50  ;;  %3142 = vmatmul.mubr.bf16.gmra.mxu1 %v3296_v51 }
  0x73   :  { %3017 = vmatprep.mubr.bf16.mxu0 %v3297_v52  ;;  %3145 = vmatprep.mubr.bf16.mxu1 %v3299_v53  ;;  %v3354_v52 = vld [vmem:[%s4680_s0 + $0x198] sm:$0xff]  }
  0x74   :  { %v3356_v53 = vld [vmem:[%s4680_s0 + $0x398] sm:$0xff]  }
  0x7a   :  { %3018 = vmatmul.mubr.bf16.gmra.mxu0 %v3298_v54  ;;  %3146 = vmatmul.mubr.bf16.gmra.mxu1 %v3300_v55  ;;  %v3357_v54 = vld [vmem:[%s4680_s0 + $0x1a0] sm:$0xff]  }
  0x7b   :  { %3021 = vmatprep.mubr.bf16.mxu0 %v3301_v56  ;;  %3149 = vmatprep.mubr.bf16.mxu1 %v3303_v57  ;;  %v3359_v55 = vld [vmem:[%s4680_s0 + $0x3a0] sm:$0xff]  }
  0x82   :  { %3022 = vmatmul.mubr.bf16.gmra.mxu0 %v3302_v58  ;;  %3150 = vmatmul.mubr.bf16.gmra.mxu1 %v3304_v59 }
  0x83   :  { %3025 = vmatprep.mubr.bf16.mxu0 %v3305_v60  ;;  %3153 = vmatprep.mubr.bf16.mxu1 %v3307_v61 }
  0x8a   :  { %3026 = vmatmul.mubr.bf16.gmra.mxu0 %v3306_v62  ;;  %3154 = vmatmul.mubr.bf16.gmra.mxu1 %v3308_v63 }
  0x8b   :  { %3029 = vmatprep.mubr.bf16.mxu0 %v3309_v0  ;;  %3157 = vmatprep.mubr.bf16.mxu1 %v3311_v1  ;;  %v3358_v0 = vld [vmem:[%s4680_s0 + $0x1a8] sm:$0xff]  }
  0x8c   :  { %v3360_v1 = vld [vmem:[%s4680_s0 + $0x3a8] sm:$0xff]  }
  0x92   :  { %3030 = vmatmul.mubr.bf16.gmra.mxu0 %v3310_v2  ;;  %3158 = vmatmul.mubr.bf16.gmra.mxu1 %v3312_v3  ;;  %v3361_v2 = vld [vmem:[%s4680_s0 + $0x1b0] sm:$0xff]  }
  0x93   :  { %3033 = vmatprep.mubr.bf16.mxu0 %v3313_v4  ;;  %3161 = vmatprep.mubr.bf16.mxu1 %v3315_v5  ;;  %v3363_v3 = vld [vmem:[%s4680_s0 + $0x3b0] sm:$0xff]  }
  0x9a   :  { %3034 = vmatmul.mubr.bf16.gmra.mxu0 %v3314_v6  ;;  %3162 = vmatmul.mubr.bf16.gmra.mxu1 %v3316_v7 }
  0x9b   :  { %3037 = vmatprep.mubr.bf16.mxu0 %v3317_v8  ;;  %3165 = vmatprep.mubr.bf16.mxu1 %v3319_v9 }
  0xa2   :  { %3038 = vmatmul.mubr.bf16.gmra.mxu0 %v3318_v10  ;;  %3166 = vmatmul.mubr.bf16.gmra.mxu1 %v3320_v11 }
  0xa3   :  { %3041 = vmatprep.mubr.bf16.mxu0 %v3321_v12  ;;  %3169 = vmatprep.mubr.bf16.mxu1 %v3323_v13  ;;  %v3362_v12 = vld [vmem:[%s4680_s0 + $0x1b8] sm:$0xff]  }
  0xa4   :  { %v3364_v13 = vld [vmem:[%s4680_s0 + $0x3b8] sm:$0xff]  }
  0xaa   :  { %3042 = vmatmul.mubr.bf16.gmra.mxu0 %v3322_v14  ;;  %3170 = vmatmul.mubr.bf16.gmra.mxu1 %v3324_v15  ;;  %v3365_v14 = vld [vmem:[%s4680_s0 + $0x1c0] sm:$0xff]  }
  0xab   :  { %3045 = vmatprep.mubr.bf16.mxu0 %v3325_v16  ;;  %3173 = vmatprep.mubr.bf16.mxu1 %v3327_v17  ;;  %v3367_v15 = vld [vmem:[%s4680_s0 + $0x3c0] sm:$0xff]  }
  0xb2   :  { %3046 = vmatmul.mubr.bf16.gmra.mxu0 %v3326_v18  ;;  %3174 = vmatmul.mubr.bf16.gmra.mxu1 %v3328_v19 }
  0xb3   :  { %3049 = vmatprep.mubr.bf16.mxu0 %v3329_v20  ;;  %3177 = vmatprep.mubr.bf16.mxu1 %v3331_v21 }
  0xba   :  { %3050 = vmatmul.mubr.bf16.gmra.mxu0 %v3330_v22  ;;  %3178 = vmatmul.mubr.bf16.gmra.mxu1 %v3332_v23 }
  0xbb   :  { %3053 = vmatprep.mubr.bf16.mxu0 %v3333_v24  ;;  %3181 = vmatprep.mubr.bf16.mxu1 %v3335_v25  ;;  %v3366_v24 = vld [vmem:[%s4680_s0 + $0x1c8] sm:$0xff]  }
  0xbc   :  { %v3368_v25 = vld [vmem:[%s4680_s0 + $0x3c8] sm:$0xff]  }
  0xc2   :  { %3054 = vmatmul.mubr.bf16.gmra.mxu0 %v3334_v26  ;;  %3182 = vmatmul.mubr.bf16.gmra.mxu1 %v3336_v27  ;;  %v3369_v26 = vld [vmem:[%s4680_s0 + $0x1d0] sm:$0xff]  }
  0xc3   :  { %3057 = vmatprep.mubr.bf16.mxu0 %v3337_v28  ;;  %3185 = vmatprep.mubr.bf16.mxu1 %v3339_v29  ;;  %v3371_v27 = vld [vmem:[%s4680_s0 + $0x3d0] sm:$0xff]  }
  0xca   :  { %3058 = vmatmul.mubr.bf16.gmra.mxu0 %v3338_v30  ;;  %3186 = vmatmul.mubr.bf16.gmra.mxu1 %v3340_v31 }
  0xcb   :  { %3061 = vmatprep.mubr.bf16.mxu0 %v3341_v32  ;;  %3189 = vmatprep.mubr.bf16.mxu1 %v3343_v33 }
  0xd2   :  { %3062 = vmatmul.mubr.bf16.gmra.mxu0 %v3342_v34  ;;  %3190 = vmatmul.mubr.bf16.gmra.mxu1 %v3344_v35 }
  0xd3   :  { %3065 = vmatprep.mubr.bf16.mxu0 %v3345_v36  ;;  %3193 = vmatprep.mubr.bf16.mxu1 %v3347_v37  ;;  %v3370_v36 = vld [vmem:[%s4680_s0 + $0x1d8] sm:$0xff]  }
  0xd4   :  { %v3372_v37 = vld [vmem:[%s4680_s0 + $0x3d8] sm:$0xff]  }
  0xda   :  { %3066 = vmatmul.mubr.bf16.gmra.mxu0 %v3346_v38  ;;  %3194 = vmatmul.mubr.bf16.gmra.mxu1 %v3348_v39  ;;  %v3373_v38 = vld [vmem:[%s4680_s0 + $0x1e0] sm:$0xff]  }
  0xdb   :  { %3069 = vmatprep.mubr.bf16.mxu0 %v3349_v40  ;;  %3197 = vmatprep.mubr.bf16.mxu1 %v3351_v41  ;;  %v3375_v39 = vld [vmem:[%s4680_s0 + $0x3e0] sm:$0xff]  }
  0xe2   :  { %v3731_v46 = vpop.f32.mrf.mxu0  ;;  %3070 = vmatmul.mubr.bf16.gmra.mxu0 %v3350_v42  ;;  %v3733_v47 = vpop.f32.mrf.mxu1  ;;  %3198 = vmatmul.mubr.bf16.gmra.mxu1 %v3352_v43 }
  0xe3   :  { %3073 = vmatprep.mubr.bf16.mxu0 %v3353_v44  ;;  %3201 = vmatprep.mubr.bf16.mxu1 %v3355_v45 }
  0xe4   :  { %v3735_v48 = vpop.f32.mrf.mxu0  ;;  %v3737_v49 = vpop.f32.mrf.mxu1 }
  0xe5   :  { %4721 = vst [vmem:[#allocation2_spill] sm:$0xff] %v3737_v49 }
  0xe6   :  { %v3739_v50 = vpop.f32.mrf.mxu0  ;;  %v3741_v51 = vpop.f32.mrf.mxu1 }
  0xe7   :  { %4722 = vst [vmem:[#allocation3_spill] sm:$0xff] %v3741_v51 }
  0xe8   :  { %v3755_v56 = vpop.f32.mrf.mxu0  ;;  %v3757_v57 = vpop.f32.mrf.mxu1 }
  0xe9   :  { %4723 = vst [vmem:[#allocation4_spill] sm:$0xff] %v3757_v57 }
  0xea   :  { %v3759_v58 = vpop.f32.mrf.mxu0  ;;  %3074 = vmatmul.mubr.bf16.gmra.mxu0 %v3354_v52  ;;  %v3761_v59 = vpop.f32.mrf.mxu1  ;;  %3202 = vmatmul.mubr.bf16.gmra.mxu1 %v3356_v53 }
  0xeb   :  { %4724 = vst [vmem:[#allocation5_spill] sm:$0xff] %v3761_v59  ;;  %3077 = vmatprep.mubr.bf16.mxu0 %v3357_v54  ;;  %3205 = vmatprep.mubr.bf16.mxu1 %v3359_v55  ;;  %v3374_v54 = vld [vmem:[%s4680_s0 + $0x1e8] sm:$0xff]  }
  0xec   :  { %v3763_v60 = vpop.f32.mrf.mxu0  ;;  %v3765_v61 = vpop.f32.mrf.mxu1  ;;  %v3376_v55 = vld [vmem:[%s4680_s0 + $0x3e8] sm:$0xff]  }
  0xed   :  { %4725 = vst [vmem:[#allocation6_spill] sm:$0xff] %v3765_v61 }
  0xee   :  { %v3767_v62 = vpop.f32.mrf.mxu0  ;;  %v3769_v63 = vpop.f32.mrf.mxu1 }
  0xef   :  { %4726 = vst [vmem:[#allocation7_spill] sm:$0xff] %v3769_v63 }
  0xf0   :  { %v3783_v4 = vpop.f32.mrf.mxu0  ;;  %v3785_v5 = vpop.f32.mrf.mxu1 }
  0xf1   :  { %4727 = vst [vmem:[#allocation8_spill] sm:$0xff] %v3785_v5 }
  0xf2   :  { %v3787_v6 = vpop.f32.mrf.mxu0  ;;  %3078 = vmatmul.mubr.bf16.gmra.mxu0 %v3358_v0  ;;  %v3789_v7 = vpop.f32.mrf.mxu1  ;;  %3206 = vmatmul.mubr.bf16.gmra.mxu1 %v3360_v1  ;;  %v3377_v0 = vld [vmem:[%s4680_s0 + $0x1f0] sm:$0xff]  }
  0xf3   :  { %4728 = vst [vmem:[#allocation9_spill] sm:$0xff] %v3789_v7  ;;  %3081 = vmatprep.mubr.bf16.mxu0 %v3361_v2  ;;  %3209 = vmatprep.mubr.bf16.mxu1 %v3363_v3  ;;  %v3379_v1 = vld [vmem:[%s4680_s0 + $0x3f0] sm:$0xff]  }
  0xf4   :  { %v3791_v8 = vpop.f32.mrf.mxu0  ;;  %v3793_v9 = vpop.f32.mrf.mxu1 }
  0xf5   :  { %4729 = vst [vmem:[#allocation10_spill] sm:$0xff] %v3793_v9 }
  0xf6   :  { %v3795_v10 = vpop.f32.mrf.mxu0  ;;  %v3797_v11 = vpop.f32.mrf.mxu1 }
  0xf7   :  { %4730 = vst [vmem:[#allocation11_spill] sm:$0xff] %v3797_v11 }
  0xf8   :  { %v3811_v16 = vpop.f32.mrf.mxu0  ;;  %v3813_v17 = vpop.f32.mrf.mxu1 }
  0xf9   :  { %4731 = vst [vmem:[#allocation12_spill] sm:$0xff] %v3813_v17 }
  0xfa   :  { %v3815_v18 = vpop.f32.mrf.mxu0  ;;  %3082 = vmatmul.mubr.bf16.gmra.mxu0 %v3362_v12  ;;  %v3817_v19 = vpop.f32.mrf.mxu1  ;;  %3210 = vmatmul.mubr.bf16.gmra.mxu1 %v3364_v13 }
  0xfb   :  { %4732 = vst [vmem:[#allocation13_spill] sm:$0xff] %v3817_v19  ;;  %3085 = vmatprep.mubr.bf16.mxu0 %v3365_v14  ;;  %3213 = vmatprep.mubr.bf16.mxu1 %v3367_v15 }
  0xfc   :  { %v3819_v20 = vpop.f32.mrf.mxu0  ;;  %v3821_v21 = vpop.f32.mrf.mxu1 }
  0xfd   :  { %4733 = vst [vmem:[#allocation14_spill] sm:$0xff] %v3819_v20  ;;  %4734 = vst [vmem:[#allocation15_spill] sm:$0xff] %v3821_v21 }
  0xfe   :  { %v3823_v22 = vpop.f32.mrf.mxu0  ;;  %v3825_v23 = vpop.f32.mrf.mxu1 }
  0xff   :  { %4735 = vst [vmem:[#allocation16_spill] sm:$0xff] %v3823_v22  ;;  %4736 = vst [vmem:[#allocation17_spill] sm:$0xff] %v3825_v23 }
 0x100   :  { %v3839_v28 = vpop.f32.mrf.mxu0  ;;  %v3841_v29 = vpop.f32.mrf.mxu1 }
 0x101   :  { %4737 = vst [vmem:[#allocation18_spill] sm:$0xff] %v3839_v28  ;;  %4738 = vst [vmem:[#allocation19_spill] sm:$0xff] %v3841_v29 }
 0x102   :  { %v3843_v30 = vpop.f32.mrf.mxu0  ;;  %3086 = vmatmul.mubr.bf16.gmra.mxu0 %v3366_v24  ;;  %v3845_v31 = vpop.f32.mrf.mxu1  ;;  %3214 = vmatmul.mubr.bf16.gmra.mxu1 %v3368_v25 }
 0x103   :  { %4739 = vst [vmem:[#allocation20_spill] sm:$0xff] %v3843_v30  ;;  %4740 = vst [vmem:[#allocation21_spill] sm:$0xff] %v3845_v31  ;;  %3089 = vmatprep.mubr.bf16.mxu0 %v3369_v26  ;;  %3217 = vmatprep.mubr.bf16.mxu1 %v3371_v27  ;;  %v3378_v26 = vld [vmem:[%s4680_s0 + $0x1f8] sm:$0xff]  }
 0x104   :  { %v3847_v32 = vpop.f32.mrf.mxu0  ;;  %v3849_v33 = vpop.f32.mrf.mxu1  ;;  %v3380_v27 = vld [vmem:[%s4680_s0 + $0x3f8] sm:$0xff]  }
 0x105   :  { %4741 = vst [vmem:[#allocation22_spill] sm:$0xff] %v3847_v32  ;;  %4742 = vst [vmem:[#allocation23_spill] sm:$0xff] %v3849_v33 }
 0x106   :  { %v3851_v34 = vpop.f32.mrf.mxu0  ;;  %v3853_v35 = vpop.f32.mrf.mxu1 }
 0x107   :  { %4743 = vst [vmem:[#allocation24_spill] sm:$0xff] %v3851_v34  ;;  %4744 = vst [vmem:[#allocation25_spill] sm:$0xff] %v3853_v35 }
 0x108   :  { %v3867_v40 = vpop.f32.mrf.mxu0  ;;  %v3869_v41 = vpop.f32.mrf.mxu1 }
 0x109   :  { %4745 = vst [vmem:[#allocation26_spill] sm:$0xff] %v3867_v40  ;;  %4746 = vst [vmem:[#allocation27_spill] sm:$0xff] %v3869_v41 }
 0x10a   :  { %v3871_v42 = vpop.f32.mrf.mxu0  ;;  %3090 = vmatmul.mubr.bf16.gmra.mxu0 %v3370_v36  ;;  %v3873_v43 = vpop.f32.mrf.mxu1  ;;  %3218 = vmatmul.mubr.bf16.gmra.mxu1 %v3372_v37 }
 0x10b   :  { %4747 = vst [vmem:[#allocation28_spill] sm:$0xff] %v3871_v42  ;;  %4748 = vst [vmem:[#allocation29_spill] sm:$0xff] %v3873_v43  ;;  %3093 = vmatprep.mubr.bf16.mxu0 %v3373_v38  ;;  %3221 = vmatprep.mubr.bf16.mxu1 %v3375_v39 }
 0x10c   :  { %v3875_v44 = vpop.f32.mrf.mxu0  ;;  %v3877_v45 = vpop.f32.mrf.mxu1 }
 0x10d   :  { %4749 = vst [vmem:[#allocation30_spill] sm:$0xff] %v3875_v44  ;;  %4750 = vst [vmem:[#allocation31_spill] sm:$0xff] %v3877_v45 }
 0x10e   :  { %v3879_v52 = vpop.f32.mrf.mxu0  ;;  %v3881_v53 = vpop.f32.mrf.mxu1 }
 0x10f   :  { %4751 = vst [vmem:[#allocation32_spill] sm:$0xff] %v3879_v52  ;;  %4752 = vst [vmem:[#allocation33_spill] sm:$0xff] %v3881_v53 }
 0x110   :  { %v3895_v2 = vpop.f32.mrf.mxu0  ;;  %v3897_v3 = vpop.f32.mrf.mxu1 }
 0x111   :  { %4753 = vst [vmem:[#allocation34_spill] sm:$0xff] %v3895_v2  ;;  %4754 = vst [vmem:[#allocation35_spill] sm:$0xff] %v3897_v3 }
 0x112   :  { %v3899_v12 = vpop.f32.mrf.mxu0  ;;  %3094 = vmatmul.mubr.bf16.gmra.mxu0 %v3374_v54  ;;  %v3901_v13 = vpop.f32.mrf.mxu1  ;;  %3222 = vmatmul.mubr.bf16.gmra.mxu1 %v3376_v55 }
 0x113   :  { %4755 = vst [vmem:[#allocation36_spill] sm:$0xff] %v3899_v12  ;;  %4756 = vst [vmem:[#allocation37_spill] sm:$0xff] %v3901_v13  ;;  %3097 = vmatprep.mubr.bf16.mxu0 %v3377_v0  ;;  %3225 = vmatprep.mubr.bf16.mxu1 %v3379_v1 }
 0x114   :  { %v3903_v14 = vpop.f32.mrf.mxu0  ;;  %v3905_v15 = vpop.f32.mrf.mxu1 }
 0x115   :  { %4757 = vst [vmem:[#allocation38_spill] sm:$0xff] %v3903_v14  ;;  %4758 = vst [vmem:[#allocation39_spill] sm:$0xff] %v3905_v15 }
 0x116   :  { %v3907_v24 = vpop.f32.mrf.mxu0  ;;  %v3909_v25 = vpop.f32.mrf.mxu1 }
 0x117   :  { %4759 = vst [vmem:[#allocation40_spill] sm:$0xff] %v3907_v24  ;;  %4760 = vst [vmem:[#allocation41_spill] sm:$0xff] %v3909_v25 }
 0x118   :  { %v3917_v36 = vpop.f32.mrf.mxu0  ;;  %v3919_v37 = vpop.f32.mrf.mxu1 }
 0x119   :  { %4761 = vst [vmem:[#allocation42_spill] sm:$0xff] %v3917_v36  ;;  %4762 = vst [vmem:[#allocation43_spill] sm:$0xff] %v3919_v37 }
 0x11a   :  { %v3921_v38 = vpop.f32.mrf.mxu0  ;;  %3098 = vmatmul.mubr.bf16.gmra.mxu0 %v3378_v26  ;;  %v3923_v39 = vpop.f32.mrf.mxu1  ;;  %3226 = vmatmul.mubr.bf16.gmra.mxu1 %v3380_v27 }
 0x11b   :  { %4763 = vst [vmem:[#allocation44_spill] sm:$0xff] %v3921_v38  ;;  %4764 = vst [vmem:[#allocation45_spill] sm:$0xff] %v3923_v39 }
 0x11c   :  { %v3925_v54 = vpop.f32.mrf.mxu0  ;;  %v3927_v55 = vpop.f32.mrf.mxu1 }
 0x11d   :  { %4765 = vst [vmem:[#allocation46_spill] sm:$0xff] %v3925_v54  ;;  %4766 = vst [vmem:[#allocation47_spill] sm:$0xff] %v3927_v55 }
 0x11e   :  { %v3929_v0 = vpop.f32.mrf.mxu0  ;;  %v3931_v1 = vpop.f32.mrf.mxu1 }
 0x11f   :  { %4767 = vst [vmem:[#allocation48_spill] sm:$0xff] %v3929_v0  ;;  %4768 = vst [vmem:[#allocation49_spill] sm:$0xff] %v3931_v1 }
 0x120   :  { %v3933_v25 = vpop.f32.mrf.mxu0  ;;  %v3935_v15 = vpop.f32.mrf.mxu1 }
 0x121   :  { %4769 = vst [vmem:[#allocation50_spill] sm:$0xff] %v3933_v25  ;;  %4770 = vst [vmem:[#allocation51_spill] sm:$0xff] %v3935_v15 }
 0x122   :  { %v3937_v13 = vpop.f32.mrf.mxu0  ;;  %v3939_v37 = vpop.f32.mrf.mxu1 }
 0x123   :  { %4771 = vst [vmem:[#allocation52_spill] sm:$0xff] %v3939_v37 }
 0x124   :  { %v3943_v27 = vpop.f32.mrf.mxu0  ;;  %v3945_v39 = vpop.f32.mrf.mxu1 }
 0x125   :  { %4772 = vst [vmem:[#allocation53_spill] sm:$0xff] %v3945_v39 }
 0x126   :  { %v3949_v3 = vpop.f32.mrf.mxu0  ;;  %v3951_v1 = vpop.f32.mrf.mxu1 }
 0x127   :  { %4773 = vst [vmem:[#allocation54_spill] sm:$0xff] %v3951_v1 }
 0x128   :  { %v3955_v53 = vpop.f32.mrf.mxu0  ;;  %v3957_v45 = vpop.f32.mrf.mxu1 }
 0x129   :  { %4774 = vst [vmem:[#allocation55_spill] sm:$0xff] %v3957_v45 }
 0x12a   :  { %v3961_v43 = vpop.f32.mrf.mxu0  ;;  %v3963_v41 = vpop.f32.mrf.mxu1 }
 0x12b   :  { %4775 = vst [vmem:[#allocation56_spill] sm:$0xff] %v3963_v41 }
 0x12c   :  { %v3967_v35 = vpop.f32.mrf.mxu0  ;;  %v3969_v33 = vpop.f32.mrf.mxu1 }
 0x12d   :  { %4776 = vst [vmem:[#allocation57_spill] sm:$0xff] %v3969_v33 }
 0x12e   :  { %v3973_v31 = vpop.f32.mrf.mxu0  ;;  %v3975_v29 = vpop.f32.mrf.mxu1 }
 0x12f   :  { %4777 = vst [vmem:[#allocation58_spill] sm:$0xff] %v3975_v29 }
 0x130   :  { %v3979_v23 = vpop.f32.mrf.mxu0  ;;  %v3981_v21 = vpop.f32.mrf.mxu1 }
 0x131   :  { %4778 = vst [vmem:[#allocation59_spill] sm:$0xff] %v3981_v21 }
 0x132   :  { %v3985_v19 = vpop.f32.mrf.mxu0  ;;  %v3987_v17 = vpop.f32.mrf.mxu1 }
 0x133   :  { %4779 = vst [vmem:[#allocation60_spill] sm:$0xff] %v3987_v17 }
 0x134   :  { %v3991_v11 = vpop.f32.mrf.mxu0  ;;  %v3993_v9 = vpop.f32.mrf.mxu1 }
 0x135   :  { %4780 = vst [vmem:[#allocation61_spill] sm:$0xff] %v3993_v9 }
 0x136   :  { %v3997_v7 = vpop.f32.mrf.mxu0  ;;  %v3999_v21 = vpop.f32.mrf.mxu1 }
 0x137   :  { %4781 = vst [vmem:[#allocation62_spill] sm:$0xff] %v3999_v21 }
 0x138   :  { %v4003_v29 = vpop.f32.mrf.mxu0  ;;  %v4005_v17 = vpop.f32.mrf.mxu1 }
 0x139   :  { %4782 = vst [vmem:[#allocation63_spill] sm:$0xff] %v4005_v17 }
 0x13a   :  { %v4009_v5 = vpop.f32.mrf.mxu0  ;;  %v4011_v9 = vpop.f32.mrf.mxu1 }
 0x13b   :  { %4783 = vst [vmem:[#allocation64_spill] sm:$0xff] %v4011_v9 }
 0x13c   :  { %v4015_v33 = vpop.f32.mrf.mxu0  ;;  %v4017_v21 = vpop.f32.mrf.mxu1 }
 0x13d   :  { %4784 = vst [vmem:[#allocation65_spill] sm:$0xff] %v4015_v33  ;;  %4785 = vst [vmem:[#allocation66_spill] sm:$0xff] %v4017_v21 }
 0x13e   :  { %v4021_v63 = vpop.f32.mrf.mxu0  ;;  %v4023_v17 = vpop.f32.mrf.mxu1 }
 0x13f   :  { %4786 = vst [vmem:[#allocation67_spill] sm:$0xff] %v4021_v63  ;;  %4787 = vst [vmem:[#allocation68_spill] sm:$0xff] %v4023_v17 }
 0x140   :  { %v4027_v41 = vpop.f32.mrf.mxu0  ;;  %v4029_v9 = vpop.f32.mrf.mxu1 }
 0x141   :  { %4788 = vst [vmem:[#allocation69_spill] sm:$0xff] %v4027_v41  ;;  %4789 = vst [vmem:[#allocation70_spill] sm:$0xff] %v4029_v9 }
 0x142   :  { %v4033_v61 = vpop.f32.mrf.mxu0  ;;  %v4035_v21 = vpop.f32.mrf.mxu1 }
 0x143   :  { %4790 = vst [vmem:[#allocation71_spill] sm:$0xff] %v4033_v61  ;;  %4791 = vst [vmem:[#allocation72_spill] sm:$0xff] %v4035_v21 }
 0x144   :  { %v4039_v59 = vpop.f32.mrf.mxu0  ;;  %v4041_v17 = vpop.f32.mrf.mxu1 }
 0x145   :  { %4792 = vst [vmem:[#allocation73_spill] sm:$0xff] %v4039_v59  ;;  %4793 = vst [vmem:[#allocation74_spill] sm:$0xff] %v4041_v17 }
 0x146   :  { %v4045_v45 = vpop.f32.mrf.mxu0  ;;  %v4047_v9 = vpop.f32.mrf.mxu1 }
 0x147   :  { %4794 = vst [vmem:[#allocation75_spill] sm:$0xff] %v4045_v45  ;;  %4795 = vst [vmem:[#allocation76_spill] sm:$0xff] %v4047_v9 }
 0x148   :  { %v4051_v1 = vpop.f32.mrf.mxu0  ;;  %v4053_v21 = vpop.f32.mrf.mxu1 }
 0x149   :  { %4796 = vst [vmem:[#allocation77_spill] sm:$0xff] %v4051_v1  ;;  %4797 = vst [vmem:[#allocation78_spill] sm:$0xff] %v4053_v21 }
 0x14a   :  { %v4057_v57 = vpop.f32.mrf.mxu0  ;;  %v4059_v17 = vpop.f32.mrf.mxu1 }
 0x14b   :  { %4798 = vst [vmem:[#allocation79_spill] sm:$0xff] %v4057_v57  ;;  %4799 = vst [vmem:[#allocation80_spill] sm:$0xff] %v4059_v17 }
 0x14c   :  { %v4063_v39 = vpop.f32.mrf.mxu0  ;;  %v4065_v9 = vpop.f32.mrf.mxu1 }
 0x14d   :  { %4800 = vst [vmem:[#allocation81_spill] sm:$0xff] %v4063_v39  ;;  %4801 = vst [vmem:[#allocation82_spill] sm:$0xff] %v4065_v9 }
 0x14e   :  { %v4069_v51 = vpop.f32.mrf.mxu0  ;;  %v4071_v21 = vpop.f32.mrf.mxu1 }
 0x14f   :  { %4802 = vst [vmem:[#allocation83_spill] sm:$0xff] %v4069_v51  ;;  %4803 = vst [vmem:[#allocation84_spill] sm:$0xff] %v4071_v21 }
 0x150   :  { %v4075_v1 = vpop.f32.mrf.mxu0  ;;  %v4077_v17 = vpop.f32.mrf.mxu1 }
 0x151   :  { %4804 = vst [vmem:[#allocation85_spill] sm:$0xff] %v4075_v1  ;;  %4805 = vst [vmem:[#allocation86_spill] sm:$0xff] %v4077_v17 }
 0x152   :  { %v4081_v57 = vpop.f32.mrf.mxu0  ;;  %v4083_v9 = vpop.f32.mrf.mxu1 }
 0x153   :  { %4806 = vst [vmem:[#allocation87_spill] sm:$0xff] %v4081_v57  ;;  %4807 = vst [vmem:[#allocation88_spill] sm:$0xff] %v4083_v9 }
 0x154   :  { %v4087_v39 = vpop.f32.mrf.mxu0  ;;  %v4089_v21 = vpop.f32.mrf.mxu1 }
 0x155   :  { %4808 = vst [vmem:[#allocation89_spill] sm:$0xff] %v4087_v39  ;;  %4809 = vst [vmem:[#allocation90_spill] sm:$0xff] %v4089_v21 }
 0x156   :  { %v4093_v51 = vpop.f32.mrf.mxu0  ;;  %v4095_v17 = vpop.f32.mrf.mxu1 }
 0x157   :  { %4810 = vst [vmem:[#allocation91_spill] sm:$0xff] %v4093_v51  ;;  %4811 = vst [vmem:[#allocation92_spill] sm:$0xff] %v4095_v17 }
 0x158   :  { %v4099_v1 = vpop.f32.mrf.mxu0  ;;  %v4101_v9 = vpop.f32.mrf.mxu1 }
 0x159   :  { %4812 = vst [vmem:[#allocation93_spill] sm:$0xff] %v4099_v1  ;;  %4813 = vst [vmem:[#allocation94_spill] sm:$0xff] %v4101_v9 }
 0x15a   :  { %v4105_v57 = vpop.f32.mrf.mxu0  ;;  %v4107_v21 = vpop.f32.mrf.mxu1 }
 0x15b   :  { %4814 = vst [vmem:[#allocation95_spill] sm:$0xff] %v4105_v57  ;;  %4815 = vst [vmem:[#allocation96_spill] sm:$0xff] %v4107_v21 }
 0x15c   :  { %v4111_v39 = vpop.f32.mrf.mxu0  ;;  %v4113_v17 = vpop.f32.mrf.mxu1 }
 0x15d   :  { %4816 = vst [vmem:[#allocation97_spill] sm:$0xff] %v4111_v39  ;;  %4817 = vst [vmem:[#allocation98_spill] sm:$0xff] %v4113_v17 }
 0x15e   :  { %v4117_v51 = vpop.f32.mrf.mxu0  ;;  %v4119_v9 = vpop.f32.mrf.mxu1 }
 0x15f   :  { %4818 = vst [vmem:[#allocation99_spill] sm:$0xff] %v4117_v51  ;;  %4819 = vst [vmem:[#allocation100_spill] sm:$0xff] %v4119_v9 }
 0x160   :  { %v4123_v1 = vpop.f32.mrf.mxu0  ;;  %v4125_v21 = vpop.f32.mrf.mxu1 }
 0x161   :  { %4820 = vst [vmem:[#allocation101_spill] sm:$0xff] %v4123_v1  ;;  %4821 = vst [vmem:[#allocation102_spill] sm:$0xff] %v4125_v21 }
 0x162   :  { %v4129_v57 = vpop.f32.mrf.mxu0  ;;  %v4131_v17 = vpop.f32.mrf.mxu1 }
 0x163   :  { %4822 = vst [vmem:[#allocation103_spill] sm:$0xff] %v4131_v17 }
 0x164   :  { %v4133_v38 = vpop.f32.mrf.mxu0  ;;  %v4135_v15 = vpop.f32.mrf.mxu1 }
 0x165   :  { %4823 = vst [vmem:[#allocation104_spill] sm:$0xff] %v4135_v15 }
 0x166   :  { %v3040_v39 = vpop.f32.mrf.mxu0  ;;  %v4137_v9 = vpop.f32.mrf.mxu1 }
 0x167   :  { %4824 = vst [vmem:[#allocation105_spill] sm:$0xff] %v4137_v9 }
 0x168   :  { %v1396_v54 = vpop.f32.mrf.mxu0  ;;  %v4139_v26 = vpop.f32.mrf.mxu1 }
 0x169   :  { %4825 = vst [vmem:[#allocation106_spill] sm:$0xff] %v4139_v26 }
 0x16a   :  { %v3043_v51 = vpop.f32.mrf.mxu0  ;;  %v4141_v0 = vpop.f32.mrf.mxu1 }
 0x16b   :  { %4826 = vst [vmem:[#allocation107_spill] sm:$0xff] %v4141_v0 }
 0x16c   :  { %v1409_v21 = vpop.f32.mrf.mxu0  ;;  %v4143_v36 = vpop.f32.mrf.mxu1 }
 0x16d   :  { %4827 = vst [vmem:[#allocation108_spill] sm:$0xff] %v4143_v36 }
 0x16e   :  { %v3044_v55 = vpop.f32.mrf.mxu0  ;;  %v4145_v1 = vpop.f32.mrf.mxu1 }
 0x16f   :  { %4828 = vst [vmem:[#allocation109_spill] sm:$0xff] %v4145_v1 }
 0x170   :  { %v1412_v25 = vpop.f32.mrf.mxu0  ;;  %v4147_v24 = vpop.f32.mrf.mxu1 }
 0x171   :  { %4829 = vst [vmem:[#allocation110_spill] sm:$0xff] %v4147_v24 }
 0x172   :  { %v3047_v14 = vpop.f32.mrf.mxu0  ;;  %v4149_v15 = vpop.f32.mrf.mxu1 }
 0x173   :  { %4830 = vst [vmem:[#allocation111_spill] sm:$0xff] %v4149_v15 }
 0x174   :  { %v1425_v12 = vpop.f32.mrf.mxu0  ;;  %v4151_v9 = vpop.f32.mrf.mxu1 }
 0x175   :  { %4831 = vst [vmem:[#allocation112_spill] sm:$0xff] %v4151_v9 }
 0x176   :  { %v3048_v2 = vpop.f32.mrf.mxu0  ;;  %v4153_v26 = vpop.f32.mrf.mxu1 }
 0x177   :  { %4832 = vst [vmem:[#allocation113_spill] sm:$0xff] %v4153_v26 }
 0x178   :  { %v1428_v52 = vpop.f32.mrf.mxu0  ;;  %v4155_v0 = vpop.f32.mrf.mxu1 }
 0x179   :  { %4833 = vst [vmem:[#allocation114_spill] sm:$0xff] %v4155_v0 }
 0x17a   :  { %v3051_v17 = vpop.f32.mrf.mxu0  ;;  %v4157_v36 = vpop.f32.mrf.mxu1 }
 0x17b   :  { %4834 = vst [vmem:[#allocation115_spill] sm:$0xff] %v4157_v36 }
 0x17c   :  { %v1441_v44 = vpop.f32.mrf.mxu0  ;;  %v4159_v1 = vpop.f32.mrf.mxu1 }
 0x17d   :  { %4835 = vst [vmem:[#allocation116_spill] sm:$0xff] %v4159_v1 }
 0x17e   :  { %v3052_v42 = vpop.f32.mrf.mxu0  ;;  %v4161_v24 = vpop.f32.mrf.mxu1 }
 0x17f   :  { %4836 = vst [vmem:[#allocation117_spill] sm:$0xff] %v4161_v24 }
 0x180   :  { %v1444_v40 = vpop.f32.mrf.mxu0  ;;  %v4163_v15 = vpop.f32.mrf.mxu1 }
 0x181   :  { %4837 = vst [vmem:[#allocation118_spill] sm:$0xff] %v4163_v15 }
 0x182   :  { %v3055_v45 = vpop.f32.mrf.mxu0  ;;  %v4165_v9 = vpop.f32.mrf.mxu1 }
 0x183   :  { %4838 = vst [vmem:[#allocation119_spill] sm:$0xff] %v4165_v9 }
 0x184   :  { %v1457_v34 = vpop.f32.mrf.mxu0  ;;  %v4167_v26 = vpop.f32.mrf.mxu1 }
 0x185   :  { %4839 = vst [vmem:[#allocation120_spill] sm:$0xff] %v4167_v26 }
 0x186   :  { %v3056_v37 = vpop.f32.mrf.mxu0  ;;  %v4169_v0 = vpop.f32.mrf.mxu1 }
 0x187   :  { %4840 = vst [vmem:[#allocation121_spill] sm:$0xff] %v4169_v0 }
 0x188   :  { %v1460_v49 = vpop.f32.mrf.mxu0  ;;  %v4171_v36 = vpop.f32.mrf.mxu1 }
 0x189   :  { %4841 = vst [vmem:[#allocation122_spill] sm:$0xff] %v4171_v36 }
 0x18a   :  { %v3059_v59 = vpop.f32.mrf.mxu0  ;;  %v4173_v1 = vpop.f32.mrf.mxu1 }
 0x18b   :  { %4842 = vst [vmem:[#allocation123_spill] sm:$0xff] %v4173_v1 }
 0x18c   :  { %v1473_v32 = vpop.f32.mrf.mxu0  ;;  %v4175_v24 = vpop.f32.mrf.mxu1 }
 0x18d   :  { %4843 = vst [vmem:[#allocation124_spill] sm:$0xff] %v4175_v24 }
 0x18e   :  { %v3060_v61 = vpop.f32.mrf.mxu0  ;;  %v4177_v15 = vpop.f32.mrf.mxu1 }
 0x18f   :  { %4844 = vst [vmem:[#allocation125_spill] sm:$0xff] %v4177_v15 }
 0x190   :  { %v1476_v30 = vpop.f32.mrf.mxu0  ;;  %v4179_v9 = vpop.f32.mrf.mxu1 }
 0x191   :  { %4845 = vst [vmem:[#allocation126_spill] sm:$0xff] %v4179_v9 }
 0x192   :  { %v3063_v41 = vpop.f32.mrf.mxu0  ;;  %v4181_v26 = vpop.f32.mrf.mxu1 }
 0x193   :  { %4846 = vst [vmem:[#allocation127_spill] sm:$0xff] %v4181_v26 }
 0x194   :  { %v1489_v28 = vpop.f32.mrf.mxu0  ;;  %v4183_v0 = vpop.f32.mrf.mxu1 }
 0x195   :  { %4847 = vst [vmem:[#allocation128_spill] sm:$0xff] %v4183_v0 }
 0x196   :  { %v4185_v63 = vpop.f32.mrf.mxu0  ;;  %v4187_v36 = vpop.f32.mrf.mxu1 }
 0x197   :  { %4848 = vst [vmem:[#allocation129_spill] sm:$0xff] %v4185_v63  ;;  %4849 = vst [vmem:[#allocation130_spill] sm:$0xff] %v4187_v36 }
 0x198   :  { %v4189_v1 = vpop.f32.mrf.mxu0  ;;  %v4191_v22 = vpop.f32.mrf.mxu1 }
 0x199   :  { %4850 = vst [vmem:[#allocation131_spill] sm:$0xff] %v4189_v1  ;;  %4851 = vst [vmem:[#allocation132_spill] sm:$0xff] %v4191_v22  ;;  %v4860_v22 = vmax.f32 %v3731_v46, %v3937_v13  ;;  %v4864_v1 = vmax.f32 %v3759_v58, %v3961_v43  ;;  %v4868_v58 = vmax.f32 %v3787_v6, %v3985_v19 }
 0x19a   :  { %v4193_v24 = vpop.f32.mrf.mxu0  ;;  %v4195_v15 = vpop.f32.mrf.mxu1  ;;  %v4872_v6 = vmax.f32 %v3815_v18, %v4009_v5  ;;  %v4882_v5 = vld [vmem:[#allocation20_spill] sm:$0xff] }
 0x19b   :  { %4852 = vst [vmem:[#allocation133_spill] sm:$0xff] %v4193_v24  ;;  %4853 = vst [vmem:[#allocation134_spill] sm:$0xff] %v4195_v15  ;;  %v2194_v36 = vmax.f32 %v4860_v22, %v4129_v57  ;;  %v4861_v15 = vmax.f32 %v3735_v48, %v3943_v27  ;;  %v2198_v46 = vmax.f32 %v4864_v1, %v3043_v51  ;;  %v4890_v27 = vld [vmem:[#allocation24_spill] sm:$0xff] }
 0x19c   :  { %v4197_v33 = vpop.f32.mrf.mxu0  ;;  %v4199_v9 = vpop.f32.mrf.mxu1  ;;  %v4865_v57 = vmax.f32 %v3763_v60, %v3967_v35  ;;  %v4866_v48 = vmax.f32 %v3767_v62, %v3973_v31  ;;  %v4244_v51 = vmax.f32 %v4868_v58, %v3047_v14  ;;  %v4869_v60 = vmax.f32 %v3791_v8, %v3991_v11 }
 0x19d   :  { %4854 = vst [vmem:[#allocation135_spill] sm:$0xff] %v4197_v33  ;;  %4855 = vst [vmem:[#allocation136_spill] sm:$0xff] %v4199_v9  ;;  %v2192_v33 = vmax.f32 %v4861_v15, %v4133_v38  ;;  %v4862_v9 = vmax.f32 %v3739_v50, %v3949_v3  ;;  %v4870_v62 = vmax.f32 %v3795_v10, %v3997_v7  ;;  %v4874_v3 = vld [vmem:[#allocation65_spill] sm:$0xff] }
 0x19e   :  { %v4201_v26 = vpop.f32.mrf.mxu0  ;;  %v4203_v20 = vpop.f32.mrf.mxu1  ;;  %v4229_v22 = vmax.f32 %v4865_v57, %v1409_v21  ;;  %v4234_v50 = vmax.f32 %v4866_v48, %v3044_v55  ;;  %v4249_v21 = vmax.f32 %v4869_v60, %v1425_v12  ;;  %v4264_v19 = vmax.f32 %v4872_v6, %v3051_v17  ;;  %v4877_v12 = vld [vmem:[#allocation67_spill] sm:$0xff]  ;;  %v4896_v60 = vld [vmem:[#allocation28_spill] sm:$0xff]  ;;  %v4900_v6 = vld [vmem:[#allocation81_spill] sm:$0xff] }
 0x19f   :  { %4856 = vst [vmem:[#allocation137_spill] sm:$0xff] %v4201_v26  ;;  %4857 = vst [vmem:[#allocation138_spill] sm:$0xff] %v4203_v20  ;;  %v2195_v26 = vmax.f32 %v4862_v9, %v3040_v39  ;;  %v4863_v20 = vmax.f32 %v3755_v56, %v3955_v53  ;;  %v4867_v56 = vmax.f32 %v3783_v4, %v3979_v23  ;;  %v4873_v53 = vld [vmem:[#allocation14_spill] sm:$0xff]  ;;  %v4883_v17 = vld [vmem:[#allocation71_spill] sm:$0xff] }
 0x1a0   :  { %v4205_v0 = vpop.f32.mrf.mxu0  ;;  %v4207_v63 = vpop.f32.mrf.mxu1  ;;  %v4254_v31 = vmax.f32 %v4870_v62, %v3048_v2  ;;  %v4871_v4 = vmax.f32 %v3811_v16, %v4003_v29  ;;  %v4875_v7 = vmax.f32 %v4873_v53, %v4874_v3  ;;  %v4876_v2 = vld [vmem:[#allocation16_spill] sm:$0xff]  ;;  %v4879_v16 = vld [vmem:[#allocation18_spill] sm:$0xff]  ;;  %v4880_v29 = vld [vmem:[#allocation69_spill] sm:$0xff]  ;;  %v4884_v18 = vmax.f32 %v4882_v5, %v4883_v17 }
 0x1a1   :  { %4858 = vst [vmem:[#allocation139_spill] sm:$0xff] %v4205_v0  ;;  %4859 = vst [vmem:[#allocation140_spill] sm:$0xff] %v4207_v63  ;;  %v2193_v0 = vmax.f32 %v4863_v20, %v1396_v54  ;;  %v4239_v20 = vmax.f32 %v4867_v56, %v1412_v25  ;;  %v4878_v13 = vmax.f32 %v4876_v2, %v4877_v12  ;;  %v4885_v25 = vld [vmem:[#allocation22_spill] sm:$0xff]  ;;  %v4889_v54 = vld [vmem:[#allocation52_spill] sm:$0xff] }
 0x1a2   :  { %v3071_v24 = vpop.f32.mrf.mxu0  ;;  %v3199_v63 = vpop.f32.mrf.mxu1  ;;  %v4259_v23 = vmax.f32 %v4871_v4, %v1428_v52  ;;  %v4270_v10 = vmax.f32 %v4875_v7, %v1441_v44  ;;  %v4881_v52 = vmax.f32 %v4879_v16, %v4880_v29  ;;  %v4886_v44 = vld [vmem:[#allocation73_spill] sm:$0xff]  ;;  %v4888_v39 = vld [vmem:[#allocation2_spill] sm:$0xff]  ;;  %v4897_v62 = vld [vmem:[#allocation79_spill] sm:$0xff] }
 0x1a3   :  { %v2226_v9 = vmax.f32 %v2194_v36, %v3071_v24  ;;  %v4275_v14 = vmax.f32 %v4878_v13, %v3052_v42  ;;  %v4887_v36 = vmax.f32 %v4885_v25, %v4886_v44  ;;  %v4899_v4 = vld [vmem:[#allocation30_spill] sm:$0xff]  ;;  %v4903_v7 = vld [vmem:[#allocation3_spill] sm:$0xff]  ;;  %v4904_v12 = vld [vmem:[#allocation53_spill] sm:$0xff] }
 0x1a4   :  { %v1521_v35 = vpop.f32.mrf.mxu0  ;;  %v2033_v43 = vpop.f32.mrf.mxu1  ;;  %v4280_v15 = vmax.f32 %v4881_v52, %v1444_v40  ;;  %v4891_v40 = vld [vmem:[#allocation75_spill] sm:$0xff]  ;;  %v4905_v16 = vld [vmem:[#allocation32_spill] sm:$0xff]  ;;  %v4908_v5 = vld [vmem:[#allocation34_spill] sm:$0xff] }
 0x1a5   :  { %v2258_v8 = vmax.f32 %v2226_v9, %v3733_v47  ;;  %v2224_v11 = vmax.f32 %v2192_v33, %v1521_v35  ;;  %v4285_v47 = vmax.f32 %v4884_v18, %v3055_v45  ;;  %v4290_v38 = vmax.f32 %v4887_v36, %v1457_v34  ;;  %v4893_v9 = vld [vmem:[#allocation26_spill] sm:$0xff]  ;;  %v4894_v45 = vld [vmem:[#allocation77_spill] sm:$0xff]  ;;  %v4906_v29 = vld [vmem:[#allocation83_spill] sm:$0xff] }
 0x1a6   :  { %v3072_v33 = vpop.f32.mrf.mxu0  ;;  %v3200_v24 = vpop.f32.mrf.mxu1  ;;  %v4892_v57 = vmax.f32 %v4890_v27, %v4891_v40  ;;  %v4895_v56 = vmax.f32 %v4893_v9, %v4894_v45  ;;  %v4898_v35 = vmax.f32 %v4896_v60, %v4897_v62  ;;  %v4907_v52 = vmax.f32 %v4905_v16, %v4906_v29  ;;  %v4909_v17 = vld [vmem:[#allocation85_spill] sm:$0xff]  ;;  %v4912_v25 = vld [vmem:[#allocation87_spill] sm:$0xff]  ;;  %v4919_v45 = vld [vmem:[#allocation54_spill] sm:$0xff] }
 0x1a7   :  { %v2256_v42 = vmax.f32 %v2224_v11, %v4888_v39  ;;  %v2290_v55 = vmax.f32 %v2258_v8, %v4889_v54  ;;  %v2227_v1 = vmax.f32 %v2195_v26, %v3072_v33  ;;  %v4901_v11 = vmax.f32 %v4899_v4, %v4900_v6  ;;  %v4911_v33 = vld [vmem:[#allocation36_spill] sm:$0xff]  ;;  %v4914_v39 = vld [vmem:[#allocation38_spill] sm:$0xff]  ;;  %v4915_v54 = vld [vmem:[#allocation89_spill] sm:$0xff] }
 0x1a8   :  { %v4297_v48 = vmax.f32 %v4892_v57, %v3056_v37  ;;  %v4302_v58 = vmax.f32 %v4895_v56, %v1460_v49  ;;  %v4307_v34 = vmax.f32 %v4898_v35, %v3059_v59  ;;  %v1524_v26 = vpop.f32.mrf.mxu0  ;;  %v2036_v53 = vpop.f32.mrf.mxu1  ;;  %v4902_v37 = vld [vmem:[#allocation103_spill] sm:$0xff]  ;;  %v4320_v59 = vmax.f32 %v4907_v52, %v3060_v61  ;;  %v4340_v61 = vld [vmem:[%s4681_s2] ss:$0 sm:$0xff]  ;;  %v4918_v57 = vld [vmem:[#allocation4_spill] sm:$0xff] }
 0x1a9   :  { %v4312_v8 = vmax.f32 %v4901_v11, %v1473_v32  ;;  %v2322_v3 = vmax.f32 %v2290_v55, %v4902_v37  ;;  %v2259_v2 = vmax.f32 %v2227_v1, %v4903_v7  ;;  %v2288_v49 = vmax.f32 %v2256_v42, %v4904_v12  ;;  %v4920_v56 = vld [vmem:[#allocation129_spill] sm:$0xff]  ;;  %v4921_v60 = vld [vmem:[#allocation40_spill] sm:$0xff]  ;;  %v4922_v62 = vld [vmem:[#allocation91_spill] sm:$0xff] }
 0x1aa   :  { %v2225_v13 = vmax.f32 %v2193_v0, %v1524_v26  ;;  %v4910_v18 = vmax.f32 %v4908_v5, %v4909_v17  ;;  %v4913_v44 = vmax.f32 %v4911_v33, %v4912_v25  ;;  %v4916_v55 = vmax.f32 %v4914_v39, %v4915_v54  ;;  %v3075_v0 = vpop.f32.mrf.mxu0  ;;  %v3203_v1 = vpop.f32.mrf.mxu1  ;;  %v4924_v4 = vld [vmem:[#allocation131_spill] sm:$0xff]  ;;  %v4925_v6 = vld [vmem:[#allocation42_spill] sm:$0xff]  ;;  %v4926_v11 = vld [vmem:[#allocation93_spill] sm:$0xff] }
 0x1ab   :  { %v2354_v27 = vmax.f32 %v2322_v3, %v3199_v63  ;;  %v4923_v35 = vmax.f32 %v4921_v60, %v4922_v62  ;;  %v4927_v26 = vmax.f32 %v4925_v6, %v4926_v11  ;;  %v4928_v7 = vld [vmem:[#allocation133_spill] sm:$0xff]  ;;  %v4929_v63 = vld [vmem:[#allocation44_spill] sm:$0xff]  ;;  %v4930_v3 = vld [vmem:[#allocation95_spill] sm:$0xff] }
 0x1ac   :  { %v4325_v32 = vmax.f32 %v4910_v18, %v1476_v30  ;;  %v4330_v36 = vmax.f32 %v4913_v44, %v3063_v41  ;;  %v4335_v42 = vmax.f32 %v4916_v55, %v1489_v28  ;;  %v4917_v30 = vld [vmem:[#allocation104_spill] sm:$0xff]  ;;  %v2257_v9 = vmax.f32 %v2225_v13, %v4918_v57  ;;  %v2049_v16 = vpop.f32.mrf.mxu1  ;;  %v4932_v5 = vld [vmem:[#allocation105_spill] sm:$0xff]  ;;  %v4933_v18 = vld [vmem:[#allocation55_spill] sm:$0xff] }
 0x1ad   :  { %v2320_v40 = vmax.f32 %v2288_v49, %v4917_v30  ;;  %v2291_v41 = vmax.f32 %v2259_v2, %v4919_v45  ;;  %v4349_v28 = vmax.f32 %v4923_v35, %v4920_v56  ;;  %v4355_v37 = vmax.f32 %v4927_v26, %v4924_v4  ;;  %v1537_v2 = vpop.f32.mrf.mxu0  ;;  %v4934_v25 = vld [vmem:[#allocation135_spill] sm:$0xff]  ;;  %v4935_v44 = vld [vmem:[#allocation46_spill] sm:$0xff]  ;;  %v4936_v39 = vld [vmem:[#allocation97_spill] sm:$0xff] }
 0x1ae   :  { %v4931_v12 = vmax.f32 %v4929_v63, %v4930_v3  ;;  %v2230_v13 = vmax.f32 %v2198_v46, %v3075_v0  ;;  %v2393_v29 = vadd.f32 %v4340_v61, %v2354_v27  ;;  %v2289_v33 = vmax.f32 %v2257_v9, %v4933_v18  ;;  %v4938_v30 = vld [vmem:[#allocation137_spill] sm:$0xff]  ;;  %v4939_v57 = vld [vmem:[#allocation48_spill] sm:$0xff]  ;;  %v4940_v45 = vld [vmem:[#allocation99_spill] sm:$0xff] }
 0x1af   :  { %v2352_v52 = vmax.f32 %v2320_v40, %v2033_v43  ;;  %v2323_v17 = vmax.f32 %v2291_v41, %v4932_v5  ;;  %v4937_v54 = vmax.f32 %v4935_v44, %v4936_v39  ;;  %v4941_v56 = vmax.f32 %v4939_v57, %v4940_v45  ;;  %v4942_v0 = vld [vmem:[#allocation5_spill] sm:$0xff]  ;;  %v3076_v27 = vpop.f32.mrf.mxu0  ;;  %v4380_v40 = vpop.f32.mrf.mxu1  ;;  %v4943_v35 = vld [vmem:[#allocation106_spill] sm:$0xff]  ;;  %v4944_v6 = vld [vmem:[#allocation139_spill] sm:$0xff] }
 0x1b0   :  { %v4361_v49 = vmax.f32 %v4931_v12, %v4928_v7  ;;  %v2262_v60 = vmax.f32 %v2230_v13, %v4942_v0  ;;  %v2228_v43 = vmax.f32 %v4229_v22, %v1537_v2  ;;  %v2425_v9 = vmax.f32 %v2393_v29, 0.0  ;;  %v4945_v11 = vld [vmem:[#allocation50_spill] sm:$0xff]  ;;  %v4946_v26 = vld [vmem:[#allocation101_spill] sm:$0xff]  ;;  %v4949_v13 = vld [vmem:[#allocation56_spill] sm:$0xff] }
 0x1b1   :  { %v4370_v55 = vmax.f32 %v4937_v54, %v4934_v25  ;;  %v4376_v46 = vmax.f32 %v4941_v56, %v4938_v30  ;;  %v2391_v41 = vadd.f32 %v4340_v61, %v2352_v52  ;;  %v2355_v62 = vmax.f32 %v2323_v17, %v3200_v24  ;;  %v4948_v3 = vld [vmem:[#allocation6_spill] sm:$0xff]  ;;  %v1540_v2 = vpop.f32.mrf.mxu0  ;;  %v4393_v18 = vpop.f32.mrf.mxu1  ;;  %v4951_v44 = vld [vmem:[#allocation7_spill] sm:$0xff]  ;;  %v4952_v54 = vld [vmem:[#allocation57_spill] sm:$0xff] }
 0x1b2   :  { %v2321_v4 = vmax.f32 %v2289_v33, %v4943_v35  ;;  %v4947_v7 = vmax.f32 %v4945_v11, %v4946_v26  ;;  %v2260_v12 = vmax.f32 %v2228_v43, %v4948_v3  ;;  %v2294_v5 = vmax.f32 %v2262_v60, %v4949_v13  ;;  %v4950_v33 = vld [vmem:[#allocation107_spill] sm:$0xff]  ;;  %v4955_v35 = vld [vmem:[#allocation58_spill] sm:$0xff]  ;;  %v4957_v13 = vld [vmem:[#allocation109_spill] sm:$0xff] }
 0x1b3   :  { %v2231_v22 = vmax.f32 %v4234_v50, %v3076_v27  ;;  %v2791_v29 = vpack.c.bf16 %v2425_v9, %v2425_v9  ;;  %v2423_v52 = vmax.f32 %v2391_v41, 0.0  ;;  %v2394_v24 = vadd.f32 %v4340_v61, %v2355_v62  ;;  %v3079_v45 = vpop.f32.mrf.mxu0  ;;  %v3207_v56 = vpop.f32.mrf.mxu1  ;;  %v4953_v27 = vld [vmem:[#allocation108_spill] sm:$0xff] }
 0x1b4   :  { %v4388_v63 = vmax.f32 %v4947_v7, %v4944_v6  ;;  %v2353_v17 = vmax.f32 %v2321_v4, %v2036_v53  ;;  %v2326_v25 = vmax.f32 %v2294_v5, %v4950_v33  ;;  %v2292_v30 = vmax.f32 %v2260_v12, %v4952_v54  ;;  %v4954_v41 = vld [vmem:[#allocation8_spill] sm:$0xff]  ;;  %v4956_v7 = vld [vmem:[#allocation9_spill] sm:$0xff] }
 0x1b5   :  { %v2263_v39 = vmax.f32 %v2231_v22, %v4951_v44  ;;  %v2229_v57 = vmax.f32 %v4239_v20, %v1540_v2  ;;  %2586 = vst.msk [vmem:[%s4682_s3 + $0x8] sm:$0xf] %vm2583_vm0, %v2791_v29  ;;  %v2789_v50 = vpack.c.bf16 %v2423_v52, %v2423_v52  ;;  %v2426_v0 = vmax.f32 %v2394_v24, 0.0  ;;  %v1553_v4 = vpop.f32.mrf.mxu0  ;;  %v2065_v6 = vpop.f32.mrf.mxu1  ;;  %v4958_v22 = vld [vmem:[#allocation59_spill] sm:$0xff] }
 0x1b6   :  { %v2392_v60 = vadd.f32 %v4340_v61, %v2353_v17  ;;  %v2234_v53 = vmax.f32 %v4244_v51, %v3079_v45  ;;  %v2358_v43 = vmax.f32 %v2326_v25, %v3203_v1  ;;  %v2324_v9 = vmax.f32 %v2292_v30, %v4953_v27  ;;  %v4959_v17 = vld [vmem:[#allocation10_spill] sm:$0xff]  ;;  %v4960_v25 = vld [vmem:[#allocation60_spill] sm:$0xff]  ;;  %v4964_v27 = vld [vmem:[#allocation61_spill] sm:$0xff] }
 0x1b7   :  { %v2261_v62 = vmax.f32 %v2229_v57, %v4954_v41  ;;  %v2295_v20 = vmax.f32 %v2263_v39, %v4955_v35  ;;  %2584 = vst.msk [vmem:[%s4682_s3] sm:$0xf] %vm2583_vm0, %v2789_v50  ;;  %v2792_v11 = vpack.c.bf16 %v2426_v0, %v2426_v0  ;;  %v2232_v51 = vmax.f32 %v4249_v21, %v1553_v4  ;;  %v3080_v29 = vpop.f32.mrf.mxu0  ;;  %v3208_v52 = vpop.f32.mrf.mxu1  ;;  %v4961_v30 = vld [vmem:[#allocation110_spill] sm:$0xff]  ;;  %v4962_v0 = vld [vmem:[#allocation111_spill] sm:$0xff] }
 0x1b8   :  { %v2424_v26 = vmax.f32 %v2392_v60, 0.0  ;;  %v2266_v3 = vmax.f32 %v2234_v53, %v4956_v7  ;;  %v2397_v1 = vadd.f32 %v4340_v61, %v2358_v43  ;;  %v2356_v12 = vmax.f32 %v2324_v9, %v2049_v16  ;;  %v4963_v53 = vld [vmem:[#allocation11_spill] sm:$0xff] }
 0x1b9   :  { %v2327_v5 = vmax.f32 %v2295_v20, %v4957_v13  ;;  %v2293_v2 = vmax.f32 %v2261_v62, %v4958_v22  ;;  %2587 = vst.msk [vmem:[%s4682_s3 + $0xc] sm:$0xf] %vm2583_vm0, %v2792_v11  ;;  %v2264_v33 = vmax.f32 %v2232_v51, %v4959_v17  ;;  %v2235_v21 = vmax.f32 %v4254_v31, %v3080_v29  ;;  %v1556_v45 = vpop.f32.mrf.mxu0  ;;  %v2068_v50 = vpop.f32.mrf.mxu1 }
 0x1ba   :  { %v2790_v24 = vpack.c.bf16 %v2424_v26, %v2424_v26  ;;  %v2298_v44 = vmax.f32 %v2266_v3, %v4960_v25  ;;  %v2429_v39 = vmax.f32 %v2397_v1, 0.0  ;;  %v2395_v16 = vadd.f32 %v4340_v61, %v2356_v12  ;;  %v4965_v26 = vld [vmem:[#allocation112_spill] sm:$0xff]  ;;  %v4967_v1 = vld [vmem:[#allocation62_spill] sm:$0xff] }
 0x1bb   :  { %v2359_v54 = vmax.f32 %v2327_v5, %v4380_v40  ;;  %v2325_v57 = vmax.f32 %v2293_v2, %v4961_v30  ;;  %v2267_v43 = vmax.f32 %v2235_v21, %v4963_v53  ;;  %v2296_v31 = vmax.f32 %v2264_v33, %v4964_v27  ;;  %v3083_v20 = vpop.f32.mrf.mxu0  ;;  %v3211_v4 = vpop.f32.mrf.mxu1  ;;  %v4966_v3 = vld [vmem:[#allocation12_spill] sm:$0xff]  ;;  %v4969_v33 = vld [vmem:[#allocation63_spill] sm:$0xff] }
 0x1bc   :  { %2585 = vst.msk [vmem:[%s4682_s3 + $0x4] sm:$0xf] %vm2583_vm0, %v2790_v24  ;;  %v2330_v60 = vmax.f32 %v2298_v44, %v4962_v0  ;;  %v2233_v9 = vmax.f32 %v4259_v23, %v1556_v45  ;;  %v2795_v41 = vpack.c.bf16 %v2429_v39, %v2429_v39  ;;  %v2427_v62 = vmax.f32 %v2395_v16, 0.0  ;;  %v4968_v24 = vld [vmem:[#allocation113_spill] sm:$0xff]  ;;  %v4971_v0 = vld [vmem:[#allocation114_spill] sm:$0xff] }
 0x1bd   :  { %v2398_v40 = vadd.f32 %v4340_v61, %v2359_v54  ;;  %v2357_v35 = vmax.f32 %v2325_v57, %v4393_v18  ;;  %v2328_v7 = vmax.f32 %v2296_v31, %v4965_v26  ;;  %v2299_v12 = vmax.f32 %v2267_v43, %v4967_v1  ;;  %v1569_v22 = vpop.f32.mrf.mxu0  ;;  %v4447_v2 = vpop.f32.mrf.mxu1  ;;  %v4970_v39 = vld [vmem:[#allocation13_spill] sm:$0xff]  ;;  %v4972_v43 = vld [vmem:[#allocation15_spill] sm:$0xff]  ;;  %v4973_v31 = vld [vmem:[#allocation64_spill] sm:$0xff] }
 0x1be   :  { %v2362_v11 = vmax.f32 %v2330_v60, %v3207_v56  ;;  %v2265_v51 = vmax.f32 %v2233_v9, %v4966_v3  ;;  %2590 = vst.msk [vmem:[%s4682_s3 + $0x18] sm:$0xf] %vm2583_vm0, %v2795_v41  ;;  %v2793_v23 = vpack.c.bf16 %v2427_v62, %v2427_v62  ;;  %v2238_v18 = vmax.f32 %v4264_v19, %v3083_v20 }
 0x1bf   :  { %v2430_v13 = vmax.f32 %v2398_v40, 0.0  ;;  %v2396_v5 = vadd.f32 %v4340_v61, %v2357_v35  ;;  %v2360_v29 = vmax.f32 %v2328_v7, %v2065_v6  ;;  %v2331_v17 = vmax.f32 %v2299_v12, %v4968_v24  ;;  %v3084_v54 = vpop.f32.mrf.mxu0  ;;  %v4458_v30 = vpop.f32.mrf.mxu1  ;;  %v4975_v7 = vld [vmem:[#allocation17_spill] sm:$0xff]  ;;  %v4978_v24 = vld [vmem:[#allocation19_spill] sm:$0xff] }
 0x1c0   :  { %v2401_v56 = vadd.f32 %v4340_v61, %v2362_v11  ;;  %v2297_v25 = vmax.f32 %v2265_v51, %v4969_v33  ;;  %2588 = vst.msk [vmem:[%s4682_s3 + $0x10] sm:$0xf] %vm2583_vm0, %v2793_v23  ;;  %v2270_v16 = vmax.f32 %v2238_v18, %v4970_v39  ;;  %v2236_v19 = vmax.f32 %v4270_v10, %v1569_v22  ;;  %v4974_v11 = vld [vmem:[#allocation115_spill] sm:$0xff]  ;;  %v4976_v51 = vld [vmem:[#allocation66_spill] sm:$0xff]  ;;  %v4979_v33 = vld [vmem:[#allocation68_spill] sm:$0xff] }
 0x1c1   :  { %v2796_v44 = vpack.c.bf16 %v2430_v13, %v2430_v13  ;;  %v2428_v21 = vmax.f32 %v2396_v5, 0.0  ;;  %v2399_v6 = vadd.f32 %v4340_v61, %v2360_v29  ;;  %v2363_v45 = vmax.f32 %v2331_v17, %v3208_v52  ;;  %v1572_v41 = vpop.f32.mrf.mxu0  ;;  %v4469_v62 = vpop.f32.mrf.mxu1 }
 0x1c2   :  { %v2433_v57 = vmax.f32 %v2401_v56, 0.0  ;;  %v2329_v60 = vmax.f32 %v2297_v25, %v4971_v0  ;;  %v2268_v27 = vmax.f32 %v2236_v19, %v4972_v43  ;;  %v2302_v9 = vmax.f32 %v2270_v16, %v4973_v31  ;;  %v4977_v56 = vld [vmem:[#allocation116_spill] sm:$0xff]  ;;  %v4980_v16 = vld [vmem:[#allocation21_spill] sm:$0xff] }
 0x1c3   :  { %2591 = vst.msk [vmem:[%s4682_s3 + $0x1c] sm:$0xf] %vm2583_vm0, %v2796_v44  ;;  %v2794_v53 = vpack.c.bf16 %v2428_v21, %v2428_v21  ;;  %v2239_v10 = vmax.f32 %v4275_v14, %v3084_v54  ;;  %v2431_v35 = vmax.f32 %v2399_v6, 0.0  ;;  %v2402_v52 = vadd.f32 %v4340_v61, %v2363_v45  ;;  %v3087_v12 = vpop.f32.mrf.mxu0  ;;  %v3215_v23 = vpop.f32.mrf.mxu1  ;;  %v4982_v45 = vld [vmem:[#allocation70_spill] sm:$0xff] }
 0x1c4   :  { %v2799_v40 = vpack.c.bf16 %v2433_v57, %v2433_v57  ;;  %v2361_v20 = vmax.f32 %v2329_v60, %v2068_v50  ;;  %v2334_v26 = vmax.f32 %v2302_v9, %v4974_v11  ;;  %v2300_v1 = vmax.f32 %v2268_v27, %v4976_v51  ;;  %v4981_v57 = vld [vmem:[#allocation117_spill] sm:$0xff]  ;;  %v4983_v27 = vld [vmem:[#allocation23_spill] sm:$0xff]  ;;  %v4984_v9 = vld [vmem:[#allocation72_spill] sm:$0xff] }
 0x1c5   :  { %2589 = vst.msk [vmem:[%s4682_s3 + $0x14] sm:$0xf] %vm2583_vm0, %v2794_v53  ;;  %v2271_v3 = vmax.f32 %v2239_v10, %v4975_v7  ;;  %v2237_v14 = vmax.f32 %v4280_v15, %v1572_v41  ;;  %v2797_v50 = vpack.c.bf16 %v2431_v35, %v2431_v35  ;;  %v2434_v13 = vmax.f32 %v2402_v52, 0.0  ;;  %v1585_v25 = vpop.f32.mrf.mxu0  ;;  %v2097_v44 = vpop.f32.mrf.mxu1  ;;  %v4985_v35 = vld [vmem:[#allocation118_spill] sm:$0xff] }
 0x1c6   :  { %2594 = vst.msk [vmem:[%s4682_s3 + $0x28] sm:$0xf] %vm2583_vm0, %v2799_v40  ;;  %v2400_v5 = vadd.f32 %v4340_v61, %v2361_v20  ;;  %v2242_v18 = vmax.f32 %v4285_v47, %v3087_v12  ;;  %v2366_v22 = vmax.f32 %v2334_v26, %v3211_v4  ;;  %v2332_v29 = vmax.f32 %v2300_v1, %v4977_v56  ;;  %v4986_v26 = vld [vmem:[#allocation119_spill] sm:$0xff]  ;;  %v4988_v1 = vld [vmem:[#allocation74_spill] sm:$0xff]  ;;  %v4989_v56 = vld [vmem:[#allocation120_spill] sm:$0xff] }
 0x1c7   :  { %v2269_v17 = vmax.f32 %v2237_v14, %v4978_v24  ;;  %v2303_v15 = vmax.f32 %v2271_v3, %v4979_v33  ;;  %2592 = vst.msk [vmem:[%s4682_s3 + $0x20] sm:$0xf] %vm2583_vm0, %v2797_v50  ;;  %v2800_v21 = vpack.c.bf16 %v2434_v13, %v2434_v13  ;;  %v2240_v47 = vmax.f32 %v4290_v38, %v1585_v25  ;;  %v3088_v60 = vpop.f32.mrf.mxu0  ;;  %v3216_v53 = vpop.f32.mrf.mxu1  ;;  %v4987_v3 = vld [vmem:[#allocation25_spill] sm:$0xff]  ;;  %v4990_v24 = vld [vmem:[#allocation27_spill] sm:$0xff]  ;;  %v4991_v33 = vld [vmem:[#allocation76_spill] sm:$0xff] }
 0x1c8   :  { %v2432_v39 = vmax.f32 %v2400_v5, 0.0  ;;  %v2274_v19 = vmax.f32 %v2242_v18, %v4980_v16  ;;  %v2405_v4 = vadd.f32 %v4340_v61, %v2366_v22  ;;  %v2364_v54 = vmax.f32 %v2332_v29, %v4447_v2 }
 0x1c9   :  { %v2335_v6 = vmax.f32 %v2303_v15, %v4981_v57  ;;  %v2301_v0 = vmax.f32 %v2269_v17, %v4982_v45  ;;  %2595 = vst.msk [vmem:[%s4682_s3 + $0x2c] sm:$0xf] %vm2583_vm0, %v2800_v21  ;;  %v2272_v31 = vmax.f32 %v2240_v47, %v4983_v27  ;;  %v2243_v10 = vmax.f32 %v4297_v48, %v3088_v60  ;;  %v1588_v20 = vpop.f32.mrf.mxu0  ;;  %v2100_v11 = vpop.f32.mrf.mxu1  ;;  %v4992_v47 = vld [vmem:[#allocation121_spill] sm:$0xff] }
 0x1ca   :  { %v2798_v43 = vpack.c.bf16 %v2432_v39, %v2432_v39  ;;  %v2306_v38 = vmax.f32 %v2274_v19, %v4984_v9  ;;  %v2437_v41 = vmax.f32 %v2405_v4, 0.0  ;;  %v2403_v2 = vadd.f32 %v4340_v61, %v2364_v54  ;;  %v4993_v54 = vld [vmem:[#allocation78_spill] sm:$0xff] }
 0x1cb   :  { %v2367_v40 = vmax.f32 %v2335_v6, %v4458_v30  ;;  %v2333_v52 = vmax.f32 %v2301_v0, %v4985_v35  ;;  %v2275_v51 = vmax.f32 %v2243_v10, %v4987_v3  ;;  %v2304_v48 = vmax.f32 %v2272_v31, %v4988_v1  ;;  %v3091_v5 = vpop.f32.mrf.mxu0  ;;  %v3219_v18 = vpop.f32.mrf.mxu1  ;;  %v4994_v0 = vld [vmem:[#allocation29_spill] sm:$0xff]  ;;  %v4997_v35 = vld [vmem:[#allocation80_spill] sm:$0xff]  ;;  %v4998_v1 = vld [vmem:[#allocation123_spill] sm:$0xff] }
 0x1cc   :  { %2593 = vst.msk [vmem:[%s4682_s3 + $0x24] sm:$0xf] %vm2583_vm0, %v2798_v43  ;;  %v2338_v7 = vmax.f32 %v2306_v38, %v4986_v26  ;;  %v2241_v14 = vmax.f32 %v4302_v58, %v1588_v20  ;;  %v2803_v12 = vpack.c.bf16 %v2437_v41, %v2437_v41  ;;  %v2435_v50 = vmax.f32 %v2403_v2, 0.0  ;;  %v4995_v38 = vld [vmem:[#allocation122_spill] sm:$0xff]  ;;  %v4996_v2 = vld [vmem:[#allocation31_spill] sm:$0xff] }
 0x1cd   :  { %v2406_v30 = vadd.f32 %v4340_v61, %v2367_v40  ;;  %v2365_v13 = vmax.f32 %v2333_v52, %v4469_v62  ;;  %v2336_v29 = vmax.f32 %v2304_v48, %v4989_v56  ;;  %v2307_v15 = vmax.f32 %v2275_v51, %v4991_v33  ;;  %v1601_v39 = vpop.f32.mrf.mxu0  ;;  %v4528_v16 = vpop.f32.mrf.mxu1 }
 0x1ce   :  { %v2370_v22 = vmax.f32 %v2338_v7, %v3215_v23  ;;  %v2273_v17 = vmax.f32 %v2241_v14, %v4990_v24  ;;  %2598 = vst.msk [vmem:[%s4682_s3 + $0x38] sm:$0xf] %vm2583_vm0, %v2803_v12  ;;  %v2801_v58 = vpack.c.bf16 %v2435_v50, %v2435_v50  ;;  %v2246_v62 = vmax.f32 %v4307_v34, %v3091_v5  ;;  %v4999_v14 = vld [vmem:[#allocation33_spill] sm:$0xff]  ;;  %v5000_v50 = vld [vmem:[#allocation82_spill] sm:$0xff] }
 0x1cf   :  { %v2438_v25 = vmax.f32 %v2406_v30, 0.0  ;;  %v2404_v21 = vadd.f32 %v4340_v61, %v2365_v13  ;;  %v2368_v19 = vmax.f32 %v2336_v29, %v2097_v44  ;;  %v2339_v4 = vmax.f32 %v2307_v15, %v4992_v47  ;;  %v3092_v43 = vpop.f32.mrf.mxu0  ;;  %v4539_v27 = vpop.f32.mrf.mxu1  ;;  %v5002_v15 = vld [vmem:[#allocation35_spill] sm:$0xff] }
 0x1d0   :  { %v2409_v23 = vadd.f32 %v4340_v61, %v2370_v22  ;;  %v2305_v57 = vmax.f32 %v2273_v17, %v4993_v54  ;;  %2596 = vst.msk [vmem:[%s4682_s3 + $0x30] sm:$0xf] %vm2583_vm0, %v2801_v58  ;;  %v2278_v60 = vmax.f32 %v2246_v62, %v4994_v0  ;;  %v2244_v34 = vmax.f32 %v4312_v8, %v1601_v39  ;;  %v5001_v17 = vld [vmem:[#allocation124_spill] sm:$0xff]  ;;  %v5005_v54 = vld [vmem:[#allocation125_spill] sm:$0xff] }
 0x1d1   :  { %v2804_v6 = vpack.c.bf16 %v2438_v25, %v2438_v25  ;;  %v2436_v45 = vmax.f32 %v2404_v21, 0.0  ;;  %v2407_v44 = vadd.f32 %v4340_v61, %v2368_v19  ;;  %v2371_v9 = vmax.f32 %v2339_v4, %v3216_v53  ;;  %v1604_v20 = vpop.f32.mrf.mxu0  ;;  %v4550_v26 = vpop.f32.mrf.mxu1  ;;  %v5003_v25 = vld [vmem:[#allocation84_spill] sm:$0xff]  ;;  %v5004_v19 = vld [vmem:[#allocation37_spill] sm:$0xff] }
 0x1d2   :  { %v2441_v31 = vmax.f32 %v2409_v23, 0.0  ;;  %v2337_v10 = vmax.f32 %v2305_v57, %v4995_v38  ;;  %v2276_v40 = vmax.f32 %v2244_v34, %v4996_v2  ;;  %v2310_v52 = vmax.f32 %v2278_v60, %v4997_v35  ;;  %v5010_v35 = vld [vmem:[#allocation127_spill] sm:$0xff] }
 0x1d3   :  { %2599 = vst.msk [vmem:[%s4682_s3 + $0x3c] sm:$0xf] %vm2583_vm0, %v2804_v6  ;;  %v2802_v41 = vpack.c.bf16 %v2436_v45, %v2436_v45  ;;  %v2247_v8 = vmax.f32 %v4320_v59, %v3092_v43  ;;  %v2439_v3 = vmax.f32 %v2407_v44, 0.0  ;;  %v2410_v53 = vadd.f32 %v4340_v61, %v2371_v9  ;;  %v3095_v13 = vpop.f32.mrf.mxu0  ;;  %v3223_v5 = vpop.f32.mrf.mxu1  ;;  %v5006_v6 = vld [vmem:[#allocation86_spill] sm:$0xff]  ;;  %v5007_v43 = vld [vmem:[#allocation39_spill] sm:$0xff]  ;;  %v5008_v44 = vld [vmem:[#allocation88_spill] sm:$0xff] }
 0x1d4   :  { %v2807_v7 = vpack.c.bf16 %v2441_v31, %v2441_v31  ;;  %v2369_v51 = vmax.f32 %v2337_v10, %v2100_v11  ;;  %v2342_v48 = vmax.f32 %v2310_v52, %v4998_v1  ;;  %v2308_v30 = vmax.f32 %v2276_v40, %v5000_v50  ;;  %v5013_v50 = vld [vmem:[#allocation128_spill] sm:$0xff] }
 0x1d5   :  { %2597 = vst.msk [vmem:[%s4682_s3 + $0x34] sm:$0xf] %vm2583_vm0, %v2802_v41  ;;  %v2279_v12 = vmax.f32 %v2247_v8, %v4999_v14  ;;  %v2245_v59 = vmax.f32 %v4325_v32, %v1604_v20  ;;  %v2805_v11 = vpack.c.bf16 %v2439_v3, %v2439_v3  ;;  %v2442_v22 = vmax.f32 %v2410_v53, 0.0  ;;  %v1617_v21 = vpop.f32.mrf.mxu0  ;;  %v2129_v62 = vpop.f32.mrf.mxu1  ;;  %v5009_v41 = vld [vmem:[#allocation126_spill] sm:$0xff]  ;;  %v5011_v8 = vld [vmem:[#allocation41_spill] sm:$0xff] }
 0x1d6   :  { %2602 = vst.msk [vmem:[%s4682_s3 + $0x48] sm:$0xf] %vm2583_vm0, %v2807_v7  ;;  %v2408_v56 = vadd.f32 %v4340_v61, %v2369_v51  ;;  %v2250_v29 = vmax.f32 %v4330_v36, %v3095_v13  ;;  %v2374_v24 = vmax.f32 %v2342_v48, %v3219_v18  ;;  %v2340_v33 = vmax.f32 %v2308_v30, %v5001_v17  ;;  %v5012_v7 = vld [vmem:[#allocation90_spill] sm:$0xff] }
 0x1d7   :  { %v2277_v58 = vmax.f32 %v2245_v59, %v5002_v15  ;;  %v2311_v32 = vmax.f32 %v2279_v12, %v5003_v25  ;;  %2600 = vst.msk [vmem:[%s4682_s3 + $0x40] sm:$0xf] %vm2583_vm0, %v2805_v11  ;;  %v2808_v39 = vpack.c.bf16 %v2442_v22, %v2442_v22  ;;  %v2248_v36 = vmax.f32 %v4335_v42, %v1617_v21  ;;  %v3096_v0 = vpop.f32.mrf.mxu0  ;;  %v3224_v60 = vpop.f32.mrf.mxu1  ;;  %v5014_v59 = vld [vmem:[#allocation43_spill] sm:$0xff]  ;;  %v5015_v11 = vld [vmem:[#allocation92_spill] sm:$0xff] }
 0x1d8   :  { %v2440_v23 = vmax.f32 %v2408_v56, 0.0  ;;  %v2282_v47 = vmax.f32 %v2250_v29, %v5004_v19  ;;  %v2413_v18 = vadd.f32 %v4340_v61, %v2374_v24  ;;  %v2372_v4 = vmax.f32 %v2340_v33, %v4528_v16  ;;  %v5016_v33 = vld [vmem:[#allocation130_spill] sm:$0xff] }
 0x1d9   :  { %v2343_v57 = vmax.f32 %v2311_v32, %v5005_v54  ;;  %v2309_v45 = vmax.f32 %v2277_v58, %v5006_v6  ;;  %2603 = vst.msk [vmem:[%s4682_s3 + $0x4c] sm:$0xf] %vm2583_vm0, %v2808_v39  ;;  %v2280_v31 = vmax.f32 %v2248_v36, %v5007_v43  ;;  %v2251_v9 = vmax.f32 %v4349_v28, %v3096_v0  ;;  %v1620_v40 = vpop.f32.mrf.mxu0  ;;  %v2132_v53 = vpop.f32.mrf.mxu1  ;;  %v5017_v58 = vld [vmem:[#allocation94_spill] sm:$0xff]  ;;  %v5020_v6 = vld [vmem:[#allocation47_spill] sm:$0xff]  ;;  %v5021_v0 = vld [vmem:[#allocation96_spill] sm:$0xff] }
 0x1da   :  { %v2806_v34 = vpack.c.bf16 %v2440_v23, %v2440_v23  ;;  %v2314_v42 = vmax.f32 %v2282_v47, %v5008_v44  ;;  %v2445_v38 = vmax.f32 %v2413_v18, 0.0  ;;  %v2411_v16 = vadd.f32 %v4340_v61, %v2372_v4  ;;  %v5018_v23 = vld [vmem:[#allocation45_spill] sm:$0xff]  ;;  %v5019_v4 = vld [vmem:[#allocation132_spill] sm:$0xff] }
 0x1db   :  { %v2375_v10 = vmax.f32 %v2343_v57, %v4539_v27  ;;  %v2341_v2 = vmax.f32 %v2309_v45, %v5009_v41  ;;  %v2283_v20 = vmax.f32 %v2251_v9, %v5011_v8  ;;  %v2312_v3 = vmax.f32 %v2280_v31, %v5012_v7  ;;  %v3099_v14 = vpop.f32.mrf.mxu0  ;;  %v3227_v32 = vpop.f32.mrf.mxu1  ;;  %v5025_v7 = vld [vmem:[#allocation136_spill] sm:$0xff] }
 0x1dc   :  { %2601 = vst.msk [vmem:[%s4682_s3 + $0x44] sm:$0xf] %vm2583_vm0, %v2806_v34  ;;  %v2346_v52 = vmax.f32 %v2314_v42, %v5010_v35  ;;  %v2249_v28 = vmax.f32 %v4355_v37, %v1620_v40  ;;  %v2811_v51 = vpack.c.bf16 %v2445_v38, %v2445_v38  ;;  %v2443_v1 = vmax.f32 %v2411_v16, 0.0  ;;  %v5022_v38 = vld [vmem:[#allocation134_spill] sm:$0xff] }
 0x1dd   :  { %v2414_v27 = vadd.f32 %v4340_v61, %v2375_v10  ;;  %v2373_v48 = vmax.f32 %v2341_v2, %v4550_v26  ;;  %v2344_v30 = vmax.f32 %v2312_v3, %v5013_v50  ;;  %v2315_v22 = vmax.f32 %v2283_v20, %v5015_v11  ;;  %v1633_v26 = vpop.f32.mrf.mxu0  ;;  %v2145_v9 = vpop.f32.mrf.mxu1  ;;  %v5023_v10 = vld [vmem:[#allocation49_spill] sm:$0xff]  ;;  %v5024_v2 = vld [vmem:[#allocation98_spill] sm:$0xff] }
 0x1de   :  { %v2378_v12 = vmax.f32 %v2346_v52, %v3223_v5  ;;  %v2281_v13 = vmax.f32 %v2249_v28, %v5014_v59  ;;  %2606 = vst.msk [vmem:[%s4682_s3 + $0x58] sm:$0xf] %vm2583_vm0, %v2811_v51  ;;  %v2809_v37 = vpack.c.bf16 %v2443_v1, %v2443_v1  ;;  %v2254_v24 = vmax.f32 %v4361_v49, %v3099_v14  ;;  %v5026_v28 = vld [vmem:[#allocation51_spill] sm:$0xff]  ;;  %v5027_v51 = vld [vmem:[#allocation100_spill] sm:$0xff]  ;;  %v5028_v50 = vld [vmem:[#allocation138_spill] sm:$0xff] }
 0x1df   :  { %v2446_v56 = vmax.f32 %v2414_v27, 0.0  ;;  %v2412_v29 = vadd.f32 %v4340_v61, %v2373_v48  ;;  %v2376_v17 = vmax.f32 %v2344_v30, %v2129_v62  ;;  %v2347_v15 = vmax.f32 %v2315_v22, %v5016_v33  ;;  %v3100_v47 = vpop.f32.mrf.mxu0  ;;  %v3228_v48 = vpop.f32.mrf.mxu1  ;;  %v5029_v59 = vld [vmem:[#allocation102_spill] sm:$0xff] }
 0x1e0   :  { %v2417_v5 = vadd.f32 %v4340_v61, %v2378_v12  ;;  %v2313_v25 = vmax.f32 %v2281_v13, %v5017_v58  ;;  %2604 = vst.msk [vmem:[%s4682_s3 + $0x50] sm:$0xf] %vm2583_vm0, %v2809_v37  ;;  %v2286_v19 = vmax.f32 %v2254_v24, %v5018_v23  ;;  %v2252_v49 = vmax.f32 %v4370_v55, %v1633_v26 }
 0x1e1   :  { %v2812_v21 = vpack.c.bf16 %v2446_v56, %v2446_v56  ;;  %v2444_v39 = vmax.f32 %v2412_v29, 0.0  ;;  %v2415_v62 = vadd.f32 %v4340_v61, %v2376_v17  ;;  %v2379_v18 = vmax.f32 %v2347_v15, %v3224_v60  ;;  %v1636_v55 = vpop.f32.mrf.mxu0  ;;  %v5030_v29 = vld [vmem:[#allocation140_spill] sm:$0xff]  ;;  %v2148_v26 = vpop.f32.mrf.mxu1 }
 0x1e2   :  { %v2449_v36 = vmax.f32 %v2417_v5, 0.0  ;;  %v2345_v54 = vmax.f32 %v2313_v25, %v5019_v4  ;;  %v2284_v45 = vmax.f32 %v2252_v49, %v5020_v6  ;;  %v2318_v34 = vmax.f32 %v2286_v19, %v5021_v0 }
 0x1e3   :  { %2607 = vst.msk [vmem:[%s4682_s3 + $0x5c] sm:$0xf] %vm2583_vm0, %v2812_v21  ;;  %v2810_v57 = vpack.c.bf16 %v2444_v39, %v2444_v39  ;;  %v2255_v43 = vmax.f32 %v4376_v46, %v3100_v47  ;;  %v2447_v44 = vmax.f32 %v2415_v62, 0.0  ;;  %v2418_v42 = vadd.f32 %v4340_v61, %v2379_v18 }
 0x1e4   :  { %v2815_v31 = vpack.c.bf16 %v2449_v36, %v2449_v36  ;;  %v2377_v60 = vmax.f32 %v2345_v54, %v2132_v53  ;;  %v2350_v16 = vmax.f32 %v2318_v34, %v5022_v38  ;;  %v2316_v40 = vmax.f32 %v2284_v45, %v5024_v2 }
 0x1e5   :  { %2605 = vst.msk [vmem:[%s4682_s3 + $0x54] sm:$0xf] %vm2583_vm0, %v2810_v57  ;;  %v2287_v41 = vmax.f32 %v2255_v43, %v5023_v10  ;;  %v2253_v46 = vmax.f32 %v4388_v63, %v1636_v55  ;;  %v2813_v35 = vpack.c.bf16 %v2447_v44, %v2447_v44  ;;  %v2450_v52 = vmax.f32 %v2418_v42, 0.0 }
 0x1e6   :  { %2610 = vst.msk [vmem:[%s4682_s3 + $0x68] sm:$0xf] %vm2583_vm0, %v2815_v31  ;;  %v2416_v8 = vadd.f32 %v4340_v61, %v2377_v60  ;;  %v2382_v20 = vmax.f32 %v2350_v16, %v3227_v32  ;;  %v2348_v3 = vmax.f32 %v2316_v40, %v5025_v7 }
 0x1e7   :  { %v2285_v53 = vmax.f32 %v2253_v46, %v5026_v28  ;;  %v2319_v1 = vmax.f32 %v2287_v41, %v5027_v51  ;;  %2608 = vst.msk [vmem:[%s4682_s3 + $0x60] sm:$0xf] %vm2583_vm0, %v2813_v35  ;;  %v2816_v63 = vpack.c.bf16 %v2450_v52, %v2450_v52 }
 0x1e8   :  { %v2448_v27 = vmax.f32 %v2416_v8, 0.0  ;;  %v2421_v14 = vadd.f32 %v4340_v61, %v2382_v20  ;;  %v2380_v12 = vmax.f32 %v2348_v3, %v2145_v9 }
 0x1e9   :  { %v2351_v30 = vmax.f32 %v2319_v1, %v5028_v50  ;;  %v2317_v13 = vmax.f32 %v2285_v53, %v5029_v59  ;;  %2611 = vst.msk [vmem:[%s4682_s3 + $0x6c] sm:$0xf] %vm2583_vm0, %v2816_v63 }
 0x1ea   :  { %v2814_v11 = vpack.c.bf16 %v2448_v27, %v2448_v27  ;;  %v2453_v22 = vmax.f32 %v2421_v14, 0.0  ;;  %v2419_v37 = vadd.f32 %v4340_v61, %v2380_v12 }
 0x1eb   :  { %v2383_v56 = vmax.f32 %v2351_v30, %v3228_v48  ;;  %v2349_v24 = vmax.f32 %v2317_v13, %v5030_v29 }
 0x1ec   :  { %2609 = vst.msk [vmem:[%s4682_s3 + $0x64] sm:$0xf] %vm2583_vm0, %v2814_v11  ;;  %v2819_v5 = vpack.c.bf16 %v2453_v22, %v2453_v22  ;;  %v2451_v17 = vmax.f32 %v2419_v37, 0.0 }
 0x1ed   :  { %v2422_v33 = vadd.f32 %v4340_v61, %v2383_v56  ;;  %v2381_v15 = vmax.f32 %v2349_v24, %v2148_v26 }
 0x1ee   :  { %2614 = vst.msk [vmem:[%s4682_s3 + $0x78] sm:$0xf] %vm2583_vm0, %v2819_v5  ;;  %v2817_v58 = vpack.c.bf16 %v2451_v17, %v2451_v17 }
 0x1ef   :  { %v2454_v25 = vmax.f32 %v2422_v33, 0.0  ;;  %v2420_v32 = vadd.f32 %v4340_v61, %v2381_v15 }
 0x1f0   :  { %2612 = vst.msk [vmem:[%s4682_s3 + $0x70] sm:$0xf] %vm2583_vm0, %v2817_v58 }
 0x1f1   :  { %v2820_v21 = vpack.c.bf16 %v2454_v25, %v2454_v25  ;;  %v2452_v39 = vmax.f32 %v2420_v32, 0.0 }
 0x1f3   :  { %2615 = vst.msk [vmem:[%s4682_s3 + $0x7c] sm:$0xf] %vm2583_vm0, %v2820_v21  ;;  %v2818_v23 = vpack.c.bf16 %v2452_v39, %v2452_v39 }
 0x1f5   :  { %2613 = vst.msk [vmem:[%s4682_s3 + $0x74] sm:$0xf] %vm2583_vm0, %v2818_v23 }

// kernel: pig_action_3dcnn_forward.4
= control target key start
LH: loop header
LB: loop body
LE: loop exit
PB: predicated region body
PF: predicated region fallthrough
CT: control target
= control target key end

     0   :  { %vm1870_vm0 = vcmask 519168   ;;  %s3434_s1 = inlined_call_operand.vmem [shape: bf16[896,64], index: 1, kind: input, shape index: {}]   ;;  %s3435_s0 = inlined_call_operand.vmem [shape: bf16[256,896], index: 0, kind: input, shape index: {}]   ;;  %s3436_s2 = inlined_call_operand.vmem [shape: f32[1,64], index: 2, kind: input, shape index: {}]   ;;  %s3437_s3 = inlined_call_operand.vmem [shape: bf16[32,64], index: 3, kind: output, shape index: {}]  }
   0x1   :  { %v2480_v0 = vld [vmem:[%s3434_s1 + $0x78] sm:$0xff]   ;;  %v2482_v2 = vld [vmem:[%s3434_s1 + $0x70] sm:$0xff]   ;;  %v2484_v4 = vld [vmem:[%s3434_s1 + $0x68] sm:$0xff]  }
   0x2   :  { %v2481_v1 = vld [vmem:[%s3434_s1 + $0x38] sm:$0xff]   ;;  %2056 = vmatprep.subr.bf16.mxu0 %v2480_v0  ;;  %2464 = vmatprep.subr.bf16.mxu1 %v2480_v0  ;;  %v2483_v3 = vld [vmem:[%s3434_s1 + $0x30] sm:$0xff]   ;;  %v2485_v5 = vld [vmem:[%s3434_s1 + $0x28] sm:$0xff]  }
   0x3   :  { %2057 = vmatpush3.bf16.msra.mxu0 %v2481_v1  ;;  %2472 = vmatpush3.bf16.msra.mxu1 %v2481_v1  ;;  %v2486_v6 = vld [vmem:[%s3434_s1 + $0x60] sm:$0xff]   ;;  %v2488_v8 = vld [vmem:[%s3434_s1 + $0x58] sm:$0xff]   ;;  %v2490_v10 = vld [vmem:[%s3434_s1 + $0x50] sm:$0xff]  }
   0x4   :  { %2058 = vmatprep.subr.bf16.mxu0 %v2482_v2  ;;  %2465 = vmatprep.subr.bf16.mxu1 %v2482_v2  ;;  %v2487_v7 = vld [vmem:[%s3434_s1 + $0x20] sm:$0xff]   ;;  %v2489_v9 = vld [vmem:[%s3434_s1 + $0x18] sm:$0xff]   ;;  %v2491_v13 = vld [vmem:[%s3434_s1 + $0x10] sm:$0xff]  }
   0x5   :  { %v2498_v11 = vld [vmem:[%s3435_s0 + $0x4] ss:$28 sps:$4 sm:$0xff]   ;;  %v2492_v14 = vld [vmem:[%s3434_s1 + $0x48] sm:$0xff]   ;;  %v2502_v18 = vld [vmem:[%s3434_s1 + $0xf8] sm:$0xff]  }
   0x6   :  { %v2501_v12 = vld [vmem:[%s3435_s0 + $0x2a4] ss:$28 sps:$4 sm:$0xff]   ;;  %1199 = vmatprep.mubr.bf16.mxu0 %v2498_v11  ;;  %v2493_v15 = vld [vmem:[%s3434_s1 + $0x8] sm:$0xff]   ;;  %v2503_v21 = vld [vmem:[%s3434_s1 + $0x178] sm:$0xff]  }
   0x7   :  { %2059 = vmatpush3.bf16.msra.mxu0 %v2483_v3  ;;  %2473 = vmatpush3.bf16.msra.mxu1 %v2483_v3  ;;  %v2494_v16 = vld [vmem:[%s3434_s1 + $0x40] sm:$0xff]   ;;  %v2504_v22 = vld [vmem:[%s3434_s1 + $0xb8] sm:$0xff]   ;;  %v2506_v24 = vld [vmem:[%s3434_s1 + $0xf0] sm:$0xff]  }
   0x8   :  { %2060 = vmatprep.subr.bf16.mxu0 %v2484_v4  ;;  %2466 = vmatprep.subr.bf16.mxu1 %v2484_v4  ;;  %v2495_v17 = vld [vmem:[%s3434_s1] sm:$0xff]   ;;  %v2505_v23 = vld [vmem:[%s3434_s1 + $0x138] sm:$0xff]   ;;  %v2517_v27 = vld [vmem:[%s3434_s1 + $0x170] sm:$0xff]  }
   0x9   :  { %1295 = vmatprep.mubr.bf16.mxu1 %v2501_v12  ;;  %v2496_v19 = vld [vmem:[%s3435_s0] ss:$28 sps:$4 sm:$0xff]   ;;  %v2507_v28 = vld [vmem:[%s3434_s1 + $0xb0] sm:$0xff]   ;;  %v2514_v32 = vld [vmem:[%s3434_s1 + $0xe8] sm:$0xff]  }
   0xa   :  { %v2499_v20 = vld [vmem:[%s3435_s0 + $0x2a0] ss:$28 sps:$4 sm:$0xff]   ;;  %v2519_v29 = vld [vmem:[%s3434_s1 + $0x130] sm:$0xff]   ;;  %v2515_v33 = vld [vmem:[%s3434_s1 + $0xa8] sm:$0xff]  }
   0xb   :  { %2061 = vmatpush3.bf16.msra.mxu0 %v2485_v5  ;;  %2474 = vmatpush3.bf16.msra.mxu1 %v2485_v5  ;;  %v2508_v25 = vld [vmem:[%s3435_s0 + $0x3c] ss:$28 sps:$4 sm:$0xff]   ;;  %v2516_v34 = vld [vmem:[%s3434_s1 + $0xe0] sm:$0xff]   ;;  %v2520_v35 = vld [vmem:[%s3435_s0 + $0x74] ss:$28 sps:$4 sm:$0xff]  }
   0xc   :  { %2062 = vmatprep.subr.bf16.mxu0 %v2486_v6  ;;  %2467 = vmatprep.subr.bf16.mxu1 %v2486_v6  ;;  %v2510_v26 = vld [vmem:[%s3435_s0 + $0x2dc] ss:$28 sps:$4 sm:$0xff]   ;;  %v2522_v36 = vld [vmem:[%s3435_s0 + $0x314] ss:$28 sps:$4 sm:$0xff]   ;;  %v2518_v37 = vld [vmem:[%s3434_s1 + $0xa0] sm:$0xff]  }
   0xd   :  { %v2512_v30 = vld [vmem:[%s3435_s0 + $0x38] ss:$28 sps:$4 sm:$0xff]   ;;  %v2524_v39 = vld [vmem:[%s3435_s0 + $0x70] ss:$28 sps:$4 sm:$0xff]   ;;  %v2534_v49 = vld [vmem:[%s3435_s0 + $0xa8] ss:$28 sps:$4 sm:$0xff]  }
   0xe   :  { %v2513_v31 = vld [vmem:[%s3435_s0 + $0x2d8] ss:$28 sps:$4 sm:$0xff]   ;;  %v2525_v40 = vld [vmem:[%s3435_s0 + $0x310] ss:$28 sps:$4 sm:$0xff]   ;;  %v2535_v50 = vld [vmem:[%s3435_s0 + $0x348] ss:$28 sps:$4 sm:$0xff]  }
   0xf   :  { %2063 = vmatpush3.bf16.msra.mxu0 %v2487_v7  ;;  %2475 = vmatpush3.bf16.msra.mxu1 %v2487_v7  ;;  %v2526_v38 = vld [vmem:[%s3434_s1 + $0xd8] sm:$0xff]   ;;  %v2537_v41 = vld [vmem:[%s3434_s1 + $0x168] sm:$0xff]   ;;  %v2528_v43 = vld [vmem:[%s3434_s1 + $0xd0] sm:$0xff]  }
  0x10   :  { %2064 = vmatprep.subr.bf16.mxu0 %v2488_v8  ;;  %2468 = vmatprep.subr.bf16.mxu1 %v2488_v8  ;;  %v2527_v42 = vld [vmem:[%s3434_s1 + $0x98] sm:$0xff]   ;;  %v2539_v44 = vld [vmem:[%s3434_s1 + $0x128] sm:$0xff]   ;;  %v2529_v47 = vld [vmem:[%s3434_s1 + $0x90] sm:$0xff]  }
  0x11   :  { %v2530_v45 = vld [vmem:[%s3435_s0 + $0xac] ss:$28 sps:$4 sm:$0xff]   ;;  %v2548_v51 = vld [vmem:[%s3434_s1 + $0x160] sm:$0xff]   ;;  %v2549_v58 = vld [vmem:[%s3434_s1 + $0x1b8] sm:$0xff]  }
  0x12   :  { %v2532_v46 = vld [vmem:[%s3435_s0 + $0x34c] ss:$28 sps:$4 sm:$0xff]   ;;  %v2550_v53 = vld [vmem:[%s3434_s1 + $0x120] sm:$0xff]   ;;  %v2563_v60 = vld [vmem:[%s3434_s1 + $0x158] sm:$0xff]  }
  0x13   :  { %2065 = vmatpush3.bf16.msra.mxu0 %v2489_v9  ;;  %2476 = vmatpush3.bf16.msra.mxu1 %v2489_v9  ;;  %v2536_v48 = vld [vmem:[%s3434_s1 + $0xc8] sm:$0xff]   ;;  %v2542_v54 = vld [vmem:[%s3435_s0 + $0xe4] ss:$28 sps:$4 sm:$0xff]   ;;  %v2564_v61 = vld [vmem:[%s3434_s1 + $0x118] sm:$0xff]  }
  0x14   :  { %2066 = vmatprep.subr.bf16.mxu0 %v2490_v10  ;;  %2469 = vmatprep.subr.bf16.mxu1 %v2490_v10  ;;  %v2538_v52 = vld [vmem:[%s3434_s1 + $0x88] sm:$0xff]   ;;  %v2540_v55 = vld [vmem:[%s3434_s1 + $0xc0] sm:$0xff]   ;;  %v2551_v63 = vld [vmem:[%s3435_s0 + $0x11c] ss:$28 sps:$4 sm:$0xff]  }
  0x15   :  { %v2546_v56 = vld [vmem:[%s3435_s0 + $0xc] ss:$28 sps:$4 sm:$0xff]   ;;  %v2541_v57 = vld [vmem:[%s3434_s1 + $0x80] sm:$0xff]   ;;  %v2565_v1 = vld [vmem:[%s3434_s1 + $0x1b0] sm:$0xff]  }
  0x16   :  { %v2544_v59 = vld [vmem:[%s3435_s0 + $0x8] ss:$28 sps:$4 sm:$0xff]   ;;  %v2547_v62 = vld [vmem:[%s3435_s0 + $0xe0] ss:$28 sps:$4 sm:$0xff]   ;;  %v2572_v2 = vld [vmem:[%s3434_s1 + $0x150] sm:$0xff]  }
  0x17   :  { %2067 = vmatpush3.bf16.msra.mxu0 %v2491_v13  ;;  %2477 = vmatpush3.bf16.msra.mxu1 %v2491_v13  ;;  %v2553_v0 = vld [vmem:[%s3435_s0 + $0x44] ss:$28 sps:$4 sm:$0xff]   ;;  %v2573_v3 = vld [vmem:[%s3434_s1 + $0x110] sm:$0xff]   ;;  %v2580_v7 = vld [vmem:[%s3434_s1 + $0x1a8] sm:$0xff]  }
  0x18   :  { %2068 = vmatprep.subr.bf16.mxu0 %v2492_v14  ;;  %2470 = vmatprep.subr.bf16.mxu1 %v2492_v14  ;;  %v2555_v4 = vld [vmem:[%s3435_s0 + $0x118] ss:$28 sps:$4 sm:$0xff]   ;;  %v2556_v5 = vld [vmem:[%s3435_s0 + $0x40] ss:$28 sps:$4 sm:$0xff]   ;;  %v2587_v9 = vld [vmem:[%s3434_s1 + $0x148] sm:$0xff]  }
  0x19   :  { %v2557_v6 = vld [vmem:[%s3435_s0 + $0x154] ss:$28 sps:$4 sm:$0xff]   ;;  %v2559_v8 = vld [vmem:[%s3435_s0 + $0x7c] ss:$28 sps:$4 sm:$0xff]   ;;  %v2588_v10 = vld [vmem:[%s3434_s1 + $0x108] sm:$0xff]  }
  0x1a   :  { %v2561_v11 = vld [vmem:[%s3435_s0 + $0x150] ss:$28 sps:$4 sm:$0xff]   ;;  %v2562_v12 = vld [vmem:[%s3435_s0 + $0x78] ss:$28 sps:$4 sm:$0xff]  }
  0x1b   :  { %2069 = vmatpush3.bf16.msra.mxu0 %v2493_v15  ;;  %2478 = vmatpush3.bf16.msra.mxu1 %v2493_v15  ;;  %v2566_v13 = vld [vmem:[%s3435_s0 + $0x18c] ss:$28 sps:$4 sm:$0xff]   ;;  %v2568_v14 = vld [vmem:[%s3435_s0 + $0xb4] ss:$28 sps:$4 sm:$0xff]   ;;  %v2595_v15 = vld [vmem:[%s3434_s1 + $0x140] sm:$0xff]  }
  0x1c   :  { %2070 = vmatprep.subr.bf16.mxu0 %v2494_v16  ;;  %2471 = vmatprep.subr.bf16.mxu1 %v2494_v16  ;;  %v2596_v16 = vld [vmem:[%s3434_s1 + $0x1a0] sm:$0xff]  }
  0x1f   :  { %2071 = vmatpush3.bf16.msra.mxu0 %v2495_v17  ;;  %2479 = vmatpush3.bf16.msra.mxu1 %v2495_v17  ;;  %v2597_v17 = vld [vmem:[%s3434_s1 + $0x100] sm:$0xff]  }
  0x20   :  { %2168 = vmatprep.subr.bf16.mxu1 %v2502_v18  ;;  %2280 = vmatprep.subr.bf16.mxu0 %v2503_v21  ;;  %v2570_v18 = vld [vmem:[%s3435_s0 + $0x188] ss:$28 sps:$4 sm:$0xff]  }
  0x21   :  { %v2576_v21 = vld [vmem:[%s3435_s0 + $0xec] ss:$28 sps:$4 sm:$0xff]  }
  0x22   :  { %1200 = vmatmul.mubr.bf16.vlgmr.msra.gmra.mxu0 %v2496_v19  ;;  %1296 = vmatmul.mubr.bf16.vlgmr.msra.gmra.mxu1 %v2499_v20  ;;  %v2571_v19 = vld [vmem:[%s3435_s0 + $0xb0] ss:$28 sps:$4 sm:$0xff]   ;;  %v2574_v20 = vld [vmem:[%s3435_s0 + $0x1c4] ss:$28 sps:$4 sm:$0xff]  }
  0x23   :  { %2169 = vmatpush3.bf16.msra.mxu1 %v2504_v22  ;;  %2281 = vmatpush3.bf16.msra.mxu0 %v2505_v23  ;;  %v2610_v22 = vld [vmem:[%s3434_s1 + $0x198] sm:$0xff]  }
  0x24   :  { %2170 = vmatprep.subr.bf16.mxu1 %v2506_v24  ;;  %1207 = vmatprep.mubr.bf16.mxu0 %v2508_v25  ;;  %v2578_v23 = vld [vmem:[%s3435_s0 + $0x1c0] ss:$28 sps:$4 sm:$0xff]   ;;  %v2579_v24 = vld [vmem:[%s3435_s0 + $0xe8] ss:$28 sps:$4 sm:$0xff]   ;;  %v2623_v25 = vld [vmem:[%s3434_s1 + $0x190] sm:$0xff]  }
  0x25   :  { %1303 = vmatprep.mubr.bf16.mxu1 %v2510_v26  ;;  %2282 = vmatprep.subr.bf16.mxu0 %v2517_v27  ;;  %v2581_v26 = vld [vmem:[%s3435_s0 + $0x1fc] ss:$28 sps:$4 sm:$0xff]   ;;  %v2583_v27 = vld [vmem:[%s3435_s0 + $0x124] ss:$28 sps:$4 sm:$0xff]  }
  0x27   :  { %2171 = vmatpush3.bf16.msra.mxu1 %v2507_v28  ;;  %2283 = vmatpush3.bf16.msra.mxu0 %v2519_v29  ;;  %v2636_v28 = vld [vmem:[%s3434_s1 + $0x188] sm:$0xff]   ;;  %v2585_v29 = vld [vmem:[%s3435_s0 + $0x1f8] ss:$28 sps:$4 sm:$0xff]  }
  0x28   :  { %2172 = vmatprep.subr.bf16.mxu1 %v2514_v32  ;;  %2284 = vmatprep.subr.bf16.mxu0 %v2537_v41  ;;  %v2591_v32 = vld [vmem:[%s3435_s0 + $0x15c] ss:$28 sps:$4 sm:$0xff]   ;;  %v2608_v41 = vld [vmem:[%s3435_s0 + $0x14] ss:$28 sps:$4 sm:$0xff]  }
  0x2a   :  { %1208 = vmatmul.mubr.bf16.gmra.mxu0 %v2512_v30  ;;  %1304 = vmatmul.mubr.bf16.gmra.mxu1 %v2513_v31  ;;  %v2586_v30 = vld [vmem:[%s3435_s0 + $0x120] ss:$28 sps:$4 sm:$0xff]   ;;  %v2589_v31 = vld [vmem:[%s3435_s0 + $0x234] ss:$28 sps:$4 sm:$0xff]  }
  0x2b   :  { %2173 = vmatpush3.bf16.msra.mxu1 %v2515_v33  ;;  %1215 = vmatprep.mubr.bf16.mxu0 %v2520_v35  ;;  %v2649_v33 = vld [vmem:[%s3434_s1 + $0x180] sm:$0xff]   ;;  %v2594_v35 = vld [vmem:[%s3435_s0 + $0x158] ss:$28 sps:$4 sm:$0xff]  }
  0x2c   :  { %2174 = vmatprep.subr.bf16.mxu1 %v2516_v34  ;;  %1311 = vmatprep.mubr.bf16.mxu1 %v2522_v36  ;;  %v2593_v34 = vld [vmem:[%s3435_s0 + $0x230] ss:$28 sps:$4 sm:$0xff]  }
  0x2d   :  { %2285 = vmatpush3.bf16.msra.mxu0 %v2539_v44  ;;  %v2598_v36 = vld [vmem:[%s3435_s0 + $0x26c] ss:$28 sps:$4 sm:$0xff]   ;;  %v2611_v44 = vld [vmem:[%s3435_s0 + $0x204] ss:$28 sps:$4 sm:$0xff]  }
  0x2e   :  { %2286 = vmatprep.subr.bf16.mxu0 %v2548_v51  ;;  %v2622_v51 = vld [vmem:[%s3435_s0 + $0x80] ss:$28 sps:$4 sm:$0xff]  }
  0x2f   :  { %2175 = vmatpush3.bf16.msra.mxu1 %v2518_v37  ;;  %v2600_v37 = vld [vmem:[%s3435_s0 + $0x194] ss:$28 sps:$4 sm:$0xff]  }
  0x30   :  { %2176 = vmatprep.subr.bf16.mxu1 %v2526_v38  ;;  %v2602_v38 = vld [vmem:[%s3435_s0 + $0x268] ss:$28 sps:$4 sm:$0xff]  }
  0x31   :  { %2287 = vmatpush3.bf16.msra.mxu0 %v2550_v53  ;;  %v2626_v53 = vld [vmem:[%s3435_s0 + $0xbc] ss:$28 sps:$4 sm:$0xff]  }
  0x32   :  { %1216 = vmatmul.mubr.bf16.gmra.mxu0 %v2524_v39  ;;  %1312 = vmatmul.mubr.bf16.gmra.mxu1 %v2525_v40  ;;  %v2603_v39 = vld [vmem:[%s3435_s0 + $0x190] ss:$28 sps:$4 sm:$0xff]  }
  0x33   :  { %2177 = vmatpush3.bf16.msra.mxu1 %v2527_v42  ;;  %1223 = vmatprep.mubr.bf16.mxu0 %v2530_v45  ;;  %v2604_v40 = vld [vmem:[%s3435_s0 + $0x1cc] ss:$28 sps:$4 sm:$0xff]  }
  0x34   :  { %2178 = vmatprep.subr.bf16.mxu1 %v2528_v43  ;;  %1319 = vmatprep.mubr.bf16.mxu1 %v2532_v46  ;;  %v2606_v42 = vld [vmem:[%s3435_s0 + $0x10] ss:$28 sps:$4 sm:$0xff]   ;;  %v2609_v43 = vld [vmem:[%s3435_s0 + $0x1c8] ss:$28 sps:$4 sm:$0xff]   ;;  %v2615_v46 = vld [vmem:[%s3435_s0 + $0x200] ss:$28 sps:$4 sm:$0xff]  }
  0x35   :  { %2288 = vmatprep.subr.bf16.mxu0 %v2563_v60  ;;  %v2613_v45 = vld [vmem:[%s3435_s0 + $0x4c] ss:$28 sps:$4 sm:$0xff]   ;;  %v2637_v60 = vld [vmem:[%s3435_s0 + $0x2e4] ss:$28 sps:$4 sm:$0xff]  }
  0x36   :  { %2289 = vmatpush3.bf16.msra.mxu0 %v2564_v61  ;;  %v2639_v61 = vld [vmem:[%s3435_s0 + $0x12c] ss:$28 sps:$4 sm:$0xff]  }
  0x37   :  { %2179 = vmatpush3.bf16.msra.mxu1 %v2529_v47  ;;  %2290 = vmatprep.subr.bf16.mxu0 %v2572_v2  ;;  %v2616_v47 = vld [vmem:[%s3435_s0 + $0x48] ss:$28 sps:$4 sm:$0xff]   ;;  %v2647_v2 = vld [vmem:[%s3435_s0 + $0x318] ss:$28 sps:$4 sm:$0xff]  }
  0x38   :  { %2180 = vmatprep.subr.bf16.mxu1 %v2536_v48  ;;  %v2617_v48 = vld [vmem:[%s3435_s0 + $0x23c] ss:$28 sps:$4 sm:$0xff]  }
  0x3a   :  { %1224 = vmatmul.mubr.bf16.gmra.mxu0 %v2534_v49  ;;  %1320 = vmatmul.mubr.bf16.gmra.mxu1 %v2535_v50  ;;  %v2619_v49 = vld [vmem:[%s3435_s0 + $0x84] ss:$28 sps:$4 sm:$0xff]   ;;  %v2621_v50 = vld [vmem:[%s3435_s0 + $0x238] ss:$28 sps:$4 sm:$0xff]  }
  0x3b   :  { %2181 = vmatpush3.bf16.msra.mxu1 %v2538_v52  ;;  %1231 = vmatprep.mubr.bf16.mxu0 %v2542_v54  ;;  %v2624_v52 = vld [vmem:[%s3435_s0 + $0x274] ss:$28 sps:$4 sm:$0xff]  }
  0x3c   :  { %2182 = vmatprep.subr.bf16.mxu1 %v2540_v55  ;;  %1360 = vmatprep.mubr.bf16.mxu1 %v2546_v56  ;;  %v2628_v54 = vld [vmem:[%s3435_s0 + $0x270] ss:$28 sps:$4 sm:$0xff]   ;;  %v2629_v55 = vld [vmem:[%s3435_s0 + $0xb8] ss:$28 sps:$4 sm:$0xff]  }
  0x3d   :  { %2291 = vmatpush3.bf16.msra.mxu0 %v2573_v3  ;;  %v2630_v56 = vld [vmem:[%s3435_s0 + $0x2ac] ss:$28 sps:$4 sm:$0xff]   ;;  %v2648_v3 = vld [vmem:[%s3435_s0 + $0x160] ss:$28 sps:$4 sm:$0xff]  }
  0x3e   :  { %2292 = vmatprep.subr.bf16.mxu0 %v2587_v9  ;;  %v2658_v9 = vld [vmem:[%s3435_s0 + $0x18] ss:$28 sps:$4 sm:$0xff]  }
  0x3f   :  { %2183 = vmatpush3.bf16.msra.mxu1 %v2541_v57  ;;  %v2632_v57 = vld [vmem:[%s3435_s0 + $0xf4] ss:$28 sps:$4 sm:$0xff]  }
  0x40   :  { %2416 = vmatprep.subr.bf16.mxu1 %v2549_v58 }
  0x41   :  { %2293 = vmatpush3.bf16.msra.mxu0 %v2588_v10  ;;  %v2659_v10 = vld [vmem:[%s3435_s0 + $0x1d0] ss:$28 sps:$4 sm:$0xff]  }
  0x42   :  { %1232 = vmatmul.mubr.bf16.gmra.mxu0 %v2547_v62  ;;  %1361 = vmatmul.mubr.bf16.vlgmr.msra.gmra.mxu1 %v2544_v59  ;;  %v2635_v59 = vld [vmem:[%s3435_s0 + $0xf0] ss:$28 sps:$4 sm:$0xff]   ;;  %v2641_v62 = vld [vmem:[%s3435_s0 + $0x2e0] ss:$28 sps:$4 sm:$0xff]  }
  0x43   :  { %2417 = vmatpush3.bf16.msra.mxu1 %v2549_v58  ;;  %1239 = vmatprep.mubr.bf16.mxu0 %v2551_v63  ;;  %v2634_v58 = vld [vmem:[%s3435_s0 + $0x2a8] ss:$28 sps:$4 sm:$0xff]  }
  0x44   :  { %1368 = vmatprep.mubr.bf16.mxu1 %v2553_v0  ;;  %2418 = vmatprep.subr.bf16.mxu1 %v2565_v1  ;;  %v2642_v63 = vld [vmem:[%s3435_s0 + $0x128] ss:$28 sps:$4 sm:$0xff]   ;;  %v2643_v0 = vld [vmem:[%s3435_s0 + $0x31c] ss:$28 sps:$4 sm:$0xff]  }
  0x45   :  { %2294 = vmatprep.subr.bf16.mxu0 %v2595_v15  ;;  %v2665_v15 = vld [vmem:[%s3435_s0 + $0xc0] ss:$28 sps:$4 sm:$0xff]  }
  0x46   :  { %2295 = vmatpush3.bf16.msra.mxu0 %v2597_v17  ;;  %v2668_v17 = vld [vmem:[%s3435_s0 + $0xf8] ss:$28 sps:$4 sm:$0xff]  }
  0x47   :  { %2419 = vmatpush3.bf16.msra.mxu1 %v2565_v1  ;;  %v2645_v1 = vld [vmem:[%s3435_s0 + $0x164] ss:$28 sps:$4 sm:$0xff]  }
  0x48   :  { %2420 = vmatprep.subr.bf16.mxu1 %v2580_v7 }
  0x4a   :  { %1240 = vmatmul.mubr.bf16.gmra.mxu0 %v2555_v4  ;;  %1369 = vmatmul.mubr.bf16.gmra.mxu1 %v2556_v5  ;;  %v2650_v4 = vld [vmem:[%s3435_s0 + $0x354] ss:$28 sps:$4 sm:$0xff]   ;;  %v2652_v5 = vld [vmem:[%s3435_s0 + $0x19c] ss:$28 sps:$4 sm:$0xff]  }
  0x4b   :  { %1247 = vmatprep.mubr.bf16.mxu0 %v2557_v6  ;;  %1376 = vmatprep.mubr.bf16.mxu1 %v2559_v8  ;;  %v2654_v6 = vld [vmem:[%s3435_s0 + $0x350] ss:$28 sps:$4 sm:$0xff]  }
  0x4c   :  { %2421 = vmatpush3.bf16.msra.mxu1 %v2580_v7  ;;  %v2655_v7 = vld [vmem:[%s3435_s0 + $0x198] ss:$28 sps:$4 sm:$0xff]  }
  0x4d   :  { %2422 = vmatprep.subr.bf16.mxu1 %v2596_v16  ;;  %v2656_v8 = vld [vmem:[%s3435_s0 + $0x1d4] ss:$28 sps:$4 sm:$0xff]  }
  0x50   :  { %2423 = vmatpush3.bf16.msra.mxu1 %v2596_v16  ;;  %v2666_v16 = vld [vmem:[%s3435_s0 + $0x244] ss:$28 sps:$4 sm:$0xff]  }
  0x51   :  { %2424 = vmatprep.subr.bf16.mxu1 %v2610_v22 }
  0x52   :  { %1248 = vmatmul.mubr.bf16.gmra.mxu0 %v2561_v11  ;;  %1377 = vmatmul.mubr.bf16.gmra.mxu1 %v2562_v12  ;;  %v2660_v11 = vld [vmem:[%s3435_s0 + $0x50] ss:$28 sps:$4 sm:$0xff]  }
  0x53   :  { %1255 = vmatprep.mubr.bf16.mxu0 %v2566_v13  ;;  %1384 = vmatprep.mubr.bf16.mxu1 %v2568_v14  ;;  %v2661_v12 = vld [vmem:[%s3435_s0 + $0x20c] ss:$28 sps:$4 sm:$0xff]  }
  0x54   :  { %2425 = vmatpush3.bf16.msra.mxu1 %v2610_v22  ;;  %v2663_v13 = vld [vmem:[%s3435_s0 + $0x88] ss:$28 sps:$4 sm:$0xff]   ;;  %v2674_v22 = vld [vmem:[%s3435_s0 + $0x278] ss:$28 sps:$4 sm:$0xff]  }
  0x55   :  { %2426 = vmatprep.subr.bf16.mxu1 %v2623_v25  ;;  %v2664_v14 = vld [vmem:[%s3435_s0 + $0x208] ss:$28 sps:$4 sm:$0xff]  }
  0x58   :  { %2427 = vmatpush3.bf16.msra.mxu1 %v2623_v25  ;;  %v2678_v25 = vld [vmem:[%s3435_s0 + $0x1d8] ss:$28 sps:$4 sm:$0xff]  }
  0x59   :  { %2428 = vmatprep.subr.bf16.mxu1 %v2636_v28 }
  0x5a   :  { %1256 = vmatmul.mubr.bf16.gmra.mxu0 %v2570_v18  ;;  %1385 = vmatmul.mubr.bf16.gmra.mxu1 %v2571_v19  ;;  %v2669_v18 = vld [vmem:[%s3435_s0 + $0x240] ss:$28 sps:$4 sm:$0xff]   ;;  %v2670_v19 = vld [vmem:[%s3435_s0 + $0x130] ss:$28 sps:$4 sm:$0xff]  }
  0x5b   :  { %1263 = vmatprep.mubr.bf16.mxu0 %v2574_v20  ;;  %1392 = vmatprep.mubr.bf16.mxu1 %v2576_v21  ;;  %v2671_v20 = vld [vmem:[%s3435_s0 + $0x27c] ss:$28 sps:$4 sm:$0xff]   ;;  %v2673_v21 = vld [vmem:[%s3435_s0 + $0x168] ss:$28 sps:$4 sm:$0xff]  }
  0x5c   :  { %2429 = vmatpush3.bf16.msra.mxu1 %v2636_v28  ;;  %v2681_v28 = vld [vmem:[%s3435_s0 + $0x2ec] ss:$28 sps:$4 sm:$0xff]  }
  0x5d   :  { %2430 = vmatprep.subr.bf16.mxu1 %v2649_v33 }
  0x60   :  { %2431 = vmatpush3.bf16.msra.mxu1 %v2649_v33 }
  0x62   :  { %1264 = vmatmul.mubr.bf16.gmra.mxu0 %v2578_v23  ;;  %1393 = vmatmul.mubr.bf16.gmra.mxu1 %v2579_v24  ;;  %v2675_v23 = vld [vmem:[%s3435_s0 + $0x1a0] ss:$28 sps:$4 sm:$0xff]   ;;  %v2676_v24 = vld [vmem:[%s3435_s0 + $0x2b4] ss:$28 sps:$4 sm:$0xff]  }
  0x63   :  { %1271 = vmatprep.mubr.bf16.mxu0 %v2581_v26  ;;  %1400 = vmatprep.mubr.bf16.mxu1 %v2583_v27  ;;  %v2679_v26 = vld [vmem:[%s3435_s0 + $0x2b0] ss:$28 sps:$4 sm:$0xff]  }
  0x64   :  { %v2680_v27 = vld [vmem:[%s3435_s0 + $0x210] ss:$28 sps:$4 sm:$0xff]  }
  0x6a   :  { %1272 = vmatmul.mubr.bf16.gmra.mxu0 %v2585_v29  ;;  %1401 = vmatmul.mubr.bf16.gmra.mxu1 %v2586_v30  ;;  %v2683_v29 = vld [vmem:[%s3435_s0 + $0x248] ss:$28 sps:$4 sm:$0xff]  }
  0x6b   :  { %1279 = vmatprep.mubr.bf16.mxu0 %v2589_v31  ;;  %1408 = vmatprep.mubr.bf16.mxu1 %v2591_v32 }
  0x72   :  { %1280 = vmatmul.mubr.bf16.gmra.mxu0 %v2593_v34  ;;  %1409 = vmatmul.mubr.bf16.gmra.mxu1 %v2594_v35 }
  0x73   :  { %1287 = vmatprep.mubr.bf16.mxu0 %v2598_v36  ;;  %1416 = vmatprep.mubr.bf16.mxu1 %v2600_v37 }
  0x7a   :  { %1288 = vmatmul.mubr.bf16.gmra.mxu0 %v2602_v38  ;;  %1417 = vmatmul.mubr.bf16.gmra.mxu1 %v2603_v39  ;;  %v2684_v38 = vld [vmem:[%s3435_s0 + $0x2e8] ss:$28 sps:$4 sm:$0xff]   ;;  %v2685_v39 = vld [vmem:[%s3435_s0 + $0x280] ss:$28 sps:$4 sm:$0xff]  }
  0x7b   :  { %1424 = vmatprep.mubr.bf16.mxu1 %v2604_v40  ;;  %1521 = vmatprep.mubr.bf16.mxu0 %v2608_v41  ;;  %v2686_v40 = vld [vmem:[%s3435_s0 + $0x324] ss:$28 sps:$4 sm:$0xff]   ;;  %v2688_v41 = vld [vmem:[%s3435_s0 + $0x2b8] ss:$28 sps:$4 sm:$0xff]  }
  0x82   :  { %1425 = vmatmul.mubr.bf16.gmra.mxu1 %v2609_v43  ;;  %1522 = vmatmul.mubr.bf16.vlgmr.msra.gmra.mxu0 %v2606_v42 }
  0x83   :  { %1432 = vmatprep.mubr.bf16.mxu1 %v2611_v44  ;;  %1529 = vmatprep.mubr.bf16.mxu0 %v2613_v45 }
  0x8a   :  { %1433 = vmatmul.mubr.bf16.gmra.mxu1 %v2615_v46  ;;  %1530 = vmatmul.mubr.bf16.gmra.mxu0 %v2616_v47 }
  0x8b   :  { %1440 = vmatprep.mubr.bf16.mxu1 %v2617_v48  ;;  %1537 = vmatprep.mubr.bf16.mxu0 %v2619_v49 }
  0x92   :  { %1441 = vmatmul.mubr.bf16.gmra.mxu1 %v2621_v50  ;;  %1538 = vmatmul.mubr.bf16.gmra.mxu0 %v2622_v51 }
  0x93   :  { %1448 = vmatprep.mubr.bf16.mxu1 %v2624_v52  ;;  %1545 = vmatprep.mubr.bf16.mxu0 %v2626_v53 }
  0x9a   :  { %1449 = vmatmul.mubr.bf16.gmra.mxu1 %v2628_v54  ;;  %1546 = vmatmul.mubr.bf16.gmra.mxu0 %v2629_v55  ;;  %v2689_v54 = vld [vmem:[%s3435_s0 + $0x320] ss:$28 sps:$4 sm:$0xff]   ;;  %v2690_v55 = vld [vmem:[%s3435_s0 + $0x2f0] ss:$28 sps:$4 sm:$0xff]  }
  0x9b   :  { %1456 = vmatprep.mubr.bf16.mxu1 %v2630_v56  ;;  %1553 = vmatprep.mubr.bf16.mxu0 %v2632_v57  ;;  %v2691_v56 = vld [vmem:[%s3435_s0 + $0x35c] ss:$28 sps:$4 sm:$0xff]   ;;  %v2693_v57 = vld [vmem:[%s3435_s0 + $0x328] ss:$28 sps:$4 sm:$0xff]  }
  0xa2   :  { %1457 = vmatmul.mubr.bf16.gmra.mxu1 %v2634_v58  ;;  %1554 = vmatmul.mubr.bf16.gmra.mxu0 %v2635_v59 }
  0xa3   :  { %1464 = vmatprep.mubr.bf16.mxu1 %v2637_v60  ;;  %1561 = vmatprep.mubr.bf16.mxu0 %v2639_v61 }
  0xaa   :  { %1465 = vmatmul.mubr.bf16.gmra.mxu1 %v2641_v62  ;;  %1562 = vmatmul.mubr.bf16.gmra.mxu0 %v2642_v63 }
  0xab   :  { %1472 = vmatprep.mubr.bf16.mxu1 %v2643_v0  ;;  %1569 = vmatprep.mubr.bf16.mxu0 %v2645_v1 }
  0xb2   :  { %1473 = vmatmul.mubr.bf16.gmra.mxu1 %v2647_v2  ;;  %1570 = vmatmul.mubr.bf16.gmra.mxu0 %v2648_v3 }
  0xb3   :  { %1480 = vmatprep.mubr.bf16.mxu1 %v2650_v4  ;;  %1577 = vmatprep.mubr.bf16.mxu0 %v2652_v5 }
  0xba   :  { %1481 = vmatmul.mubr.bf16.gmra.mxu1 %v2654_v6  ;;  %1578 = vmatmul.mubr.bf16.gmra.mxu0 %v2655_v7  ;;  %v2694_v6 = vld [vmem:[%s3435_s0 + $0x358] ss:$28 sps:$4 sm:$0xff]   ;;  %v2695_v7 = vld [vmem:[%s3435_s0 + $0x360] ss:$28 sps:$4 sm:$0xff]  }
  0xbb   :  { %1585 = vmatprep.mubr.bf16.mxu0 %v2656_v8  ;;  %2432 = vmatprep.mubr.bf16.mxu1 %v2658_v9 }
  0xc2   :  { %1586 = vmatmul.mubr.bf16.gmra.mxu0 %v2659_v10  ;;  %2433 = vmatmul.mubr.bf16.vlgmr.msra.gmra.mxu1 %v2660_v11 }
  0xc3   :  { %1593 = vmatprep.mubr.bf16.mxu0 %v2661_v12  ;;  %2436 = vmatprep.mubr.bf16.mxu1 %v2663_v13 }
  0xca   :  { %1594 = vmatmul.mubr.bf16.gmra.mxu0 %v2664_v14  ;;  %2437 = vmatmul.mubr.bf16.gmra.mxu1 %v2665_v15 }
  0xcb   :  { %1601 = vmatprep.mubr.bf16.mxu0 %v2666_v16  ;;  %2440 = vmatprep.mubr.bf16.mxu1 %v2668_v17 }
  0xd2   :  { %1602 = vmatmul.mubr.bf16.gmra.mxu0 %v2669_v18  ;;  %2441 = vmatmul.mubr.bf16.gmra.mxu1 %v2670_v19 }
  0xd3   :  { %1609 = vmatprep.mubr.bf16.mxu0 %v2671_v20  ;;  %2444 = vmatprep.mubr.bf16.mxu1 %v2673_v21 }
  0xda   :  { %1610 = vmatmul.mubr.bf16.gmra.mxu0 %v2674_v22  ;;  %2445 = vmatmul.mubr.bf16.gmra.mxu1 %v2675_v23 }
  0xdb   :  { %1617 = vmatprep.mubr.bf16.mxu0 %v2676_v24  ;;  %2448 = vmatprep.mubr.bf16.mxu1 %v2678_v25 }
  0xe2   :  { %v2072_v30 = vpop.f32.mrf.mxu0  ;;  %v2144_v31 = vpop.f32.mrf.mxu1  ;;  %1618 = vmatmul.mubr.bf16.gmra.mxu0 %v2679_v26  ;;  %2449 = vmatmul.mubr.bf16.gmra.mxu1 %v2680_v27 }
  0xe3   :  { %1625 = vmatprep.mubr.bf16.mxu0 %v2681_v28  ;;  %2452 = vmatprep.mubr.bf16.mxu1 %v2683_v29 }
  0xe4   :  { %v2073_v32 = vpop.f32.mrf.mxu0  ;;  %v2145_v33 = vpop.f32.mrf.mxu1 }
  0xe5   :  { %v3190_v34 = vadd.f32 %v2073_v32, %v2072_v30  ;;  %v3192_v35 = vadd.f32 %v2145_v33, %v2144_v31 }
  0xe6   :  { %v2075_v36 = vpop.f32.mrf.mxu0  ;;  %v2147_v37 = vpop.f32.mrf.mxu1 }
  0xe8   :  { %v2076_v42 = vpop.f32.mrf.mxu0  ;;  %v2148_v43 = vpop.f32.mrf.mxu1 }
  0xe9   :  { %v3206_v44 = vadd.f32 %v2076_v42, %v2075_v36  ;;  %v3208_v45 = vadd.f32 %v2148_v43, %v2147_v37 }
  0xea   :  { %v2078_v46 = vpop.f32.mrf.mxu0  ;;  %v2150_v47 = vpop.f32.mrf.mxu1  ;;  %1626 = vmatmul.mubr.bf16.gmra.mxu0 %v2684_v38  ;;  %2453 = vmatmul.mubr.bf16.gmra.mxu1 %v2685_v39 }
  0xeb   :  { %1633 = vmatprep.mubr.bf16.mxu0 %v2686_v40  ;;  %2456 = vmatprep.mubr.bf16.mxu1 %v2688_v41 }
  0xec   :  { %v2079_v48 = vpop.f32.mrf.mxu0  ;;  %v2151_v49 = vpop.f32.mrf.mxu1 }
  0xed   :  { %v3210_v50 = vadd.f32 %v2079_v48, %v2078_v46  ;;  %v3212_v51 = vadd.f32 %v2151_v49, %v2150_v47 }
  0xee   :  { %v2081_v52 = vpop.f32.mrf.mxu0  ;;  %v2153_v53 = vpop.f32.mrf.mxu1 }
  0xf0   :  { %v2082_v58 = vpop.f32.mrf.mxu0  ;;  %v2154_v59 = vpop.f32.mrf.mxu1 }
  0xf1   :  { %v3226_v60 = vadd.f32 %v2082_v58, %v2081_v52  ;;  %v3228_v61 = vadd.f32 %v2154_v59, %v2153_v53 }
  0xf2   :  { %v2084_v62 = vpop.f32.mrf.mxu0  ;;  %v2156_v63 = vpop.f32.mrf.mxu1  ;;  %1634 = vmatmul.mubr.bf16.gmra.mxu0 %v2689_v54  ;;  %2457 = vmatmul.mubr.bf16.gmra.mxu1 %v2690_v55 }
  0xf3   :  { %1641 = vmatprep.mubr.bf16.mxu0 %v2691_v56  ;;  %2460 = vmatprep.mubr.bf16.mxu1 %v2693_v57 }
  0xf4   :  { %v2085_v0 = vpop.f32.mrf.mxu0  ;;  %v2157_v1 = vpop.f32.mrf.mxu1 }
  0xf5   :  { %v2086_v2 = vadd.f32 %v2085_v0, %v2084_v62  ;;  %v3230_v3 = vadd.f32 %v2157_v1, %v2156_v63 }
  0xf6   :  { %v2087_v4 = vpop.f32.mrf.mxu0  ;;  %v2159_v5 = vpop.f32.mrf.mxu1 }
  0xf8   :  { %v2088_v8 = vpop.f32.mrf.mxu0  ;;  %v2160_v9 = vpop.f32.mrf.mxu1 }
  0xf9   :  { %v2089_v10 = vadd.f32 %v2088_v8, %v2087_v4  ;;  %v3238_v11 = vadd.f32 %v2160_v9, %v2159_v5 }
  0xfa   :  { %v2090_v12 = vpop.f32.mrf.mxu0  ;;  %v2162_v13 = vpop.f32.mrf.mxu1  ;;  %1642 = vmatmul.mubr.bf16.gmra.mxu0 %v2694_v6  ;;  %2461 = vmatmul.mubr.bf16.gmra.mxu1 %v2695_v7 }
  0xfc   :  { %v2091_v14 = vpop.f32.mrf.mxu0  ;;  %v2163_v15 = vpop.f32.mrf.mxu1 }
  0xfd   :  { %v2092_v16 = vadd.f32 %v2091_v14, %v2090_v12  ;;  %v3240_v17 = vadd.f32 %v2163_v15, %v2162_v13 }
  0xfe   :  { %v2093_v18 = vpop.f32.mrf.mxu0  ;;  %v2165_v19 = vpop.f32.mrf.mxu1 }
 0x100   :  { %v2094_v20 = vpop.f32.mrf.mxu0  ;;  %v2166_v21 = vpop.f32.mrf.mxu1 }
 0x101   :  { %v2095_v22 = vadd.f32 %v2094_v20, %v2093_v18  ;;  %v3242_v23 = vadd.f32 %v2166_v21, %v2165_v19 }
 0x102   :  { %v2096_v24 = vpop.f32.mrf.mxu0  ;;  %v2184_v25 = vpop.f32.mrf.mxu1 }
 0x104   :  { %v2097_v26 = vpop.f32.mrf.mxu0  ;;  %v2185_v27 = vpop.f32.mrf.mxu1 }
 0x105   :  { %v2098_v28 = vadd.f32 %v2097_v26, %v2096_v24  ;;  %v2186_v29 = vadd.f32 %v2185_v27, %v2184_v25 }
 0x106   :  { %v2099_v30 = vpop.f32.mrf.mxu0  ;;  %v2187_v31 = vpop.f32.mrf.mxu1 }
 0x107   :  { %v3245_v32 = vadd.f32 %v2186_v29, %v3190_v34 }
 0x108   :  { %v2100_v33 = vpop.f32.mrf.mxu0  ;;  %v2188_v36 = vpop.f32.mrf.mxu1 }
 0x109   :  { %v2101_v37 = vadd.f32 %v2100_v33, %v2099_v30  ;;  %v2189_v38 = vadd.f32 %v2188_v36, %v2187_v31 }
 0x10a   :  { %v2102_v39 = vpop.f32.mrf.mxu0  ;;  %v2190_v40 = vpop.f32.mrf.mxu1 }
 0x10b   :  { %v3248_v41 = vadd.f32 %v2189_v38, %v3206_v44 }
 0x10c   :  { %v2103_v42 = vpop.f32.mrf.mxu0  ;;  %v2191_v43 = vpop.f32.mrf.mxu1 }
 0x10d   :  { %v2104_v46 = vadd.f32 %v2103_v42, %v2102_v39  ;;  %v2192_v47 = vadd.f32 %v2191_v43, %v2190_v40 }
 0x10e   :  { %v2105_v48 = vpop.f32.mrf.mxu0  ;;  %v2193_v49 = vpop.f32.mrf.mxu1 }
 0x10f   :  { %v3251_v52 = vadd.f32 %v2192_v47, %v3210_v50 }
 0x110   :  { %v2106_v34 = vpop.f32.mrf.mxu0  ;;  %v2194_v53 = vpop.f32.mrf.mxu1 }
 0x111   :  { %v2107_v54 = vadd.f32 %v2106_v34, %v2105_v48  ;;  %v2195_v55 = vadd.f32 %v2194_v53, %v2193_v49 }
 0x112   :  { %v2108_v56 = vpop.f32.mrf.mxu0  ;;  %v2196_v57 = vpop.f32.mrf.mxu1 }
 0x113   :  { %v3254_v58 = vadd.f32 %v2195_v55, %v3226_v60 }
 0x114   :  { %v2109_v44 = vpop.f32.mrf.mxu0  ;;  %v2197_v59 = vpop.f32.mrf.mxu1 }
 0x115   :  { %v2110_v62 = vadd.f32 %v2109_v44, %v2108_v56  ;;  %v2198_v63 = vadd.f32 %v2197_v59, %v2196_v57 }
 0x116   :  { %v2111_v0 = vpop.f32.mrf.mxu0  ;;  %v2199_v1 = vpop.f32.mrf.mxu1 }
 0x117   :  { %v3256_v4 = vadd.f32 %v2198_v63, %v2086_v2 }
 0x118   :  { %v2112_v5 = vpop.f32.mrf.mxu0  ;;  %v2200_v50 = vpop.f32.mrf.mxu1 }
 0x119   :  { %v2113_v6 = vadd.f32 %v2112_v5, %v2111_v0  ;;  %v2201_v7 = vadd.f32 %v2200_v50, %v2199_v1 }
 0x11a   :  { %v2114_v8 = vpop.f32.mrf.mxu0  ;;  %v2202_v9 = vpop.f32.mrf.mxu1 }
 0x11b   :  { %v3258_v12 = vadd.f32 %v2201_v7, %v2089_v10 }
 0x11c   :  { %v2115_v13 = vpop.f32.mrf.mxu0  ;;  %v2203_v14 = vpop.f32.mrf.mxu1 }
 0x11d   :  { %v2116_v60 = vadd.f32 %v2115_v13, %v2114_v8  ;;  %v2204_v15 = vadd.f32 %v2203_v14, %v2202_v9 }
 0x11e   :  { %v2117_v18 = vpop.f32.mrf.mxu0  ;;  %v2205_v19 = vpop.f32.mrf.mxu1 }
 0x11f   :  { %v3260_v20 = vadd.f32 %v2204_v15, %v2092_v16 }
 0x120   :  { %v2118_v21 = vpop.f32.mrf.mxu0  ;;  %v2206_v24 = vpop.f32.mrf.mxu1 }
 0x121   :  { %v2119_v2 = vadd.f32 %v2118_v21, %v2117_v18  ;;  %v2207_v25 = vadd.f32 %v2206_v24, %v2205_v19 }
 0x122   :  { %v2120_v26 = vpop.f32.mrf.mxu0  ;;  %v2208_v27 = vpop.f32.mrf.mxu1 }
 0x123   :  { %v3262_v29 = vadd.f32 %v2207_v25, %v2095_v22 }
 0x124   :  { %v2121_v30 = vpop.f32.mrf.mxu0  ;;  %v2209_v31 = vpop.f32.mrf.mxu1 }
 0x125   :  { %v2122_v10 = vadd.f32 %v2121_v30, %v2120_v26  ;;  %v2210_v33 = vadd.f32 %v2209_v31, %v2208_v27 }
 0x126   :  { %v2123_v36 = vpop.f32.mrf.mxu0  ;;  %v2211_v38 = vpop.f32.mrf.mxu1 }
 0x127   :  { %v3264_v39 = vadd.f32 %v2210_v33, %v2098_v28 }
 0x128   :  { %v2124_v40 = vpop.f32.mrf.mxu0  ;;  %v2212_v42 = vpop.f32.mrf.mxu1 }
 0x129   :  { %v2125_v16 = vadd.f32 %v2124_v40, %v2123_v36  ;;  %v2213_v43 = vadd.f32 %v2212_v42, %v2211_v38 }
 0x12a   :  { %v2126_v47 = vpop.f32.mrf.mxu0  ;;  %v2214_v48 = vpop.f32.mrf.mxu1 }
 0x12b   :  { %v3266_v49 = vadd.f32 %v2213_v43, %v2101_v37 }
 0x12c   :  { %v2127_v34 = vpop.f32.mrf.mxu0  ;;  %v2215_v53 = vpop.f32.mrf.mxu1 }
 0x12d   :  { %v2128_v22 = vadd.f32 %v2127_v34, %v2126_v47  ;;  %v2216_v55 = vadd.f32 %v2215_v53, %v2214_v48 }
 0x12e   :  { %v2129_v56 = vpop.f32.mrf.mxu0  ;;  %v2217_v57 = vpop.f32.mrf.mxu1 }
 0x12f   :  { %v3268_v44 = vadd.f32 %v2216_v55, %v2104_v46 }
 0x130   :  { %v2130_v59 = vpop.f32.mrf.mxu0  ;;  %v2218_v63 = vpop.f32.mrf.mxu1 }
 0x131   :  { %v3270_v28 = vadd.f32 %v2130_v59, %v2129_v56  ;;  %v2219_v0 = vadd.f32 %v2218_v63, %v2217_v57 }
 0x132   :  { %v2132_v1 = vpop.f32.mrf.mxu0  ;;  %v2220_v5 = vpop.f32.mrf.mxu1 }
 0x133   :  { %v3272_v50 = vadd.f32 %v2219_v0, %v2107_v54 }
 0x134   :  { %v2133_v7 = vpop.f32.mrf.mxu0  ;;  %v2221_v37 = vpop.f32.mrf.mxu1 }
 0x135   :  { %v3274_v8 = vadd.f32 %v2133_v7, %v2132_v1  ;;  %v2222_v9 = vadd.f32 %v2221_v37, %v2220_v5 }
 0x136   :  { %v2135_v13 = vpop.f32.mrf.mxu0  ;;  %v2223_v14 = vpop.f32.mrf.mxu1 }
 0x137   :  { %v3276_v15 = vadd.f32 %v2222_v9, %v2110_v62 }
 0x138   :  { %v2136_v46 = vpop.f32.mrf.mxu0  ;;  %v2224_v18 = vpop.f32.mrf.mxu1 }
 0x139   :  { %v3278_v19 = vadd.f32 %v2136_v46, %v2135_v13  ;;  %v2225_v21 = vadd.f32 %v2224_v18, %v2223_v14 }
 0x13a   :  { %v2138_v24 = vpop.f32.mrf.mxu0  ;;  %v2226_v25 = vpop.f32.mrf.mxu1 }
 0x13b   :  { %v3280_v26 = vadd.f32 %v2225_v21, %v2113_v6 }
 0x13c   :  { %v2139_v54 = vpop.f32.mrf.mxu0  ;;  %v2227_v27 = vpop.f32.mrf.mxu1 }
 0x13d   :  { %v3282_v30 = vadd.f32 %v2139_v54, %v2138_v24  ;;  %v2228_v31 = vadd.f32 %v2227_v27, %v2226_v25 }
 0x13e   :  { %v2141_v33 = vpop.f32.mrf.mxu0  ;;  %v2229_v36 = vpop.f32.mrf.mxu1 }
 0x13f   :  { %v3284_v38 = vadd.f32 %v2228_v31, %v2116_v60 }
 0x140   :  { %v2142_v62 = vpop.f32.mrf.mxu0  ;;  %v2230_v40 = vpop.f32.mrf.mxu1 }
 0x141   :  { %v3286_v42 = vadd.f32 %v2142_v62, %v2141_v33  ;;  %v2231_v43 = vadd.f32 %v2230_v40, %v2229_v36 }
 0x142   :  { %v2232_v47 = vpop.f32.mrf.mxu1  ;;  %v2296_v48 = vpop.f32.mrf.mxu0 }
 0x143   :  { %v3288_v34 = vadd.f32 %v2231_v43, %v2119_v2 }
 0x144   :  { %v2233_v6 = vpop.f32.mrf.mxu1  ;;  %v2297_v53 = vpop.f32.mrf.mxu0 }
 0x145   :  { %v2234_v55 = vadd.f32 %v2233_v6, %v2232_v47  ;;  %v2298_v56 = vadd.f32 %v2297_v53, %v2296_v48 }
 0x146   :  { %v2235_v57 = vpop.f32.mrf.mxu1  ;;  %v2299_v59 = vpop.f32.mrf.mxu0 }
 0x147   :  { %v3290_v63 = vadd.f32 %v2234_v55, %v2122_v10  ;;  %v3293_v60 = vadd.f32 %v2298_v56, %v3245_v32 }
 0x148   :  { %v2236_v0 = vpop.f32.mrf.mxu1  ;;  %v2300_v1 = vpop.f32.mrf.mxu0 }
 0x149   :  { %v2237_v5 = vadd.f32 %v2236_v0, %v2235_v57  ;;  %v2301_v7 = vadd.f32 %v2300_v1, %v2299_v59 }
 0x14a   :  { %v2238_v37 = vpop.f32.mrf.mxu1  ;;  %v2302_v9 = vpop.f32.mrf.mxu0 }
 0x14b   :  { %v3295_v13 = vadd.f32 %v2237_v5, %v2125_v16  ;;  %v3298_v2 = vadd.f32 %v2301_v7, %v3248_v41 }
 0x14c   :  { %v2239_v14 = vpop.f32.mrf.mxu1  ;;  %v2303_v46 = vpop.f32.mrf.mxu0 }
 0x14d   :  { %v2240_v18 = vadd.f32 %v2239_v14, %v2238_v37  ;;  %v2304_v21 = vadd.f32 %v2303_v46, %v2302_v9 }
 0x14e   :  { %v2241_v10 = vpop.f32.mrf.mxu1  ;;  %v2305_v24 = vpop.f32.mrf.mxu0 }
 0x14f   :  { %v3300_v25 = vadd.f32 %v2240_v18, %v2128_v22  ;;  %v3303_v32 = vadd.f32 %v2304_v21, %v3251_v52 }
 0x150   :  { %v2242_v54 = vpop.f32.mrf.mxu1  ;;  %v2306_v27 = vpop.f32.mrf.mxu0 }
 0x151   :  { %v2243_v31 = vadd.f32 %v2242_v54, %v2241_v10  ;;  %v2307_v33 = vadd.f32 %v2306_v27, %v2305_v24 }
 0x152   :  { %v2244_v16 = vpop.f32.mrf.mxu1  ;;  %v2308_v36 = vpop.f32.mrf.mxu0 }
 0x153   :  { %v3306_v41 = vadd.f32 %v2243_v31, %v3270_v28  ;;  %v3309_v62 = vadd.f32 %v2307_v33, %v3254_v58 }
 0x154   :  { %v2245_v40 = vpop.f32.mrf.mxu1  ;;  %v2309_v43 = vpop.f32.mrf.mxu0 }
 0x155   :  { %v2246_v47 = vadd.f32 %v2245_v40, %v2244_v16  ;;  %v2310_v22 = vadd.f32 %v2309_v43, %v2308_v36 }
 0x156   :  { %v2247_v48 = vpop.f32.mrf.mxu1  ;;  %v2311_v6 = vpop.f32.mrf.mxu0 }
 0x157   :  { %v3312_v52 = vadd.f32 %v2246_v47, %v3274_v8  ;;  %v3315_v53 = vadd.f32 %v2310_v22, %v3256_v4 }
 0x158   :  { %v2248_v55 = vpop.f32.mrf.mxu1  ;;  %v2312_v56 = vpop.f32.mrf.mxu0 }
 0x159   :  { %v2249_v57 = vadd.f32 %v2248_v55, %v2247_v48  ;;  %v2313_v28 = vadd.f32 %v2312_v56, %v2311_v6 }
 0x15a   :  { %v2250_v59 = vpop.f32.mrf.mxu1  ;;  %v2314_v0 = vpop.f32.mrf.mxu0 }
 0x15b   :  { %v3318_v58 = vadd.f32 %v2249_v57, %v3278_v19  ;;  %v3321_v1 = vadd.f32 %v2313_v28, %v3258_v12 }
 0x15c   :  { %v2251_v5 = vpop.f32.mrf.mxu1  ;;  %v2315_v7 = vpop.f32.mrf.mxu0 }
 0x15d   :  { %v2252_v37 = vadd.f32 %v2251_v5, %v2250_v59  ;;  %v2316_v8 = vadd.f32 %v2315_v7, %v2314_v0 }
 0x15e   :  { %v2253_v9 = vpop.f32.mrf.mxu1  ;;  %v2317_v14 = vpop.f32.mrf.mxu0 }
 0x15f   :  { %v3324_v4 = vadd.f32 %v2252_v37, %v3282_v30  ;;  %v3327_v46 = vadd.f32 %v2316_v8, %v3260_v20 }
 0x160   :  { %v2254_v18 = vpop.f32.mrf.mxu1  ;;  %v2318_v21 = vpop.f32.mrf.mxu0 }
 0x161   :  { %v2255_v10 = vadd.f32 %v2254_v18, %v2253_v9  ;;  %v2319_v19 = vadd.f32 %v2318_v21, %v2317_v14 }
 0x162   :  { %v2256_v24 = vpop.f32.mrf.mxu1  ;;  %v2320_v54 = vpop.f32.mrf.mxu0 }
 0x163   :  { %v3330_v12 = vadd.f32 %v2255_v10, %v3286_v42  ;;  %v3333_v27 = vadd.f32 %v2319_v19, %v3262_v29 }
 0x164   :  { %v2257_v31 = vpop.f32.mrf.mxu1  ;;  %v2321_v33 = vpop.f32.mrf.mxu0 }
 0x165   :  { %v2258_v16 = vadd.f32 %v2257_v31, %v2256_v24  ;;  %v2322_v30 = vadd.f32 %v2321_v33, %v2320_v54 }
 0x166   :  { %v2259_v36 = vpop.f32.mrf.mxu1  ;;  %v2323_v40 = vpop.f32.mrf.mxu0 }
 0x167   :  { %v3336_v20 = vadd.f32 %v2258_v16, %v3192_v35  ;;  %v3339_v43 = vadd.f32 %v2322_v30, %v3264_v39 }
 0x168   :  { %v2260_v47 = vpop.f32.mrf.mxu1  ;;  %v2324_v22 = vpop.f32.mrf.mxu0 }
 0x169   :  { %v2261_v48 = vadd.f32 %v2260_v47, %v2259_v36  ;;  %v2325_v42 = vadd.f32 %v2324_v22, %v2323_v40 }
 0x16a   :  { %v2262_v6 = vpop.f32.mrf.mxu1  ;;  %v2326_v55 = vpop.f32.mrf.mxu0 }
 0x16b   :  { %v3342_v29 = vadd.f32 %v2261_v48, %v3208_v45  ;;  %v3345_v56 = vadd.f32 %v2325_v42, %v3266_v49 }
 0x16c   :  { %v2263_v57 = vpop.f32.mrf.mxu1  ;;  %v2327_v28 = vpop.f32.mrf.mxu0 }
 0x16d   :  { %v2264_v59 = vadd.f32 %v2263_v57, %v2262_v6  ;;  %v2328_v35 = vadd.f32 %v2327_v28, %v2326_v55 }
 0x16e   :  { %v2265_v0 = vpop.f32.mrf.mxu1  ;;  %v2329_v5 = vpop.f32.mrf.mxu0 }
 0x16f   :  { %v3348_v39 = vadd.f32 %v2264_v59, %v3212_v51  ;;  %v1564_v7 = vadd.f32 %v2328_v35, %v3268_v44 }
 0x170   :  { %v2266_v37 = vpop.f32.mrf.mxu1  ;;  %v2330_v8 = vpop.f32.mrf.mxu0 }
 0x171   :  { %v2267_v9 = vadd.f32 %v2266_v37, %v2265_v0  ;;  %v2331_v14 = vadd.f32 %v2330_v8, %v2329_v5 }
 0x172   :  { %v2268_v45 = vpop.f32.mrf.mxu1  ;;  %v3351_v18 = vpop.f32.mrf.mxu0 }
 0x173   :  { %v3354_v49 = vadd.f32 %v2267_v9, %v3228_v61  ;;  %v3357_v21 = vadd.f32 %v2331_v14, %v3272_v50 }
 0x174   :  { %v2269_v10 = vpop.f32.mrf.mxu1  ;;  %v2333_v19 = vpop.f32.mrf.mxu0 }
 0x175   :  { %v2270_v24 = vadd.f32 %v2269_v10, %v2268_v45 }
 0x176   :  { %v2271_v51 = vpop.f32.mrf.mxu1  ;;  %v3359_v54 = vpop.f32.mrf.mxu0 }
 0x177   :  { %v3362_v44 = vadd.f32 %v2270_v24, %v3230_v3 }
 0x178   :  { %v2272_v31 = vpop.f32.mrf.mxu1  ;;  %v3364_v33 = vpop.f32.mrf.mxu0 }
 0x179   :  { %v2273_v16 = vadd.f32 %v2272_v31, %v2271_v51 }
 0x17a   :  { %v2274_v30 = vpop.f32.mrf.mxu1  ;;  %v2338_v36 = vpop.f32.mrf.mxu0 }
 0x17b   :  { %v3367_v61 = vadd.f32 %v2273_v16, %v3238_v11 }
 0x17c   :  { %v2275_v50 = vpop.f32.mrf.mxu1  ;;  %v2339_v40 = vpop.f32.mrf.mxu0 }
 0x17d   :  { %v2276_v47 = vadd.f32 %v2275_v50, %v2274_v30 }
 0x17e   :  { %v2277_v22 = vpop.f32.mrf.mxu1  ;;  %v2341_v48 = vpop.f32.mrf.mxu0 }
 0x17f   :  { %v3370_v42 = vadd.f32 %v2276_v47, %v3240_v17 }
 0x180   :  { %v2278_v6 = vpop.f32.mrf.mxu1  ;;  %v2342_v3 = vpop.f32.mrf.mxu0 }
 0x181   :  { %v2279_v55 = vadd.f32 %v2278_v6, %v2277_v22 }
 0x182   :  { %v2344_v57 = vpop.f32.mrf.mxu0  ;;  %v2434_v28 = vpop.f32.mrf.mxu1 }
 0x183   :  { %v3373_v59 = vadd.f32 %v2279_v55, %v3242_v23  ;;  %v1693_v17 = vadd.f32 %v2434_v28, %v3303_v32 }
 0x184   :  { %v2345_v35 = vpop.f32.mrf.mxu0  ;;  %v1684_v0 = vpop.f32.mrf.mxu1 }
 0x185   :  { %3438 = vst [vmem:[#allocation2_spill] sm:$0xff] %v3373_v59  ;;  %v1685_v51 = vadd.f32 %v1684_v0, %v3293_v60 }
 0x186   :  { %v3375_v11 = vpop.f32.mrf.mxu0  ;;  %v2435_v5 = vpop.f32.mrf.mxu1 }
 0x187   :  { %v1696_v50 = vadd.f32 %v2435_v5, %v3309_v62 }
 0x188   :  { %v3377_v37 = vpop.f32.mrf.mxu0  ;;  %v1687_v8 = vpop.f32.mrf.mxu1 }
 0x189   :  { %v1688_v32 = vadd.f32 %v1687_v8, %v3298_v2 }
 0x18a   :  { %v2350_v9 = vpop.f32.mrf.mxu0  ;;  %v2438_v14 = vpop.f32.mrf.mxu1 }
 0x18b   :  { %v1709_v45 = vadd.f32 %v2438_v14, %v3327_v46 }
 0x18c   :  { %v2351_v10 = vpop.f32.mrf.mxu0  ;;  %v1700_v24 = vpop.f32.mrf.mxu1 }
 0x18d   :  { %v1813_v23 = vmax.f32 %v1693_v17, %v1709_v45  ;;  %v1701_v31 = vadd.f32 %v1700_v24, %v3315_v53  ;;  %v2340_v45 = vadd.f32 %v2339_v40, %v2338_v36 }
 0x18e   :  { %v2353_v16 = vpop.f32.mrf.mxu0  ;;  %v2439_v30 = vpop.f32.mrf.mxu1 }
 0x18f   :  { %v1811_v47 = vmax.f32 %v1685_v51, %v1701_v31  ;;  %v1712_v22 = vadd.f32 %v2439_v30, %v3333_v27  ;;  %v2334_v27 = vadd.f32 %v2333_v19, %v3351_v18 }
 0x190   :  { %v2354_v6 = vpop.f32.mrf.mxu0  ;;  %v1703_v55 = vpop.f32.mrf.mxu1 }
 0x191   :  { %v1814_v28 = vmax.f32 %v1696_v50, %v1712_v22  ;;  %v1704_v46 = vadd.f32 %v1703_v55, %v3321_v1  ;;  %v2343_v1 = vadd.f32 %v2342_v3, %v2341_v48  ;;  %v1572_v18 = vadd.f32 %v2334_v27, %v3276_v15 }
 0x192   :  { %v2356_v14 = vpop.f32.mrf.mxu0  ;;  %v2442_v59 = vpop.f32.mrf.mxu1 }
 0x193   :  { %v1812_v60 = vmax.f32 %v1688_v32, %v1704_v46  ;;  %v1725_v0 = vadd.f32 %v2442_v59, %v1564_v7  ;;  %v1580_v7 = vadd.f32 %v2340_v45, %v3284_v38  ;;  %v1583_v48 = vadd.f32 %v2343_v1, %v3288_v34 }
 0x194   :  { %v2357_v17 = vpop.f32.mrf.mxu0  ;;  %v1716_v53 = vpop.f32.mrf.mxu1 }
 0x195   :  { %v1817_v24 = vmax.f32 %v1813_v23, %v1725_v0  ;;  %v1717_v62 = vadd.f32 %v1716_v53, %v3339_v43  ;;  %v2337_v43 = vadd.f32 %v3364_v33, %v3359_v54  ;;  %v2355_v33 = vadd.f32 %v2354_v6, %v2353_v16 }
 0x196   :  { %v2359_v5 = vpop.f32.mrf.mxu0  ;;  %v2443_v51 = vpop.f32.mrf.mxu1 }
 0x197   :  { %v1815_v31 = vmax.f32 %v1811_v47, %v1717_v62  ;;  %v1728_v2 = vadd.f32 %v2443_v51, %v3357_v21  ;;  %v2352_v21 = vadd.f32 %v2351_v10, %v2350_v9  ;;  %v1575_v0 = vadd.f32 %v2337_v43, %v3280_v26 }
 0x198   :  { %v2360_v8 = vpop.f32.mrf.mxu0  ;;  %v1719_v30 = vpop.f32.mrf.mxu1  ;;  %v2349_v10 = vadd.f32 %v3377_v37, %v3375_v11  ;;  %v1599_v16 = vadd.f32 %v2355_v33, %v3306_v41 }
 0x199   :  { %v1818_v50 = vmax.f32 %v1814_v28, %v1728_v2  ;;  %v1720_v22 = vadd.f32 %v1719_v30, %v3345_v56  ;;  %v2346_v28 = vadd.f32 %v2345_v35, %v2344_v57  ;;  %v1596_v15 = vadd.f32 %v2352_v21, %v3300_v25 }
 0x19a   :  { %v2362_v59 = vpop.f32.mrf.mxu0  ;;  %v2446_v36 = vpop.f32.mrf.mxu1  ;;  %v2358_v30 = vadd.f32 %v2357_v17, %v2356_v14 }
 0x19b   :  { %v1816_v40 = vmax.f32 %v1812_v60, %v1720_v22  ;;  %v1741_v23 = vadd.f32 %v2446_v36, %v1580_v7  ;;  %v1588_v57 = vadd.f32 %v2346_v28, %v3290_v63 }
 0x19c   :  { %v2363_v19 = vpop.f32.mrf.mxu0  ;;  %v1732_v47 = vpop.f32.mrf.mxu1  ;;  %v1604_v41 = vadd.f32 %v2358_v30, %v3312_v52 }
 0x19d   :  { %v1821_v55 = vmax.f32 %v1817_v24, %v1741_v23  ;;  %v1733_v32 = vadd.f32 %v1732_v47, %v1572_v18  ;;  %v2364_v27 = vadd.f32 %v2363_v19, %v2362_v59 }
 0x19e   :  { %v2365_v3 = vpop.f32.mrf.mxu0  ;;  %v2447_v56 = vpop.f32.mrf.mxu1 }
 0x19f   :  { %v1819_v38 = vmax.f32 %v1815_v31, %v1733_v32  ;;  %v1744_v46 = vadd.f32 %v2447_v56, %v1583_v48  ;;  %v1612_v63 = vadd.f32 %v2364_v27, %v3324_v4 }
 0x1a0   :  { %v2366_v53 = vpop.f32.mrf.mxu0  ;;  %v1735_v54 = vpop.f32.mrf.mxu1 }
 0x1a1   :  { %v1822_v60 = vmax.f32 %v1818_v50, %v1744_v46  ;;  %v1736_v45 = vadd.f32 %v1735_v54, %v1575_v0  ;;  %v1591_v50 = vadd.f32 %v2349_v10, %v3295_v13  ;;  %v2367_v37 = vadd.f32 %v2366_v53, %v2365_v3 }
 0x1a2   :  { %v2368_v62 = vpop.f32.mrf.mxu0  ;;  %v2450_v9 = vpop.f32.mrf.mxu1 }
 0x1a3   :  { %v1820_v34 = vmax.f32 %v1816_v40, %v1736_v45  ;;  %v1757_v24 = vadd.f32 %v2450_v9, %v1596_v15  ;;  %v2361_v40 = vadd.f32 %v2360_v8, %v2359_v5  ;;  %v1615_v13 = vadd.f32 %v2367_v37, %v3330_v12 }
 0x1a4   :  { %v2369_v35 = vpop.f32.mrf.mxu0  ;;  %v1748_v51 = vpop.f32.mrf.mxu1 }
 0x1a5   :  { %v1825_v26 = vmax.f32 %v1821_v55, %v1757_v24  ;;  %v1749_v31 = vadd.f32 %v1748_v51, %v1588_v57  ;;  %v2370_v48 = vadd.f32 %v2369_v35, %v2368_v62  ;;  %v1607_v4 = vadd.f32 %v2361_v40, %v3318_v58 }
 0x1a6   :  { %v2371_v6 = vpop.f32.mrf.mxu0  ;;  %v2451_v2 = vpop.f32.mrf.mxu1 }
 0x1a7   :  { %v1823_v25 = vmax.f32 %v1819_v38, %v1749_v31  ;;  %v1760_v1 = vadd.f32 %v2451_v2, %v1599_v16  ;;  %v1620_v12 = vadd.f32 %v2370_v48, %v3336_v20 }
 0x1a8   :  { %v2372_v22 = vpop.f32.mrf.mxu0  ;;  %v1751_v11 = vpop.f32.mrf.mxu1 }
 0x1a9   :  { %v1826_v7 = vmax.f32 %v1822_v60, %v1760_v1  ;;  %v1752_v36 = vadd.f32 %v1751_v11, %v1591_v50  ;;  %v2373_v54 = vadd.f32 %v2372_v22, %v2371_v6  ;;  %v2047_v22 = vld [vmem:[%s3436_s2] ss:$0 sm:$0xff] }
 0x1aa   :  { %v2374_v43 = vpop.f32.mrf.mxu0  ;;  %v2454_v59 = vpop.f32.mrf.mxu1 }
 0x1ab   :  { %v1824_v23 = vmax.f32 %v1820_v34, %v1752_v36  ;;  %v1773_v18 = vadd.f32 %v2454_v59, %v1612_v63 }
 0x1ac   :  { %v2375_v19 = vpop.f32.mrf.mxu0  ;;  %v1764_v14 = vpop.f32.mrf.mxu1 }
 0x1ad   :  { %v1829_v17 = vmax.f32 %v1825_v26, %v1773_v18  ;;  %v2376_v47 = vadd.f32 %v2375_v19, %v2374_v43  ;;  %v1765_v21 = vadd.f32 %v1764_v14, %v1604_v41  ;;  %v3439_v19 = vld [vmem:[#allocation2_spill] sm:$0xff] }
 0x1ae   :  { %v2377_v55 = vpop.f32.mrf.mxu0  ;;  %v2455_v32 = vpop.f32.mrf.mxu1 }
 0x1af   :  { %v1827_v3 = vmax.f32 %v1823_v25, %v1765_v21  ;;  %v1776_v56 = vadd.f32 %v2455_v32, %v1615_v13  ;;  %v1628_v52 = vadd.f32 %v2376_v47, %v3348_v39  ;;  %v1623_v39 = vadd.f32 %v2373_v54, %v3342_v29 }
 0x1b0   :  { %v2378_v28 = vpop.f32.mrf.mxu0  ;;  %v1767_v5 = vpop.f32.mrf.mxu1 }
 0x1b1   :  { %v1830_v8 = vmax.f32 %v1826_v7, %v1776_v56  ;;  %v2379_v38 = vadd.f32 %v2378_v28, %v2377_v55  ;;  %v1768_v46 = vadd.f32 %v1767_v5, %v1607_v4 }
 0x1b2   :  { %v2380_v0 = vpop.f32.mrf.mxu0  ;;  %v2458_v53 = vpop.f32.mrf.mxu1 }
 0x1b3   :  { %v1828_v33 = vmax.f32 %v1824_v23, %v1768_v46  ;;  %v1789_v60 = vadd.f32 %v2458_v53, %v1628_v52  ;;  %v1631_v58 = vadd.f32 %v2379_v38, %v3354_v49 }
 0x1b4   :  { %v2381_v45 = vpop.f32.mrf.mxu0  ;;  %v1780_v15 = vpop.f32.mrf.mxu1 }
 0x1b5   :  { %v1833_v62 = vmax.f32 %v1829_v17, %v1789_v60  ;;  %v1781_v9 = vadd.f32 %v1780_v15, %v1620_v12  ;;  %v2382_v24 = vadd.f32 %v2381_v45, %v2380_v0 }
 0x1b6   :  { %v2383_v10 = vpop.f32.mrf.mxu0  ;;  %v2459_v34 = vpop.f32.mrf.mxu1 }
 0x1b7   :  { %v1831_v57 = vmax.f32 %v1827_v3, %v1781_v9  ;;  %v1792_v35 = vadd.f32 %v2459_v34, %v1631_v58  ;;  %v1636_v30 = vadd.f32 %v2382_v24, %v3362_v44 }
 0x1b8   :  { %v2384_v51 = vpop.f32.mrf.mxu0  ;;  %v1783_v27 = vpop.f32.mrf.mxu1 }
 0x1b9   :  { %v1834_v26 = vmax.f32 %v1830_v8, %v1792_v35  ;;  %v1784_v31 = vadd.f32 %v1783_v27, %v1623_v39  ;;  %v2385_v20 = vadd.f32 %v2384_v51, %v2383_v10 }
 0x1ba   :  { %v2386_v16 = vpop.f32.mrf.mxu0  ;;  %v2462_v6 = vpop.f32.mrf.mxu1 }
 0x1bb   :  { %v1832_v2 = vmax.f32 %v1828_v33, %v1784_v31  ;;  %v1639_v36 = vadd.f32 %v2385_v20, %v3367_v61 }
 0x1bc   :  { %v2387_v25 = vpop.f32.mrf.mxu0  ;;  %v1796_v1 = vpop.f32.mrf.mxu1 }
 0x1bd   :  { %v2388_v49 = vadd.f32 %v2387_v25, %v2386_v16  ;;  %v1797_v50 = vadd.f32 %v1796_v1, %v1636_v30 }
 0x1be   :  { %v2389_v11 = vpop.f32.mrf.mxu0  ;;  %v2463_v29 = vpop.f32.mrf.mxu1 }
 0x1bf   :  { %v1644_v37 = vadd.f32 %v2388_v49, %v3370_v42  ;;  %v1835_v7 = vmax.f32 %v1831_v57, %v1797_v50 }
 0x1c0   :  { %v2390_v63 = vpop.f32.mrf.mxu0  ;;  %v1799_v43 = vpop.f32.mrf.mxu1 }
 0x1c1   :  { %v1805_v59 = vadd.f32 %v2462_v6, %v1644_v37  ;;  %v1846_v40 = vadd.f32 %v2047_v22, %v1835_v7  ;;  %v2391_v44 = vadd.f32 %v2390_v63, %v2389_v11  ;;  %v1800_v23 = vadd.f32 %v1799_v43, %v1639_v36 }
 0x1c3   :  { %v1837_v18 = vmax.f32 %v1833_v62, %v1805_v59  ;;  %v1850_v41 = vmax.f32 %v1846_v40, 0.0  ;;  %v1647_v14 = vadd.f32 %v2391_v44, %v3439_v19  ;;  %v1836_v17 = vmax.f32 %v1832_v2, %v1800_v23 }
 0x1c5   :  { %v1848_v47 = vadd.f32 %v2047_v22, %v1837_v18  ;;  %v2052_v21 = vpack.c.bf16 %v1850_v41, %v1850_v41  ;;  %v1808_v13 = vadd.f32 %v2463_v29, %v1647_v14  ;;  %v1847_v55 = vadd.f32 %v2047_v22, %v1836_v17 }
 0x1c7   :  { %v1852_v42 = vmax.f32 %v1848_v47, 0.0  ;;  %1871 = vst.msk [vmem:[%s3437_s3] sm:$0xf] %vm1870_vm0, %v2052_v21  ;;  %v1838_v61 = vmax.f32 %v1834_v26, %v1808_v13  ;;  %v1851_v32 = vmax.f32 %v1847_v55, 0.0 }
 0x1c9   :  { %v2054_v48 = vpack.c.bf16 %v1852_v42, %v1852_v42  ;;  %v1849_v3 = vadd.f32 %v2047_v22, %v1838_v61  ;;  %v2053_v56 = vpack.c.bf16 %v1851_v32, %v1851_v32 }
 0x1cb   :  { %1873 = vst.msk [vmem:[%s3437_s3 + $0x8] sm:$0xf] %vm1870_vm0, %v2054_v48  ;;  %v1853_v4 = vmax.f32 %v1849_v3, 0.0  ;;  %1872 = vst.msk [vmem:[%s3437_s3 + $0x4] sm:$0xf] %vm1870_vm0, %v2053_v56 }
 0x1cd   :  { %v2055_v28 = vpack.c.bf16 %v1853_v4, %v1853_v4 }
 0x1cf   :  { %1874 = vst.msk [vmem:[%s3437_s3 + $0xc] sm:$0xf] %vm1870_vm0, %v2055_v28 }

// kernel: pig_action_3dcnn_forward.5
= control target key start
LH: loop header
LB: loop body
LE: loop exit
PB: predicated region body
PF: predicated region fallthrough
CT: control target
= control target key end

     0   :  { %v163_v28 = vlaneseq  ;;  %v1179_v36 = vmov 1966171168   ;;  %s1454_s0 = inlined_call_operand.vmem [shape: bf16[2,1024], index: 0, kind: input, shape index: {}]   ;;  %s1455_s1 = inlined_call_operand.vmem [shape: bf16[1024,128], index: 1, kind: input, shape index: {}]   ;;  %s1456_s2 = inlined_call_operand.vmem [shape: f32[1,128], index: 2, kind: input, shape index: {}]   ;;  %s1457_s3 = inlined_call_operand.vmem [shape: bf16[128,2], index: 3, kind: input, shape index: {}]   ;;  %s1458_s4 = inlined_call_operand.vmem [shape: f32[1,2], index: 4, kind: input, shape index: {}]   ;;  %s1459_s5 = inlined_call_operand.hbm [shape: f32[2,2], index: 5, kind: output, shape index: {}]  }
   0x1   :  { %v1084_v0 = vld [vmem:[%s1455_s1 + $0x78] sm:$0xff]   ;;  %v1088_v4 = vld [vmem:[%s1455_s1 + $0x70] sm:$0xff]   ;;  %v1092_v8 = vld [vmem:[%s1455_s1 + $0x68] sm:$0xff]   ;;  %v161_v37 = vunpack.c.l.s4 %v1179_v36 }
   0x2   :  { %v1085_v1 = vld [vmem:[%s1455_s1 + $0xf8] sm:$0xff]   ;;  %963 = vmatprep.subr.bf16.mxu0 %v1084_v0  ;;  %v1089_v5 = vld [vmem:[%s1455_s1 + $0xf0] sm:$0xff]   ;;  %v1093_v9 = vld [vmem:[%s1455_s1 + $0xe8] sm:$0xff]   ;;  %v164_v33 = vshrl.u32 %v163_v28, 7 }
   0x3   :  { %v1086_v2 = vld [vmem:[%s1455_s1 + $0x38] sm:$0xff]   ;;  %985 = vmatprep.subr.bf16.mxu1 %v1085_v1  ;;  %v1090_v6 = vld [vmem:[%s1455_s1 + $0x30] sm:$0xff]   ;;  %v1094_v10 = vld [vmem:[%s1455_s1 + $0x28] sm:$0xff]   ;;  %v162_v40 = vunpack.c.0.s8 %v161_v37 }
   0x4   :  { %v1087_v3 = vld [vmem:[%s1455_s1 + $0xb8] sm:$0xff]   ;;  %964 = vmatpush3.bf16.msra.mxu0 %v1086_v2  ;;  %v1091_v7 = vld [vmem:[%s1455_s1 + $0xb0] sm:$0xff]   ;;  %v1095_v11 = vld [vmem:[%s1455_s1 + $0xa8] sm:$0xff]  }
   0x5   :  { %986 = vmatpush3.bf16.msra.mxu1 %v1087_v3  ;;  %965 = vmatprep.subr.bf16.mxu0 %v1088_v4  ;;  %v1096_v12 = vld [vmem:[%s1455_s1 + $0x60] sm:$0xff]   ;;  %v1100_v16 = vld [vmem:[%s1455_s1 + $0x58] sm:$0xff]   ;;  %v1104_v20 = vld [vmem:[%s1455_s1 + $0x50] sm:$0xff]   ;;  %v1318_v41 = vsub.s32 %v162_v40, %v164_v33 }
   0x6   :  { %987 = vmatprep.subr.bf16.mxu1 %v1089_v5  ;;  %v1097_v13 = vld [vmem:[%s1455_s1 + $0xe0] sm:$0xff]   ;;  %v1101_v17 = vld [vmem:[%s1455_s1 + $0xd8] sm:$0xff]   ;;  %v1105_v21 = vld [vmem:[%s1455_s1 + $0xd0] sm:$0xff]  }
   0x7   :  { %v1098_v14 = vld [vmem:[%s1455_s1 + $0x20] sm:$0xff]   ;;  %v1102_v18 = vld [vmem:[%s1455_s1 + $0x18] sm:$0xff]   ;;  %v1106_v22 = vld [vmem:[%s1455_s1 + $0x10] sm:$0xff]  }
   0x8   :  { %966 = vmatpush3.bf16.msra.mxu0 %v1090_v6  ;;  %v1099_v15 = vld [vmem:[%s1455_s1 + $0xa0] sm:$0xff]   ;;  %v1103_v19 = vld [vmem:[%s1455_s1 + $0x98] sm:$0xff]   ;;  %v1107_v23 = vld [vmem:[%s1455_s1 + $0x90] sm:$0xff]  }
   0x9   :  { %988 = vmatpush3.bf16.msra.mxu1 %v1091_v7  ;;  %967 = vmatprep.subr.bf16.mxu0 %v1092_v8  ;;  %v1108_v24 = vld [vmem:[%s1455_s1 + $0x48] sm:$0xff]   ;;  %v1112_v29 = vld [vmem:[%s1455_s1 + $0x40] sm:$0xff]   ;;  %v1117_v35 = vld [vmem:[%s1455_s1 + $0x178] sm:$0xff]  }
   0xa   :  { %989 = vmatprep.subr.bf16.mxu1 %v1093_v9  ;;  %v1109_v25 = vld [vmem:[%s1455_s1 + $0xc8] sm:$0xff]   ;;  %v1113_v30 = vld [vmem:[%s1455_s1 + $0xc0] sm:$0xff]   ;;  %v1118_v38 = vld [vmem:[%s1455_s1 + $0x1f8] sm:$0xff]  }
   0xb   :  { %v1110_v26 = vld [vmem:[%s1455_s1 + $0x8] sm:$0xff]   ;;  %v1114_v31 = vld [vmem:[%s1455_s1] sm:$0xff]   ;;  %v1119_v47 = vld [vmem:[%s1455_s1 + $0x138] sm:$0xff]  }
   0xc   :  { %968 = vmatpush3.bf16.msra.mxu0 %v1094_v10  ;;  %v1111_v27 = vld [vmem:[%s1455_s1 + $0x88] sm:$0xff]   ;;  %v1115_v32 = vld [vmem:[%s1455_s1 + $0x80] sm:$0xff]   ;;  %v1120_v49 = vld [vmem:[%s1455_s1 + $0x1b8] sm:$0xff]  }
   0xd   :  { %990 = vmatpush3.bf16.msra.mxu1 %v1095_v11  ;;  %969 = vmatprep.subr.bf16.mxu0 %v1096_v12  ;;  %v22_v34 = vld [vmem:[%s1454_s0] sm:$0xff]  ;;  %v1121_v52 = vld [vmem:[%s1455_s1 + $0x170] sm:$0xff]   ;;  %v1125_v58 = vld [vmem:[%s1455_s1 + $0x168] sm:$0xff]  }
   0xe   :  { %991 = vmatprep.subr.bf16.mxu1 %v1097_v13  ;;  %v159_v39 = vcombine.high %v22_v34, %v22_v34  ;;  %v166_v42 = vrot.slane %v22_v34, %v1318_v41  ;;  %v1122_v54 = vld [vmem:[%s1455_s1 + $0x1f0] sm:$0xff]   ;;  %v1126_v59 = vld [vmem:[%s1455_s1 + $0x1e8] sm:$0xff]   ;;  %v1129_v62 = vld [vmem:[%s1455_s1 + $0x160] sm:$0xff]  }
   0xf   :  { %v1123_v55 = vld [vmem:[%s1455_s1 + $0x130] sm:$0xff]   ;;  %v1127_v60 = vld [vmem:[%s1455_s1 + $0x128] sm:$0xff]   ;;  %v1130_v63 = vld [vmem:[%s1455_s1 + $0x1e0] sm:$0xff]  }
  0x10   :  { %970 = vmatpush3.bf16.msra.mxu0 %v1098_v14  ;;  %v1322_v43 = vrot.slane %v159_v39, %v1318_v41  ;;  %v174_v44 = vcombine.high %v166_v42, %v166_v42  ;;  %v182_v45 = vrot.slane %v166_v42, %v1318_v41  ;;  %v1124_v57 = vld [vmem:[%s1455_s1 + $0x1b0] sm:$0xff]   ;;  %v1128_v61 = vld [vmem:[%s1455_s1 + $0x1a8] sm:$0xff]   ;;  %v1131_v0 = vld [vmem:[%s1455_s1 + $0x120] sm:$0xff]  }
  0x11   :  { %992 = vmatpush3.bf16.msra.mxu1 %v1099_v15  ;;  %971 = vmatprep.subr.bf16.mxu0 %v1100_v16  ;;  %v1132_v1 = vld [vmem:[%s1455_s1 + $0x1a0] sm:$0xff]   ;;  %v1133_v2 = vld [vmem:[%s1455_s1 + $0x158] sm:$0xff]   ;;  %v1137_v6 = vld [vmem:[%s1455_s1 + $0x150] sm:$0xff]  }
  0x12   :  { %993 = vmatprep.subr.bf16.mxu1 %v1101_v17  ;;  %v175_v46 = vcombine.high %v1322_v43, %v1322_v43  ;;  %v196_v48 = vrot.slane %v174_v44, %v1318_v41  ;;  %v204_v51 = vcombine.high %v182_v45, %v182_v45  ;;  %v1134_v3 = vld [vmem:[%s1455_s1 + $0x1d8] sm:$0xff]   ;;  %v1138_v7 = vld [vmem:[%s1455_s1 + $0x1d0] sm:$0xff]   ;;  %v1141_v10 = vld [vmem:[%s1455_s1 + $0x148] sm:$0xff]  }
  0x13   :  { %v1135_v4 = vld [vmem:[%s1455_s1 + $0x118] sm:$0xff]   ;;  %v1139_v8 = vld [vmem:[%s1455_s1 + $0x110] sm:$0xff]   ;;  %v1142_v11 = vld [vmem:[%s1455_s1 + $0x1c8] sm:$0xff]  }
  0x14   :  { %972 = vmatpush3.bf16.msra.mxu0 %v1102_v18  ;;  %v203_v50 = vrot.slane %v175_v46, %v1318_v41  ;;  %632 = vmatprep.mubr.bf16.mxu0 %v196_v48  ;;  %v206_v53 = vcombine.high %v196_v48, %v196_v48  ;;  %v1136_v5 = vld [vmem:[%s1455_s1 + $0x198] sm:$0xff]   ;;  %v1140_v9 = vld [vmem:[%s1455_s1 + $0x190] sm:$0xff]   ;;  %v1143_v12 = vld [vmem:[%s1455_s1 + $0x108] sm:$0xff]  }
  0x15   :  { %994 = vmatpush3.bf16.msra.mxu1 %v1103_v19  ;;  %973 = vmatprep.subr.bf16.mxu0 %v1104_v20  ;;  %v1145_v13 = vld [vmem:[%s1455_s1 + $0x140] sm:$0xff]   ;;  %v1144_v14 = vld [vmem:[%s1455_s1 + $0x188] sm:$0xff]  }
  0x16   :  { %995 = vmatprep.subr.bf16.mxu1 %v1105_v21  ;;  %v207_v56 = vcombine.high %v203_v50, %v203_v50  ;;  %672 = vmatprep.mubr.bf16.mxu1 %v206_v53 }
  0x18   :  { %974 = vmatpush3.bf16.msra.mxu0 %v1106_v22 }
  0x19   :  { %996 = vmatpush3.bf16.msra.mxu1 %v1107_v23  ;;  %975 = vmatprep.subr.bf16.mxu0 %v1108_v24 }
  0x1a   :  { %997 = vmatprep.subr.bf16.mxu1 %v1109_v25 }
  0x1c   :  { %976 = vmatpush3.bf16.msra.mxu0 %v1110_v26 }
  0x1d   :  { %998 = vmatpush3.bf16.msra.mxu1 %v1111_v27  ;;  %977 = vmatprep.subr.bf16.mxu0 %v1112_v29 }
  0x1e   :  { %999 = vmatprep.subr.bf16.mxu1 %v1113_v30 }
  0x20   :  { %978 = vmatpush3.bf16.msra.mxu0 %v1114_v31 }
  0x21   :  { %1000 = vmatpush3.bf16.msra.mxu1 %v1115_v32  ;;  %1007 = vmatprep.subr.bf16.mxu0 %v1117_v35 }
  0x22   :  { %1029 = vmatprep.subr.bf16.mxu1 %v1118_v38 }
  0x23   :  { %633 = vmatmul.mubr.bf16.vlgmr.msra.gmra.mxu0 %v182_v45 }
  0x24   :  { %1008 = vmatpush3.bf16.msra.mxu0 %v1119_v47  ;;  %673 = vmatmul.mubr.bf16.vlgmr.msra.gmra.mxu1 %v204_v51 }
  0x25   :  { %1009 = vmatprep.subr.bf16.mxu0 %v1121_v52  ;;  %1030 = vmatpush3.bf16.msra.mxu1 %v1120_v49 }
  0x26   :  { %712 = vmatprep.mubr.bf16.mxu0 %v203_v50  ;;  %1031 = vmatprep.subr.bf16.mxu1 %v1122_v54 }
  0x27   :  { %752 = vmatprep.mubr.bf16.mxu1 %v207_v56 }
  0x28   :  { %1010 = vmatpush3.bf16.msra.mxu0 %v1123_v55 }
  0x29   :  { %1011 = vmatprep.subr.bf16.mxu0 %v1125_v58  ;;  %1032 = vmatpush3.bf16.msra.mxu1 %v1124_v57 }
  0x2a   :  { %1033 = vmatprep.subr.bf16.mxu1 %v1126_v59 }
  0x2c   :  { %1012 = vmatpush3.bf16.msra.mxu0 %v1127_v60 }
  0x2d   :  { %1013 = vmatprep.subr.bf16.mxu0 %v1129_v62  ;;  %1034 = vmatpush3.bf16.msra.mxu1 %v1128_v61 }
  0x2e   :  { %1035 = vmatprep.subr.bf16.mxu1 %v1130_v63 }
  0x30   :  { %1014 = vmatpush3.bf16.msra.mxu0 %v1131_v0 }
  0x31   :  { %1015 = vmatprep.subr.bf16.mxu0 %v1133_v2  ;;  %1036 = vmatpush3.bf16.msra.mxu1 %v1132_v1 }
  0x32   :  { %1037 = vmatprep.subr.bf16.mxu1 %v1134_v3 }
  0x34   :  { %1016 = vmatpush3.bf16.msra.mxu0 %v1135_v4 }
  0x35   :  { %1017 = vmatprep.subr.bf16.mxu0 %v1137_v6  ;;  %1038 = vmatpush3.bf16.msra.mxu1 %v1136_v5 }
  0x36   :  { %1039 = vmatprep.subr.bf16.mxu1 %v1138_v7 }
  0x38   :  { %1018 = vmatpush3.bf16.msra.mxu0 %v1139_v8 }
  0x39   :  { %1019 = vmatprep.subr.bf16.mxu0 %v1141_v10  ;;  %1040 = vmatpush3.bf16.msra.mxu1 %v1140_v9 }
  0x3a   :  { %10 = vsyncpa [#allocation3], 0  ;;  %1041 = vmatprep.subr.bf16.mxu1 %v1142_v11  ;;  %v1146_v15 = vld [vmem:[%s1455_s1 + $0x1c0] sm:$0xff]   ;;  %v189_v17 = vrot.slane %v1322_v43, %v1318_v41  ;;  %v1149_v20 = vld [vmem:[%s1457_s3 + $0x38] sm:$0xff]   ;;  %v1180_v21 = vmov 0.0   ;;  %vm1181_vm0 = vmmov 0  }
  0x3b   :  { %v1147_v16 = vld [vmem:[%s1455_s1 + $0x100] sm:$0xff]   ;;  %v1150_v22 = vld [vmem:[%s1457_s3 + $0x30] sm:$0xff]   ;;  %v1151_v23 = vld [vmem:[%s1457_s3 + $0x28] sm:$0xff]   ;;  %s1182_s12 = smov [#allocation2]   ;;  %vm873_vm1 = vcmask 9216  }
  0x3c   :  { %1020 = vmatpush3.bf16.msra.mxu0 %v1143_v12  ;;  %v1148_v18 = vld [vmem:[%s1455_s1 + $0x180] sm:$0xff]   ;;  %v205_v19 = vcombine.high %v189_v17, %v189_v17  ;;  %v1153_v25 = vld [vmem:[%s1457_s3 + $0x18] sm:$0xff]   ;;  %v1154_v26 = vld [vmem:[%s1457_s3 + $0x10] sm:$0xff]   ;;  %s881_s0 = sshll.u32 %s1182_s12, 4  ;;  %s882_s0 = int_to_ptr.vmem [resolvable:$true] %s881_s0 }
  0x3d   :  { %1021 = vmatprep.subr.bf16.mxu0 %v1145_v13  ;;  %1042 = vmatpush3.bf16.msra.mxu1 %v1144_v14  ;;  %v1152_v24 = vld [vmem:[%s1457_s3 + $0x20] sm:$0xff]   ;;  %v1155_v27 = vld [vmem:[%s1457_s3 + $0x8] sm:$0xff]   ;;  %s1157_s13 = scalar_lea.vmem %s882_s0, 32  ;;  %p1162_p1 = scmp.lt.s32.totalorder %s882_s0, %s882_s0 }
  0x3e   :  { %1043 = vmatprep.subr.bf16.mxu1 %v1146_v15  ;;  %v1156_v28 = vld [vmem:[%s1457_s3] sm:$0xff]   ;;  %p1158_p0 = scmp.ne.s32.totalorder %s882_s0, %s1157_s13  ;;  %p1163_p2 = scmp.lt.s32.totalorder %s1157_s13, %s1157_s13 }
  0x3f   :  { %v889_v38 = vld [vmem:[%s1456_s2] ss:$0 sm:$0xff] }
  0x40   :  { %1022 = vmatpush3.bf16.msra.mxu0 %v1147_v16  ;;  %v954_v56 = vld [vmem:[%s1458_s4] ss:$0 sm:$0xff]  ;;  %p1164_p3 = por %p1163_p2, %p1162_p1 }
  0x41   :  { %1044 = vmatpush3.bf16.msra.mxu1 %v1148_v18  ;;  %1060 = vmatprep.subr.bf16.mxu0 %v1180_v21 }
  0x42   :  { %p1165_p4 = pnand %p1164_p3, %p1158_p0 }
  0x43   :  { %713 = vmatmul.mubr.bf16.vlgmr.msra.gmra.mxu0 %v189_v17 }
  0x44   :  { %753 = vmatmul.mubr.bf16.vlgmr.msra.gmra.mxu1 %v205_v19  ;;  %1061 = vmatpush3.bf16.msra.mxu0 %v1149_v20 }
  0x45   :  { %1062 = vmatprep.subr.bf16.mxu0 %v1180_v21  ;;  %1076 = vmatprep.mubr.msk.bf16.mxu0 %vm1181_vm0, %v1180_v21 }
  0x48   :  { %1063 = vmatpush3.bf16.msra.mxu0 %v1150_v22 }
  0x49   :  { %1064 = vmatprep.subr.bf16.mxu0 %v1180_v21 }
  0x4c   :  { %1065 = vmatpush3.bf16.msra.mxu0 %v1151_v23 }
  0x4d   :  { %1066 = vmatprep.subr.bf16.mxu0 %v1180_v21 }
  0x50   :  { %1067 = vmatpush3.bf16.msra.mxu0 %v1152_v24 }
  0x51   :  { %1068 = vmatprep.subr.bf16.mxu0 %v1180_v21 }
  0x54   :  { %1069 = vmatpush3.bf16.msra.mxu0 %v1153_v25 }
  0x55   :  { %1070 = vmatprep.subr.bf16.mxu0 %v1180_v21 }
  0x58   :  { %1071 = vmatpush3.bf16.msra.mxu0 %v1154_v26 }
  0x59   :  { %1072 = vmatprep.subr.bf16.mxu0 %v1180_v21 }
  0x5c   :  { %1073 = vmatpush3.bf16.msra.mxu0 %v1155_v27 }
  0x5d   :  { %1074 = vmatprep.subr.bf16.mxu0 %v1180_v21 }
  0x60   :  { %1075 = vmatpush3.bf16.msra.mxu0 %v1156_v28 }
  0xe3   :  { %v979_v29 = vpop.f32.mrf.mxu0 }
  0xe4   :  { %v1001_v30 = vpop.f32.mrf.mxu1 }
  0xe5   :  { %v980_v31 = vpop.f32.mrf.mxu0 }
  0xe6   :  { %v1002_v32 = vpop.f32.mrf.mxu1  ;;  %v981_v37 = vadd.f32 %v980_v31, %v979_v29 }
  0xe7   :  { %v982_v33 = vpop.f32.mrf.mxu0  ;;  %v1003_v40 = vadd.f32 %v1002_v32, %v1001_v30 }
  0xe8   :  { %v1004_v34 = vpop.f32.mrf.mxu1  ;;  %v635_v39 = vadd.f32 %v981_v37, %v889_v38 }
  0xe9   :  { %v983_v35 = vpop.f32.mrf.mxu0 }
  0xea   :  { %v1005_v36 = vpop.f32.mrf.mxu1  ;;  %v675_v44 = vadd.f32 %v1003_v40, %v635_v39 }
 0x103   :  { %v1023_v41 = vpop.f32.mrf.mxu0 }
 0x104   :  { %v1045_v42 = vpop.f32.mrf.mxu1 }
 0x105   :  { %v1024_v43 = vpop.f32.mrf.mxu0 }
 0x106   :  { %v1025_v45 = vadd.f32 %v1024_v43, %v1023_v41  ;;  %v1046_v46 = vpop.f32.mrf.mxu1 }
 0x107   :  { %v1026_v47 = vpop.f32.mrf.mxu0  ;;  %v1047_v49 = vadd.f32 %v1046_v46, %v1045_v42 }
 0x108   :  { %v715_v48 = vadd.f32 %v1025_v45, %v675_v44  ;;  %v1048_v50 = vpop.f32.mrf.mxu1 }
 0x109   :  { %v1027_v51 = vpop.f32.mrf.mxu0 }
 0x10a   :  { %v755_v52 = vadd.f32 %v1047_v49, %v715_v48  ;;  %v1049_v53 = vpop.f32.mrf.mxu1 }
 0x10c   :  { %v760_v54 = vmax.f32 %v755_v52, 0.0 }
 0x10e   :  { %v761_v55 = vpack.c.bf16 %v760_v54, %v760_v54 }
 0x110   :  { %1077 = vmatmul.mubr.bf16.vlgmr.msra.gmra.mxu0 %v761_v55 }
 0x1d0   :  { %v867_v57 = vpop.f32.mrf.mxu0 }
 0x1d1   :  { %v868_v58 = vadd.f32 %v954_v56, %v867_v57 }
 0x1d2   :  { %v1078_v59 = vpop.f32.mrf.mxu0 }
 0x1d3   :  { %874 = vst.msk [vmem:[#allocation2] sm:$0x3] %vm873_vm1, %v868_v58 }
 0x1d4   :  { %v870_v60 = vpop.f32.mrf.mxu0 }
 0x1d5   :  { %1168 = shalt.err (!%p1165_p4)
}
 0x1d6   :  { %884 = dma.vmem_to_hbm [thread:$0]  %s882_s0, 32, %s1459_s5, [#allocation3]   ;;  %v1079_v61 = vpop.f32.mrf.mxu0 }
 0x1d7   :  { %1177 = dma.done.wait [#allocation3], 32  }
 0x1d8   :  { %1178 = vsyncadd [#allocation3], 4294967264 }
 0x1d9   :  { %888 = vsyncpa [#allocation3], 1 }

</bundles_post_ra>
